<compile_context>
chip_gen: v7x
topology: tpu7x:2x2x1
jax: 0.10.0
libtpu: 0.0.40
codegen_flags: <defaults>
</compile_context>

<pallas_src>
import numpy as np
import jax
import jax.numpy as jnp
from jax.experimental import pallas as pl
from jax.experimental.pallas import tpu as pltpu

NEG_SLOPE = 0.2
BN_EPS = 1e-5


def _leaky(x):
    return jnp.where(x >= 0, x, NEG_SLOPE * x)


def _full_spec(a):
    nd = a.ndim
    return pl.BlockSpec(a.shape, lambda g, _nd=nd: (0,) * _nd)


# ----------------------------------------------------------------------------
# Host-side (tiny) weight / constant preprocessing
# ----------------------------------------------------------------------------
def _banded_conv_weights(w, w_out):
    """w: (K,K,Cin,Cout) HWIO  ->  (K, (w_out+K-1)*Cin, w_out*Cout).

    T[ky][(wo+kx)*Cin+ci, wo*Cout+co] = w[ky,kx,ci,co], so a stride-1 'same'
    conv becomes K matmuls of the padded rows against T[ky]."""
    K = w.shape[0]
    wp = w_out + K - 1
    mats = []
    for ky in range(K):
        t = None
        for kx in range(K):
            shift = jnp.asarray(np.eye(wp, w_out, k=-kx, dtype=np.float32))
            blk = jnp.kron(shift, w[ky, kx])
            t = blk if t is None else t + blk
        mats.append(t)
    return jnp.stack(mats)


def _pool_matrices(h, w, c):
    """2x2 average pool (== bilinear x0.5 on even sizes) as row/col matmuls.
    Returns rq (Ho,H) with the 0.25 folded in, and cm (W*c, Wo*c)."""
    ho, wo = h // 2, w // 2
    rq = 0.25 * np.repeat(np.eye(ho, dtype=np.float32), 2, axis=1)
    cm = np.kron(np.repeat(np.eye(wo, dtype=np.float32), 2, axis=0),
                 np.eye(c, dtype=np.float32))
    return jnp.asarray(rq), jnp.asarray(cm)


def _channel_fold(w, c):
    """(w*c, c) 0/1 matrix that sums the W groups -> per-channel reduction."""
    return jnp.asarray(np.kron(np.ones((w, 1), np.float32),
                               np.eye(c, dtype=np.float32)))


def _tile_cols(v, w):
    """(c,) -> (1, w*c): per-channel vector tiled across the W groups."""
    return jnp.tile(v, w).reshape(1, -1)


def _bn_scale_shift(stats, gamma, beta, count):
    """stats: (N, 2, C) per-image [sum, sumsq].  Training-mode BatchNorm."""
    s = jnp.sum(stats[:, 0, :], axis=0)
    ss = jnp.sum(stats[:, 1, :], axis=0)
    mean = s / count
    var = ss / count - mean * mean           # biased variance (PyTorch norm)
    scale = gamma * jax.lax.rsqrt(var + BN_EPS)
    shift = beta - mean * scale
    return scale, shift


# ----------------------------------------------------------------------------
# Kernel A: conv1+lrelu+conv2+lrelu, bn1 partial stats, 2x2 pool of main & skip
# ----------------------------------------------------------------------------
def head_pool_call(x_flat, w1, b1, w2, b2, *, n):
    N, H, WC3 = x_flat.shape
    W = WC3 // 3
    Ho, Wo = H // 2, W // 2
    C = n
    K1, P1 = 7, 3
    Hp, Wp = H + 2 * P1, W + 2 * P1

    t1 = _banded_conv_weights(w1, W)                       # (7, Wp*3, W*C)
    b1t = _tile_cols(b1, W)                                # (1, W*C)
    w2b = jnp.kron(jnp.eye(W, dtype=jnp.float32), w2[0, 0])  # (W*C, W*C)
    b2t = _tile_cols(b2, W)
    rq, cmc = _pool_matrices(H, W, C)                      # (Ho,H), (W*C, Wo*C)
    _, cm3 = _pool_matrices(H, W, 3)                       # (W*3, Wo*3)
    gfold = _channel_fold(W, C)                            # (W*C, C)

    def kernel(x_ref, t1_ref, b1_ref, w2_ref, b2_ref, rq_ref, cmc_ref, cm3_ref,
               g_ref, main_ref, skip_ref, st_ref, xp_ref):
        # zero-padded input in VMEM scratch (no HBM pad round trip)
        xp_ref[...] = jnp.zeros_like(xp_ref)
        x = x_ref[0]                                            # (H, W*3)
        xp_ref[P1:P1 + H, P1 * 3:P1 * 3 + W * 3] = x
        # conv1: 7 row-shifted lane-dense matmuls
        acc = jnp.zeros((H, W * C), jnp.float32)
        for ky in range(K1):
            acc = acc + jnp.dot(xp_ref[ky:ky + H, :], t1_ref[ky],
                                preferred_element_type=jnp.float32)
        h = _leaky(acc + b1_ref[...])
        # conv2 (1x1) as block-diagonal matmul, still lane-dense
        h = _leaky(jnp.dot(h, w2_ref[...], preferred_element_type=jnp.float32)
                   + b2_ref[...])
        # bn1 per-image partial sums (full-resolution statistics)
        s1 = jnp.dot(jnp.sum(h, axis=0, keepdims=True), g_ref[...],
                     preferred_element_type=jnp.float32)
        s2 = jnp.dot(jnp.sum(h * h, axis=0, keepdims=True), g_ref[...],
                     preferred_element_type=jnp.float32)
        st_ref[0, 0:1, :] = s1
        st_ref[0, 1:2, :] = s2
        # 2x2 average pool of the (pre-bn1) features and of the raw input.
        main_ref[0] = jnp.dot(
            jnp.dot(rq_ref[...], h, preferred_element_type=jnp.float32),
            cmc_ref[...], preferred_element_type=jnp.float32)
        skip_ref[0] = jnp.dot(
            jnp.dot(rq_ref[...], x, preferred_element_type=jnp.float32),
            cm3_ref[...], preferred_element_type=jnp.float32)

    return pl.pallas_call(
        kernel,
        out_shape=(jax.ShapeDtypeStruct((N, Ho, Wo * C), jnp.float32),
                   jax.ShapeDtypeStruct((N, Ho, Wo * 3), jnp.float32),
                   jax.ShapeDtypeStruct((N, 2, C), jnp.float32)),
        grid=(N,),
        in_specs=[pl.BlockSpec((1, H, W * 3), lambda g: (g, 0, 0)),
                  _full_spec(t1), _full_spec(b1t), _full_spec(w2b),
                  _full_spec(b2t), _full_spec(rq), _full_spec(cmc),
                  _full_spec(cm3), _full_spec(gfold)],
        out_specs=(pl.BlockSpec((1, Ho, Wo * C), lambda g: (g, 0, 0)),
                   pl.BlockSpec((1, Ho, Wo * 3), lambda g: (g, 0, 0)),
                   pl.BlockSpec((1, 2, C), lambda g: (g, 0, 0))),
        scratch_shapes=[pltpu.VMEM((Hp, Wp * 3), jnp.float32)],
        compiler_params=pltpu.CompilerParams(dimension_semantics=("parallel",)),
    )(x_flat, t1, b1t, w2b, b2t, rq, cmc, cm3, gfold)


# ----------------------------------------------------------------------------
# Kernels B/C/D: BN-affine(+lrelu/+residual) prologue, 3x3 conv, BN-stats epi.
# ----------------------------------------------------------------------------
def fused_conv3x3_call(x, scale, shift, w3x3, *, act=False, residual=None,
                       emit_affine=False, n=16):
    """y = conv3x3( maybe_lrelu(x*scale+shift) [+ residual] ).
    Also emits per-image (sum, sumsq) of y for the following BatchNorm and,
    optionally, the affined input (needed as a later skip connection)."""
    N, Ho, WoC = x.shape
    C = n
    Wo = WoC // C
    K, P = 3, 1
    Hp, Wp = Ho + 2 * P, Wo + 2 * P

    tw = _banded_conv_weights(w3x3, Wo)        # (3, Wp*C, Wo*C)
    sc_row = _tile_cols(scale, Wo)
    sh_row = _tile_cols(shift, Wo)
    gfold = _channel_fold(Wo, C)
    has_res = residual is not None

    def kernel(x_ref, s_ref, t_ref, w_ref, g_ref, *rest):
        rest = list(rest)
        res_ref = rest.pop(0) if has_res else None
        aff_ref = rest.pop(0) if emit_affine else None
        o_ref, st_ref, xp_ref = rest
        y = x_ref[0] * s_ref[...] + t_ref[...]
        if act:
            y = _leaky(y)
        if has_res:
            y = y + res_ref[0]
        if emit_affine:
            aff_ref[0] = y
        xp_ref[...] = jnp.zeros_like(xp_ref)
        xp_ref[P:P + Ho, P * C:P * C + Wo * C] = y
        acc = jnp.zeros((Ho, Wo * C), jnp.float32)
        for ky in range(K):
            acc = acc + jnp.dot(xp_ref[ky:ky + Ho, :], w_ref[ky],
                                preferred_element_type=jnp.float32)
        o_ref[0] = acc
        s1 = jnp.dot(jnp.sum(acc, axis=0, keepdims=True), g_ref[...],
                     preferred_element_type=jnp.float32)
        s2 = jnp.dot(jnp.sum(acc * acc, axis=0, keepdims=True), g_ref[...],
                     preferred_element_type=jnp.float32)
        st_ref[0, 0:1, :] = s1
        st_ref[0, 1:2, :] = s2

    act_spec = pl.BlockSpec((1, Ho, Wo * C), lambda g: (g, 0, 0))
    in_specs = [act_spec, _full_spec(sc_row), _full_spec(sh_row),
                _full_spec(tw), _full_spec(gfold)]
    args = [x, sc_row, sh_row, tw, gfold]
    if has_res:
        in_specs.append(act_spec)
        args.append(residual)
    out_shape, out_specs = [], []
    if emit_affine:
        out_shape.append(jax.ShapeDtypeStruct((N, Ho, Wo * C), jnp.float32))
        out_specs.append(act_spec)
    out_shape += [jax.ShapeDtypeStruct((N, Ho, Wo * C), jnp.float32),
                  jax.ShapeDtypeStruct((N, 2, C), jnp.float32)]
    out_specs += [act_spec, pl.BlockSpec((1, 2, C), lambda g: (g, 0, 0))]

    return pl.pallas_call(
        kernel,
        out_shape=tuple(out_shape),
        grid=(N,),
        in_specs=in_specs,
        out_specs=tuple(out_specs),
        scratch_shapes=[pltpu.VMEM((Hp, Wp * C), jnp.float32)],
        compiler_params=pltpu.CompilerParams(dimension_semantics=("parallel",)),
    )(*args)


# ----------------------------------------------------------------------------
# Kernel E: bn2 affine + residual -> conv4 (7x7, C->3) + bias + pooled-x skip
# ----------------------------------------------------------------------------
def tail_conv7_call(x, scale, shift, resid, skip, w4, b4, *, n=16):
    N, Ho, WoC = x.shape
    C = n
    Wo = WoC // C
    K, P = 7, 3
    Hp, Wp = Ho + 2 * P, Wo + 2 * P

    tw = _banded_conv_weights(w4, Wo)          # (7, Wp*C, Wo*3)
    sc_row = _tile_cols(scale, Wo)
    sh_row = _tile_cols(shift, Wo)
    b4_row = _tile_cols(b4, Wo)                # (1, Wo*3)

    def kernel(x_ref, s_ref, t_ref, r_ref, k_ref, w_ref, b_ref, o_ref, xp_ref):
        y = x_ref[0] * s_ref[...] + t_ref[...] + r_ref[0]
        xp_ref[...] = jnp.zeros_like(xp_ref)
        xp_ref[P:P + Ho, P * C:P * C + Wo * C] = y
        acc = jnp.zeros((Ho, Wo * 3), jnp.float32)
        for ky in range(K):
            acc = acc + jnp.dot(xp_ref[ky:ky + Ho, :], w_ref[ky],
                                preferred_element_type=jnp.float32)
        o_ref[0] = acc + b_ref[...] + k_ref[0]

    act_spec = pl.BlockSpec((1, Ho, Wo * C), lambda g: (g, 0, 0))
    skip_spec = pl.BlockSpec((1, Ho, Wo * 3), lambda g: (g, 0, 0))
    return pl.pallas_call(
        kernel,
        out_shape=jax.ShapeDtypeStruct((N, Ho, Wo * 3), jnp.float32),
        grid=(N,),
        in_specs=[act_spec, _full_spec(sc_row), _full_spec(sh_row), act_spec,
                  skip_spec, _full_spec(tw), _full_spec(b4_row)],
        out_specs=skip_spec,
        scratch_shapes=[pltpu.VMEM((Hp, Wp * C), jnp.float32)],
        compiler_params=pltpu.CompilerParams(dimension_semantics=("parallel",)),
    )(x, sc_row, sh_row, resid, skip, tw, b4_row)


# ----------------------------------------------------------------------------
# Full Resizer forward (scale_factor=0.5, r=1, n=16, bilinear)
# ----------------------------------------------------------------------------
def resizer_forward(x_nchw, p):
    N, cin, H, W = x_nchw.shape
    assert cin == 3 and H % 2 == 0 and W % 2 == 0, "RGB input with even H,W"
    n = p['w1'].shape[-1]
    Ho, Wo = H // 2, W // 2

    # NCHW -> lane-flattened NHWC:  (N, H, W*3)
    x_flat = jnp.transpose(x_nchw, (0, 2, 3, 1)).reshape(N, H, W * 3)

    # head: conv1+lrelu+conv2+lrelu, bn1 stats, 2x2 avg-pool of main and skip
    main_raw, skip, st1 = head_pool_call(x_flat, p['w1'], p['b1'],
                                         p['w2'], p['b2'], n=n)
    s1, t1 = _bn_scale_shift(st1, p['bn1_g'], p['bn1_b'], N * H * W)

    # ResBlock (bn1 affine applied post-pool; commutes with average pooling)
    main_path, r1, st_rb1 = fused_conv3x3_call(
        main_raw, s1, t1, p['rb_w1'], emit_affine=True, n=n)
    s_rb1, t_rb1 = _bn_scale_shift(st_rb1, p['rb_bn1_g'], p['rb_bn1_b'],
                                   N * Ho * Wo)
    r2, st_rb2 = fused_conv3x3_call(r1, s_rb1, t_rb1, p['rb_w2'], act=True, n=n)
    s_rb2, t_rb2 = _bn_scale_shift(st_rb2, p['rb_bn2_g'], p['rb_bn2_b'],
                                   N * Ho * Wo)

    # conv3 on (rb_bn2(r2) + main_path), bn2 stats
    c3, st2 = fused_conv3x3_call(r2, s_rb2, t_rb2, p['w3'],
                                 residual=main_path, n=n)
    s2, t2 = _bn_scale_shift(st2, p['bn2_g'], p['bn2_b'], N * Ho * Wo)

    # tail: bn2 + main_path skip -> conv4 + bias + pooled-input skip
    out = tail_conv7_call(c3, s2, t2, main_path, skip, p['w4'], p['b4'], n=n)
    return jnp.transpose(out.reshape(N, Ho, Wo, 3), (0, 3, 1, 2))


if __name__ == "__main__":
    key = jax.random.PRNGKey(0)
    ks = jax.random.split(key, 10)
    n = 16

    def w_init(k, shape, fan_in):  # mimics torch Conv2d default init
        bound = 1.0 / (fan_in ** 0.5)
        return jax.random.uniform(k, shape, jnp.float32, -bound, bound)

    params = {
        'w1': w_init(ks[0], (7, 7, 3, n), 3 * 49), 'b1': w_init(ks[1], (n,), 3 * 49),
        'w2': w_init(ks[2], (1, 1, n, n), n),      'b2': w_init(ks[3], (n,), n),
        'bn1_g': jnp.ones((n,), jnp.float32), 'bn1_b': jnp.zeros((n,), jnp.float32),
        'rb_w1': w_init(ks[4], (3, 3, n, n), n * 9),
        'rb_bn1_g': jnp.ones((n,), jnp.float32), 'rb_bn1_b': jnp.zeros((n,), jnp.float32),
        'rb_w2': w_init(ks[5], (3, 3, n, n), n * 9),
        'rb_bn2_g': jnp.ones((n,), jnp.float32), 'rb_bn2_b': jnp.zeros((n,), jnp.float32),
        'w3': w_init(ks[6], (3, 3, n, n), n * 9),
        'bn2_g': jnp.ones((n,), jnp.float32), 'bn2_b': jnp.zeros((n,), jnp.float32),
        'w4': w_init(ks[7], (7, 7, n, 3), n * 49), 'b4': w_init(ks[8], (3,), n * 49),
    }

    x = jax.random.normal(ks[9], (2, 3, 16, 16), jnp.float32)   # NCHW like PyTorch
    out = jax.jit(resizer_forward)(x, params)
    out = jax.block_until_ready(out)
    assert out.shape == (2, 3, 8, 8), out.shape
    assert bool(jnp.all(jnp.isfinite(out)))
    print("KERNEL_OK")
</pallas_src>

<mosaic_0001>
module attributes {stable_mosaic.version = 11 : i64} {
  func.func @kernel(%arg0: i32, %arg1: memref<1x16x48xf32, #tpu.memory_space<vmem>>, %arg2: memref<7x66x256xf32, #tpu.memory_space<vmem>>, %arg3: memref<1x256xf32, #tpu.memory_space<vmem>>, %arg4: memref<256x256xf32, #tpu.memory_space<vmem>>, %arg5: memref<1x256xf32, #tpu.memory_space<vmem>>, %arg6: memref<8x16xf32, #tpu.memory_space<vmem>>, %arg7: memref<256x128xf32, #tpu.memory_space<vmem>>, %arg8: memref<48x24xf32, #tpu.memory_space<vmem>>, %arg9: memref<256x16xf32, #tpu.memory_space<vmem>>, %arg10: memref<1x8x128xf32, #tpu.memory_space<vmem>>, %arg11: memref<1x8x24xf32, #tpu.memory_space<vmem>>, %arg12: memref<1x2x16xf32, #tpu.memory_space<vmem>>, %arg13: memref<22x66xf32, #tpu.memory_space<vmem>>) attributes {dimension_semantics = [#tpu.dimension_semantics<parallel>], iteration_bounds = array<i64: 2>, scalar_prefetch = 0 : i64, scratch_operands = 1 : i64, tpu.core_type = #tpu.core_type<tc>, window_params = [{transform_indices = @transform_0, window_bounds = array<i64: 1, 16, 48>}, {pipeline_mode = #tpu.pipeline_mode<synchronous>, transform_indices = @transform_1, window_bounds = array<i64: 7, 66, 256>}, {pipeline_mode = #tpu.pipeline_mode<synchronous>, transform_indices = @transform_2, window_bounds = array<i64: 1, 256>}, {pipeline_mode = #tpu.pipeline_mode<synchronous>, transform_indices = @transform_3, window_bounds = array<i64: 256, 256>}, {pipeline_mode = #tpu.pipeline_mode<synchronous>, transform_indices = @transform_4, window_bounds = array<i64: 1, 256>}, {pipeline_mode = #tpu.pipeline_mode<synchronous>, transform_indices = @transform_5, window_bounds = array<i64: 8, 16>}, {pipeline_mode = #tpu.pipeline_mode<synchronous>, transform_indices = @transform_6, window_bounds = array<i64: 256, 128>}, {pipeline_mode = #tpu.pipeline_mode<synchronous>, transform_indices = @transform_7, window_bounds = array<i64: 48, 24>}, {pipeline_mode = #tpu.pipeline_mode<synchronous>, transform_indices = @transform_8, window_bounds = array<i64: 256, 16>}, {transform_indices = @transform_9, window_bounds = array<i64: 1, 8, 128>}, {transform_indices = @transform_10, window_bounds = array<i64: 1, 8, 24>}, {transform_indices = @transform_11, window_bounds = array<i64: 1, 2, 16>}]} {
    %cst = arith.constant 0.000000e+00 : f32
    %0 = vector.broadcast %cst : f32 to vector<22x66xf32>
    %c0 = arith.constant 0 : index
    %c0_0 = arith.constant 0 : index
    %1 = vector.load %arg13[%c0, %c0_0] : memref<22x66xf32, #tpu.memory_space<vmem>>, vector<22x66xf32>
    tpu.vector_store %arg13[%c0, %c0_0], %0 {strides = array<i32>} : memref<22x66xf32, #tpu.memory_space<vmem>>, vector<22x66xf32>,
    %c0_1 = arith.constant 0 : index
    %c0_2 = arith.constant 0 : index
    %c0_3 = arith.constant 0 : index
    %2 = vector.load %arg1[%c0_1, %c0_2, %c0_3] : memref<1x16x48xf32, #tpu.memory_space<vmem>>, vector<1x16x48xf32>
    %3 = vector.shape_cast %2 : vector<1x16x48xf32> to vector<16x48xf32>
    %c3 = arith.constant 3 : index
    %c9 = arith.constant 9 : index
    %4 = vector.load %arg13[%c3, %c9] : memref<22x66xf32, #tpu.memory_space<vmem>>, vector<16x48xf32>
    tpu.vector_store %arg13[%c3, %c9], %3 {strides = array<i32>} : memref<22x66xf32, #tpu.memory_space<vmem>>, vector<16x48xf32>,
    %cst_4 = arith.constant 0.000000e+00 : f32
    %5 = vector.broadcast %cst_4 : f32 to vector<16x256xf32>
    %c0_5 = arith.constant 0 : index
    %c0_6 = arith.constant 0 : index
    %6 = vector.load %arg13[%c0_5, %c0_6] : memref<22x66xf32, #tpu.memory_space<vmem>>, vector<16x66xf32>
    %c0_7 = arith.constant 0 : index
    %c0_8 = arith.constant 0 : index
    %c0_9 = arith.constant 0 : index
    %7 = vector.load %arg2[%c0_7, %c0_8, %c0_9] : memref<7x66x256xf32, #tpu.memory_space<vmem>>, vector<1x66x256xf32>
    %8 = vector.shape_cast %7 : vector<1x66x256xf32> to vector<66x256xf32>
    %cst_10 = arith.constant dense<0.000000e+00> : vector<16x256xf32>
    %9 = tpu.matmul %6, %8, %cst_10 {dimension_numbers = #tpu.dot_dimension_numbers<[1], [0], [0], [1], [0, 0, 1, 1], [], []>} : vector<16x66xf32>, vector<66x256xf32>, vector<16x256xf32> -> vector<16x256xf32>
    %10 = arith.addf %5, %9 : vector<16x256xf32>
    %c1 = arith.constant 1 : index
    %c0_11 = arith.constant 0 : index
    %11 = vector.load %arg13[%c1, %c0_11] : memref<22x66xf32, #tpu.memory_space<vmem>>, vector<16x66xf32>
    %c1_12 = arith.constant 1 : index
    %c0_13 = arith.constant 0 : index
    %c0_14 = arith.constant 0 : index
    %12 = vector.load %arg2[%c1_12, %c0_13, %c0_14] : memref<7x66x256xf32, #tpu.memory_space<vmem>>, vector<1x66x256xf32>
    %13 = vector.shape_cast %12 : vector<1x66x256xf32> to vector<66x256xf32>
    %cst_15 = arith.constant dense<0.000000e+00> : vector<16x256xf32>
    %14 = tpu.matmul %11, %13, %cst_15 {dimension_numbers = #tpu.dot_dimension_numbers<[1], [0], [0], [1], [0, 0, 1, 1], [], []>} : vector<16x66xf32>, vector<66x256xf32>, vector<16x256xf32> -> vector<16x256xf32>
    %15 = arith.addf %10, %14 : vector<16x256xf32>
    %c2 = arith.constant 2 : index
    %c0_16 = arith.constant 0 : index
    %16 = vector.load %arg13[%c2, %c0_16] : memref<22x66xf32, #tpu.memory_space<vmem>>, vector<16x66xf32>
    %c2_17 = arith.constant 2 : index
    %c0_18 = arith.constant 0 : index
    %c0_19 = arith.constant 0 : index
    %17 = vector.load %arg2[%c2_17, %c0_18, %c0_19] : memref<7x66x256xf32, #tpu.memory_space<vmem>>, vector<1x66x256xf32>
    %18 = vector.shape_cast %17 : vector<1x66x256xf32> to vector<66x256xf32>
    %cst_20 = arith.constant dense<0.000000e+00> : vector<16x256xf32>
    %19 = tpu.matmul %16, %18, %cst_20 {dimension_numbers = #tpu.dot_dimension_numbers<[1], [0], [0], [1], [0, 0, 1, 1], [], []>} : vector<16x66xf32>, vector<66x256xf32>, vector<16x256xf32> -> vector<16x256xf32>
    %20 = arith.addf %15, %19 : vector<16x256xf32>
    %c3_21 = arith.constant 3 : index
    %c0_22 = arith.constant 0 : index
    %21 = vector.load %arg13[%c3_21, %c0_22] : memref<22x66xf32, #tpu.memory_space<vmem>>, vector<16x66xf32>
    %c3_23 = arith.constant 3 : index
    %c0_24 = arith.constant 0 : index
    %c0_25 = arith.constant 0 : index
    %22 = vector.load %arg2[%c3_23, %c0_24, %c0_25] : memref<7x66x256xf32, #tpu.memory_space<vmem>>, vector<1x66x256xf32>
    %23 = vector.shape_cast %22 : vector<1x66x256xf32> to vector<66x256xf32>
    %cst_26 = arith.constant dense<0.000000e+00> : vector<16x256xf32>
    %24 = tpu.matmul %21, %23, %cst_26 {dimension_numbers = #tpu.dot_dimension_numbers<[1], [0], [0], [1], [0, 0, 1, 1], [], []>} : vector<16x66xf32>, vector<66x256xf32>, vector<16x256xf32> -> vector<16x256xf32>
    %25 = arith.addf %20, %24 : vector<16x256xf32>
    %c4 = arith.constant 4 : index
    %c0_27 = arith.constant 0 : index
    %26 = vector.load %arg13[%c4, %c0_27] : memref<22x66xf32, #tpu.memory_space<vmem>>, vector<16x66xf32>
    %c4_28 = arith.constant 4 : index
    %c0_29 = arith.constant 0 : index
    %c0_30 = arith.constant 0 : index
    %27 = vector.load %arg2[%c4_28, %c0_29, %c0_30] : memref<7x66x256xf32, #tpu.memory_space<vmem>>, vector<1x66x256xf32>
    %28 = vector.shape_cast %27 : vector<1x66x256xf32> to vector<66x256xf32>
    %cst_31 = arith.constant dense<0.000000e+00> : vector<16x256xf32>
    %29 = tpu.matmul %26, %28, %cst_31 {dimension_numbers = #tpu.dot_dimension_numbers<[1], [0], [0], [1], [0, 0, 1, 1], [], []>} : vector<16x66xf32>, vector<66x256xf32>, vector<16x256xf32> -> vector<16x256xf32>
    %30 = arith.addf %25, %29 : vector<16x256xf32>
    %c5 = arith.constant 5 : index
    %c0_32 = arith.constant 0 : index
    %31 = vector.load %arg13[%c5, %c0_32] : memref<22x66xf32, #tpu.memory_space<vmem>>, vector<16x66xf32>
    %c5_33 = arith.constant 5 : index
    %c0_34 = arith.constant 0 : index
    %c0_35 = arith.constant 0 : index
    %32 = vector.load %arg2[%c5_33, %c0_34, %c0_35] : memref<7x66x256xf32, #tpu.memory_space<vmem>>, vector<1x66x256xf32>
    %33 = vector.shape_cast %32 : vector<1x66x256xf32> to vector<66x256xf32>
    %cst_36 = arith.constant dense<0.000000e+00> : vector<16x256xf32>
    %34 = tpu.matmul %31, %33, %cst_36 {dimension_numbers = #tpu.dot_dimension_numbers<[1], [0], [0], [1], [0, 0, 1, 1], [], []>} : vector<16x66xf32>, vector<66x256xf32>, vector<16x256xf32> -> vector<16x256xf32>
    %35 = arith.addf %30, %34 : vector<16x256xf32>
    %c6 = arith.constant 6 : index
    %c0_37 = arith.constant 0 : index
    %36 = vector.load %arg13[%c6, %c0_37] : memref<22x66xf32, #tpu.memory_space<vmem>>, vector<16x66xf32>
    %c6_38 = arith.constant 6 : index
    %c0_39 = arith.constant 0 : index
    %c0_40 = arith.constant 0 : index
    %37 = vector.load %arg2[%c6_38, %c0_39, %c0_40] : memref<7x66x256xf32, #tpu.memory_space<vmem>>, vector<1x66x256xf32>
    %38 = vector.shape_cast %37 : vector<1x66x256xf32> to vector<66x256xf32>
    %cst_41 = arith.constant dense<0.000000e+00> : vector<16x256xf32>
    %39 = tpu.matmul %36, %38, %cst_41 {dimension_numbers = #tpu.dot_dimension_numbers<[1], [0], [0], [1], [0, 0, 1, 1], [], []>} : vector<16x66xf32>, vector<66x256xf32>, vector<16x256xf32> -> vector<16x256xf32>
    %40 = arith.addf %35, %39 : vector<16x256xf32>
    %c0_42 = arith.constant 0 : index
    %c0_43 = arith.constant 0 : index
    %41 = vector.load %arg3[%c0_42, %c0_43] : memref<1x256xf32, #tpu.memory_space<vmem>>, vector<1x256xf32>
    %42 = vector.broadcast %41 : vector<1x256xf32> to vector<16x256xf32>
    %43 = arith.addf %40, %42 : vector<16x256xf32>
    %cst_44 = arith.constant 0.000000e+00 : f32
    %44 = vector.broadcast %cst_44 : f32 to vector<16x256xf32>
    %45 = arith.cmpf oge, %43, %44 : vector<16x256xf32>
    %cst_45 = arith.constant 2.000000e-01 : f32
    %46 = vector.broadcast %cst_45 : f32 to vector<16x256xf32>
    %47 = arith.mulf %46, %43 : vector<16x256xf32>
    %48 = arith.select %45, %43, %47 : vector<16x256xi1>, vector<16x256xf32>
    %c0_46 = arith.constant 0 : index
    %c0_47 = arith.constant 0 : index
    %49 = vector.load %arg4[%c0_46, %c0_47] : memref<256x256xf32, #tpu.memory_space<vmem>>, vector<256x256xf32>
    %cst_48 = arith.constant dense<0.000000e+00> : vector<16x256xf32>
    %50 = tpu.matmul %48, %49, %cst_48 {dimension_numbers = #tpu.dot_dimension_numbers<[1], [0], [0], [1], [0, 0, 1, 1], [], []>} : vector<16x256xf32>, vector<256x256xf32>, vector<16x256xf32> -> vector<16x256xf32>
    %c0_49 = arith.constant 0 : index
    %c0_50 = arith.constant 0 : index
    %51 = vector.load %arg5[%c0_49, %c0_50] : memref<1x256xf32, #tpu.memory_space<vmem>>, vector<1x256xf32>
    %52 = vector.broadcast %51 : vector<1x256xf32> to vector<16x256xf32>
    %53 = arith.addf %50, %52 : vector<16x256xf32>
    %cst_51 = arith.constant 0.000000e+00 : f32
    %54 = vector.broadcast %cst_51 : f32 to vector<16x256xf32>
    %55 = arith.cmpf oge, %53, %54 : vector<16x256xf32>
    %cst_52 = arith.constant 2.000000e-01 : f32
    %56 = vector.broadcast %cst_52 : f32 to vector<16x256xf32>
    %57 = arith.mulf %56, %53 : vector<16x256xf32>
    %58 = arith.select %55, %53, %57 : vector<16x256xi1>, vector<16x256xf32>
    %cst_53 = arith.constant dense<0.000000e+00> : vector<256xf32>
    %59 = vector.multi_reduction <add>, %58, %cst_53 [0] : vector<16x256xf32> to vector<256xf32>
    %60 = vector.shape_cast %59 : vector<256xf32> to vector<1x256xf32>
    %c0_54 = arith.constant 0 : index
    %c0_55 = arith.constant 0 : index
    %61 = vector.load %arg9[%c0_54, %c0_55] : memref<256x16xf32, #tpu.memory_space<vmem>>, vector<256x16xf32>
    %cst_56 = arith.constant dense<0.000000e+00> : vector<1x16xf32>
    %62 = tpu.matmul %60, %61, %cst_56 {dimension_numbers = #tpu.dot_dimension_numbers<[1], [0], [0], [1], [0, 0, 1, 1], [], []>} : vector<1x256xf32>, vector<256x16xf32>, vector<1x16xf32> -> vector<1x16xf32>
    %63 = arith.mulf %58, %58 : vector<16x256xf32>
    %cst_57 = arith.constant dense<0.000000e+00> : vector<256xf32>
    %64 = vector.multi_reduction <add>, %63, %cst_57 [0] : vector<16x256xf32> to vector<256xf32>
    %65 = vector.shape_cast %64 : vector<256xf32> to vector<1x256xf32>
    %c0_58 = arith.constant 0 : index
    %c0_59 = arith.constant 0 : index
    %66 = vector.load %arg9[%c0_58, %c0_59] : memref<256x16xf32, #tpu.memory_space<vmem>>, vector<256x16xf32>
    %cst_60 = arith.constant dense<0.000000e+00> : vector<1x16xf32>
    %67 = tpu.matmul %65, %66, %cst_60 {dimension_numbers = #tpu.dot_dimension_numbers<[1], [0], [0], [1], [0, 0, 1, 1], [], []>} : vector<1x256xf32>, vector<256x16xf32>, vector<1x16xf32> -> vector<1x16xf32>
    %c0_61 = arith.constant 0 : index
    %c0_62 = arith.constant 0 : index
    %c0_63 = arith.constant 0 : index
    %68 = vector.load %arg12[%c0_61, %c0_62, %c0_63] : memref<1x2x16xf32, #tpu.memory_space<vmem>>, vector<1x1x16xf32>
    %69 = vector.shape_cast %68 : vector<1x1x16xf32> to vector<1x16xf32>
    %70 = vector.shape_cast %62 : vector<1x16xf32> to vector<1x1x16xf32>
    tpu.vector_store %arg12[%c0_61, %c0_62, %c0_63], %70 {strides = array<i32>} : memref<1x2x16xf32, #tpu.memory_space<vmem>>, vector<1x1x16xf32>,
    %c0_64 = arith.constant 0 : index
    %c1_65 = arith.constant 1 : index
    %c0_66 = arith.constant 0 : index
    %71 = vector.load %arg12[%c0_64, %c1_65, %c0_66] : memref<1x2x16xf32, #tpu.memory_space<vmem>>, vector<1x1x16xf32>
    %72 = vector.shape_cast %71 : vector<1x1x16xf32> to vector<1x16xf32>
    %73 = vector.shape_cast %67 : vector<1x16xf32> to vector<1x1x16xf32>
    tpu.vector_store %arg12[%c0_64, %c1_65, %c0_66], %73 {strides = array<i32>} : memref<1x2x16xf32, #tpu.memory_space<vmem>>, vector<1x1x16xf32>,
    %c0_67 = arith.constant 0 : index
    %c0_68 = arith.constant 0 : index
    %74 = vector.load %arg6[%c0_67, %c0_68] : memref<8x16xf32, #tpu.memory_space<vmem>>, vector<8x16xf32>
    %cst_69 = arith.constant dense<0.000000e+00> : vector<8x256xf32>
    %75 = tpu.matmul %74, %58, %cst_69 {dimension_numbers = #tpu.dot_dimension_numbers<[1], [0], [0], [1], [0, 0, 1, 1], [], []>} : vector<8x16xf32>, vector<16x256xf32>, vector<8x256xf32> -> vector<8x256xf32>
    %c0_70 = arith.constant 0 : index
    %c0_71 = arith.constant 0 : index
    %76 = vector.load %arg7[%c0_70, %c0_71] : memref<256x128xf32, #tpu.memory_space<vmem>>, vector<256x128xf32>
    %cst_72 = arith.constant dense<0.000000e+00> : vector<8x128xf32>
    %77 = tpu.matmul %75, %76, %cst_72 {dimension_numbers = #tpu.dot_dimension_numbers<[1], [0], [0], [1], [0, 0, 1, 1], [], []>} : vector<8x256xf32>, vector<256x128xf32>, vector<8x128xf32> -> vector<8x128xf32>
    %c0_73 = arith.constant 0 : index
    %c0_74 = arith.constant 0 : index
    %c0_75 = arith.constant 0 : index
    %78 = vector.load %arg10[%c0_73, %c0_74, %c0_75] : memref<1x8x128xf32, #tpu.memory_space<vmem>>, vector<1x8x128xf32>
    %79 = vector.shape_cast %78 : vector<1x8x128xf32> to vector<8x128xf32>
    %80 = vector.shape_cast %77 : vector<8x128xf32> to vector<1x8x128xf32>
    tpu.vector_store %arg10[%c0_73, %c0_74, %c0_75], %80 {strides = array<i32>} : memref<1x8x128xf32, #tpu.memory_space<vmem>>, vector<1x8x128xf32>,
    %c0_76 = arith.constant 0 : index
    %c0_77 = arith.constant 0 : index
    %81 = vector.load %arg6[%c0_76, %c0_77] : memref<8x16xf32, #tpu.memory_space<vmem>>, vector<8x16xf32>
    %cst_78 = arith.constant dense<0.000000e+00> : vector<8x48xf32>
    %82 = tpu.matmul %81, %3, %cst_78 {dimension_numbers = #tpu.dot_dimension_numbers<[1], [0], [0], [1], [0, 0, 1, 1], [], []>} : vector<8x16xf32>, vector<16x48xf32>, vector<8x48xf32> -> vector<8x48xf32>
    %c0_79 = arith.constant 0 : index
    %c0_80 = arith.constant 0 : index
    %83 = vector.load %arg8[%c0_79, %c0_80] : memref<48x24xf32, #tpu.memory_space<vmem>>, vector<48x24xf32>
    %cst_81 = arith.constant dense<0.000000e+00> : vector<8x24xf32>
    %84 = tpu.matmul %82, %83, %cst_81 {dimension_numbers = #tpu.dot_dimension_numbers<[1], [0], [0], [1], [0, 0, 1, 1], [], []>} : vector<8x48xf32>, vector<48x24xf32>, vector<8x24xf32> -> vector<8x24xf32>
    %c0_82 = arith.constant 0 : index
    %c0_83 = arith.constant 0 : index
    %c0_84 = arith.constant 0 : index
    %85 = vector.load %arg11[%c0_82, %c0_83, %c0_84] : memref<1x8x24xf32, #tpu.memory_space<vmem>>, vector<1x8x24xf32>
    %86 = vector.shape_cast %85 : vector<1x8x24xf32> to vector<8x24xf32>
    %87 = vector.shape_cast %84 : vector<8x24xf32> to vector<1x8x24xf32>
    tpu.vector_store %arg11[%c0_82, %c0_83, %c0_84], %87 {strides = array<i32>} : memref<1x8x24xf32, #tpu.memory_space<vmem>>, vector<1x8x24xf32>,
    return
  }
  func.func @transform_0(%arg0: i32) -> (i32, i32, i32) {
    %c0_i32 = arith.constant 0 : i32
    %c0_i32_0 = arith.constant 0 : i32
    %c0_i32_1 = arith.constant 0 : i32
    return %arg0, %c0_i32, %c0_i32_0 : i32, i32, i32
  }
  func.func @transform_1(%arg0: i32) -> (i32, i32, i32) {
    %c0_i32 = arith.constant 0 : i32
    %c0_i32_0 = arith.constant 0 : i32
    %c0_i32_1 = arith.constant 0 : i32
    %c0_i32_2 = arith.constant 0 : i32
    return %c0_i32, %c0_i32_0, %c0_i32_1 : i32, i32, i32
  }
  func.func @transform_2(%arg0: i32) -> (i32, i32) {
    %c0_i32 = arith.constant 0 : i32
    %c0_i32_0 = arith.constant 0 : i32
    %c0_i32_1 = arith.constant 0 : i32
    return %c0_i32, %c0_i32_0 : i32, i32
  }
  func.func @transform_3(%arg0: i32) -> (i32, i32) {
    %c0_i32 = arith.constant 0 : i32
    %c0_i32_0 = arith.constant 0 : i32
    %c0_i32_1 = arith.constant 0 : i32
    return %c0_i32, %c0_i32_0 : i32, i32
  }
  func.func @transform_4(%arg0: i32) -> (i32, i32) {
    %c0_i32 = arith.constant 0 : i32
    %c0_i32_0 = arith.constant 0 : i32
    %c0_i32_1 = arith.constant 0 : i32
    return %c0_i32, %c0_i32_0 : i32, i32
  }
  func.func @transform_5(%arg0: i32) -> (i32, i32) {
    %c0_i32 = arith.constant 0 : i32
    %c0_i32_0 = arith.constant 0 : i32
    %c0_i32_1 = arith.constant 0 : i32
    return %c0_i32, %c0_i32_0 : i32, i32
  }
  func.func @transform_6(%arg0: i32) -> (i32, i32) {
    %c0_i32 = arith.constant 0 : i32
    %c0_i32_0 = arith.constant 0 : i32
    %c0_i32_1 = arith.constant 0 : i32
    return %c0_i32, %c0_i32_0 : i32, i32
  }
  func.func @transform_7(%arg0: i32) -> (i32, i32) {
    %c0_i32 = arith.constant 0 : i32
    %c0_i32_0 = arith.constant 0 : i32
    %c0_i32_1 = arith.constant 0 : i32
    return %c0_i32, %c0_i32_0 : i32, i32
  }
  func.func @transform_8(%arg0: i32) -> (i32, i32) {
    %c0_i32 = arith.constant 0 : i32
    %c0_i32_0 = arith.constant 0 : i32
    %c0_i32_1 = arith.constant 0 : i32
    return %c0_i32, %c0_i32_0 : i32, i32
  }
  func.func @transform_9(%arg0: i32) -> (i32, i32, i32) {
    %c0_i32 = arith.constant 0 : i32
    %c0_i32_0 = arith.constant 0 : i32
    %c0_i32_1 = arith.constant 0 : i32
    return %arg0, %c0_i32, %c0_i32_0 : i32, i32, i32
  }
  func.func @transform_10(%arg0: i32) -> (i32, i32, i32) {
    %c0_i32 = arith.constant 0 : i32
    %c0_i32_0 = arith.constant 0 : i32
    %c0_i32_1 = arith.constant 0 : i32
    return %arg0, %c0_i32, %c0_i32_0 : i32, i32, i32
  }
  func.func @transform_11(%arg0: i32) -> (i32, i32, i32) {
    %c0_i32 = arith.constant 0 : i32
    %c0_i32_0 = arith.constant 0 : i32
    %c0_i32_1 = arith.constant 0 : i32
    return %arg0, %c0_i32, %c0_i32_0 : i32, i32, i32
  }
}

module attributes {stable_mosaic.version = 11 : i64} {
  func.func @kernel(%arg0: i32, %arg1: memref<1x8x128xf32, #tpu.memory_space<vmem>>, %arg2: memref<1x128xf32, #tpu.memory_space<vmem>>, %arg3: memref<1x128xf32, #tpu.memory_space<vmem>>, %arg4: memref<3x160x128xf32, #tpu.memory_space<vmem>>, %arg5: memref<128x16xf32, #tpu.memory_space<vmem>>, %arg6: memref<1x8x128xf32, #tpu.memory_space<vmem>>, %arg7: memref<1x8x128xf32, #tpu.memory_space<vmem>>, %arg8: memref<1x2x16xf32, #tpu.memory_space<vmem>>, %arg9: memref<10x160xf32, #tpu.memory_space<vmem>>) attributes {dimension_semantics = [#tpu.dimension_semantics<parallel>], iteration_bounds = array<i64: 2>, scalar_prefetch = 0 : i64, scratch_operands = 1 : i64, tpu.core_type = #tpu.core_type<tc>, window_params = [{transform_indices = @transform_0, window_bounds = array<i64: 1, 8, 128>}, {pipeline_mode = #tpu.pipeline_mode<synchronous>, transform_indices = @transform_1, window_bounds = array<i64: 1, 128>}, {pipeline_mode = #tpu.pipeline_mode<synchronous>, transform_indices = @transform_2, window_bounds = array<i64: 1, 128>}, {pipeline_mode = #tpu.pipeline_mode<synchronous>, transform_indices = @transform_3, window_bounds = array<i64: 3, 160, 128>}, {pipeline_mode = #tpu.pipeline_mode<synchronous>, transform_indices = @transform_4, window_bounds = array<i64: 128, 16>}, {transform_indices = @transform_5, window_bounds = array<i64: 1, 8, 128>}, {transform_indices = @transform_6, window_bounds = array<i64: 1, 8, 128>}, {transform_indices = @transform_7, window_bounds = array<i64: 1, 2, 16>}]} {
    %c0 = arith.constant 0 : index
    %c0_0 = arith.constant 0 : index
    %c0_1 = arith.constant 0 : index
    %0 = vector.load %arg1[%c0, %c0_0, %c0_1] : memref<1x8x128xf32, #tpu.memory_space<vmem>>, vector<1x8x128xf32>
    %1 = vector.shape_cast %0 : vector<1x8x128xf32> to vector<8x128xf32>
    %c0_2 = arith.constant 0 : index
    %c0_3 = arith.constant 0 : index
    %2 = vector.load %arg2[%c0_2, %c0_3] : memref<1x128xf32, #tpu.memory_space<vmem>>, vector<1x128xf32>
    %3 = vector.broadcast %2 : vector<1x128xf32> to vector<8x128xf32>
    %4 = arith.mulf %1, %3 : vector<8x128xf32>
    %c0_4 = arith.constant 0 : index
    %c0_5 = arith.constant 0 : index
    %5 = vector.load %arg3[%c0_4, %c0_5] : memref<1x128xf32, #tpu.memory_space<vmem>>, vector<1x128xf32>
    %6 = vector.broadcast %5 : vector<1x128xf32> to vector<8x128xf32>
    %7 = arith.addf %4, %6 : vector<8x128xf32>
    %c0_6 = arith.constant 0 : index
    %c0_7 = arith.constant 0 : index
    %c0_8 = arith.constant 0 : index
    %8 = vector.load %arg6[%c0_6, %c0_7, %c0_8] : memref<1x8x128xf32, #tpu.memory_space<vmem>>, vector<1x8x128xf32>
    %9 = vector.shape_cast %8 : vector<1x8x128xf32> to vector<8x128xf32>
    %10 = vector.shape_cast %7 : vector<8x128xf32> to vector<1x8x128xf32>
    tpu.vector_store %arg6[%c0_6, %c0_7, %c0_8], %10 {strides = array<i32>} : memref<1x8x128xf32, #tpu.memory_space<vmem>>, vector<1x8x128xf32>,
    %cst = arith.constant 0.000000e+00 : f32
    %11 = vector.broadcast %cst : f32 to vector<10x160xf32>
    %c0_9 = arith.constant 0 : index
    %c0_10 = arith.constant 0 : index
    %12 = vector.load %arg9[%c0_9, %c0_10] : memref<10x160xf32, #tpu.memory_space<vmem>>, vector<10x160xf32>
    tpu.vector_store %arg9[%c0_9, %c0_10], %11 {strides = array<i32>} : memref<10x160xf32, #tpu.memory_space<vmem>>, vector<10x160xf32>,
    %c1 = arith.constant 1 : index
    %c16 = arith.constant 16 : index
    %13 = vector.load %arg9[%c1, %c16] : memref<10x160xf32, #tpu.memory_space<vmem>>, vector<8x128xf32>
    tpu.vector_store %arg9[%c1, %c16], %7 {strides = array<i32>} : memref<10x160xf32, #tpu.memory_space<vmem>>, vector<8x128xf32>,
    %cst_11 = arith.constant 0.000000e+00 : f32
    %14 = vector.broadcast %cst_11 : f32 to vector<8x128xf32>
    %c0_12 = arith.constant 0 : index
    %c0_13 = arith.constant 0 : index
    %15 = vector.load %arg9[%c0_12, %c0_13] : memref<10x160xf32, #tpu.memory_space<vmem>>, vector<8x160xf32>
    %c0_14 = arith.constant 0 : index
    %c0_15 = arith.constant 0 : index
    %c0_16 = arith.constant 0 : index
    %16 = vector.load %arg4[%c0_14, %c0_15, %c0_16] : memref<3x160x128xf32, #tpu.memory_space<vmem>>, vector<1x160x128xf32>
    %17 = vector.shape_cast %16 : vector<1x160x128xf32> to vector<160x128xf32>
    %cst_17 = arith.constant dense<0.000000e+00> : vector<8x128xf32>
    %18 = tpu.matmul %15, %17, %cst_17 {dimension_numbers = #tpu.dot_dimension_numbers<[1], [0], [0], [1], [0, 0, 1, 1], [], []>} : vector<8x160xf32>, vector<160x128xf32>, vector<8x128xf32> -> vector<8x128xf32>
    %19 = arith.addf %14, %18 : vector<8x128xf32>
    %c1_18 = arith.constant 1 : index
    %c0_19 = arith.constant 0 : index
    %20 = vector.load %arg9[%c1_18, %c0_19] : memref<10x160xf32, #tpu.memory_space<vmem>>, vector<8x160xf32>
    %c1_20 = arith.constant 1 : index
    %c0_21 = arith.constant 0 : index
    %c0_22 = arith.constant 0 : index
    %21 = vector.load %arg4[%c1_20, %c0_21, %c0_22] : memref<3x160x128xf32, #tpu.memory_space<vmem>>, vector<1x160x128xf32>
    %22 = vector.shape_cast %21 : vector<1x160x128xf32> to vector<160x128xf32>
    %cst_23 = arith.constant dense<0.000000e+00> : vector<8x128xf32>
    %23 = tpu.matmul %20, %22, %cst_23 {dimension_numbers = #tpu.dot_dimension_numbers<[1], [0], [0], [1], [0, 0, 1, 1], [], []>} : vector<8x160xf32>, vector<160x128xf32>, vector<8x128xf32> -> vector<8x128xf32>
    %24 = arith.addf %19, %23 : vector<8x128xf32>
    %c2 = arith.constant 2 : index
    %c0_24 = arith.constant 0 : index
    %25 = vector.load %arg9[%c2, %c0_24] : memref<10x160xf32, #tpu.memory_space<vmem>>, vector<8x160xf32>
    %c2_25 = arith.constant 2 : index
    %c0_26 = arith.constant 0 : index
    %c0_27 = arith.constant 0 : index
    %26 = vector.load %arg4[%c2_25, %c0_26, %c0_27] : memref<3x160x128xf32, #tpu.memory_space<vmem>>, vector<1x160x128xf32>
    %27 = vector.shape_cast %26 : vector<1x160x128xf32> to vector<160x128xf32>
    %cst_28 = arith.constant dense<0.000000e+00> : vector<8x128xf32>
    %28 = tpu.matmul %25, %27, %cst_28 {dimension_numbers = #tpu.dot_dimension_numbers<[1], [0], [0], [1], [0, 0, 1, 1], [], []>} : vector<8x160xf32>, vector<160x128xf32>, vector<8x128xf32> -> vector<8x128xf32>
    %29 = arith.addf %24, %28 : vector<8x128xf32>
    %c0_29 = arith.constant 0 : index
    %c0_30 = arith.constant 0 : index
    %c0_31 = arith.constant 0 : index
    %30 = vector.load %arg7[%c0_29, %c0_30, %c0_31] : memref<1x8x128xf32, #tpu.memory_space<vmem>>, vector<1x8x128xf32>
    %31 = vector.shape_cast %30 : vector<1x8x128xf32> to vector<8x128xf32>
    %32 = vector.shape_cast %29 : vector<8x128xf32> to vector<1x8x128xf32>
    tpu.vector_store %arg7[%c0_29, %c0_30, %c0_31], %32 {strides = array<i32>} : memref<1x8x128xf32, #tpu.memory_space<vmem>>, vector<1x8x128xf32>,
    %cst_32 = arith.constant dense<0.000000e+00> : vector<128xf32>
    %33 = vector.multi_reduction <add>, %29, %cst_32 [0] : vector<8x128xf32> to vector<128xf32>
    %34 = vector.shape_cast %33 : vector<128xf32> to vector<1x128xf32>
    %c0_33 = arith.constant 0 : index
    %c0_34 = arith.constant 0 : index
    %35 = vector.load %arg5[%c0_33, %c0_34] : memref<128x16xf32, #tpu.memory_space<vmem>>, vector<128x16xf32>
    %cst_35 = arith.constant dense<0.000000e+00> : vector<1x16xf32>
    %36 = tpu.matmul %34, %35, %cst_35 {dimension_numbers = #tpu.dot_dimension_numbers<[1], [0], [0], [1], [0, 0, 1, 1], [], []>} : vector<1x128xf32>, vector<128x16xf32>, vector<1x16xf32> -> vector<1x16xf32>
    %37 = arith.mulf %29, %29 : vector<8x128xf32>
    %cst_36 = arith.constant dense<0.000000e+00> : vector<128xf32>
    %38 = vector.multi_reduction <add>, %37, %cst_36 [0] : vector<8x128xf32> to vector<128xf32>
    %39 = vector.shape_cast %38 : vector<128xf32> to vector<1x128xf32>
    %c0_37 = arith.constant 0 : index
    %c0_38 = arith.constant 0 : index
    %40 = vector.load %arg5[%c0_37, %c0_38] : memref<128x16xf32, #tpu.memory_space<vmem>>, vector<128x16xf32>
    %cst_39 = arith.constant dense<0.000000e+00> : vector<1x16xf32>
    %41 = tpu.matmul %39, %40, %cst_39 {dimension_numbers = #tpu.dot_dimension_numbers<[1], [0], [0], [1], [0, 0, 1, 1], [], []>} : vector<1x128xf32>, vector<128x16xf32>, vector<1x16xf32> -> vector<1x16xf32>
    %c0_40 = arith.constant 0 : index
    %c0_41 = arith.constant 0 : index
    %c0_42 = arith.constant 0 : index
    %42 = vector.load %arg8[%c0_40, %c0_41, %c0_42] : memref<1x2x16xf32, #tpu.memory_space<vmem>>, vector<1x1x16xf32>
    %43 = vector.shape_cast %42 : vector<1x1x16xf32> to vector<1x16xf32>
    %44 = vector.shape_cast %36 : vector<1x16xf32> to vector<1x1x16xf32>
    tpu.vector_store %arg8[%c0_40, %c0_41, %c0_42], %44 {strides = array<i32>} : memref<1x2x16xf32, #tpu.memory_space<vmem>>, vector<1x1x16xf32>,
    %c0_43 = arith.constant 0 : index
    %c1_44 = arith.constant 1 : index
    %c0_45 = arith.constant 0 : index
    %45 = vector.load %arg8[%c0_43, %c1_44, %c0_45] : memref<1x2x16xf32, #tpu.memory_space<vmem>>, vector<1x1x16xf32>
    %46 = vector.shape_cast %45 : vector<1x1x16xf32> to vector<1x16xf32>
    %47 = vector.shape_cast %41 : vector<1x16xf32> to vector<1x1x16xf32>
    tpu.vector_store %arg8[%c0_43, %c1_44, %c0_45], %47 {strides = array<i32>} : memref<1x2x16xf32, #tpu.memory_space<vmem>>, vector<1x1x16xf32>,
    return
  }
  func.func @transform_0(%arg0: i32) -> (i32, i32, i32) {
    %c0_i32 = arith.constant 0 : i32
    %c0_i32_0 = arith.constant 0 : i32
    %c0_i32_1 = arith.constant 0 : i32
    return %arg0, %c0_i32, %c0_i32_0 : i32, i32, i32
  }
  func.func @transform_1(%arg0: i32) -> (i32, i32) {
    %c0_i32 = arith.constant 0 : i32
    %c0_i32_0 = arith.constant 0 : i32
    %c0_i32_1 = arith.constant 0 : i32
    return %c0_i32, %c0_i32_0 : i32, i32
  }
  func.func @transform_2(%arg0: i32) -> (i32, i32) {
    %c0_i32 = arith.constant 0 : i32
    %c0_i32_0 = arith.constant 0 : i32
    %c0_i32_1 = arith.constant 0 : i32
    return %c0_i32, %c0_i32_0 : i32, i32
  }
  func.func @transform_3(%arg0: i32) -> (i32, i32, i32) {
    %c0_i32 = arith.constant 0 : i32
    %c0_i32_0 = arith.constant 0 : i32
    %c0_i32_1 = arith.constant 0 : i32
    %c0_i32_2 = arith.constant 0 : i32
    return %c0_i32, %c0_i32_0, %c0_i32_1 : i32, i32, i32
  }
  func.func @transform_4(%arg0: i32) -> (i32, i32) {
    %c0_i32 = arith.constant 0 : i32
    %c0_i32_0 = arith.constant 0 : i32
    %c0_i32_1 = arith.constant 0 : i32
    return %c0_i32, %c0_i32_0 : i32, i32
  }
  func.func @transform_5(%arg0: i32) -> (i32, i32, i32) {
    %c0_i32 = arith.constant 0 : i32
    %c0_i32_0 = arith.constant 0 : i32
    %c0_i32_1 = arith.constant 0 : i32
    return %arg0, %c0_i32, %c0_i32_0 : i32, i32, i32
  }
  func.func @transform_6(%arg0: i32) -> (i32, i32, i32) {
    %c0_i32 = arith.constant 0 : i32
    %c0_i32_0 = arith.constant 0 : i32
    %c0_i32_1 = arith.constant 0 : i32
    return %arg0, %c0_i32, %c0_i32_0 : i32, i32, i32
  }
  func.func @transform_7(%arg0: i32) -> (i32, i32, i32) {
    %c0_i32 = arith.constant 0 : i32
    %c0_i32_0 = arith.constant 0 : i32
    %c0_i32_1 = arith.constant 0 : i32
    return %arg0, %c0_i32, %c0_i32_0 : i32, i32, i32
  }
}

module attributes {stable_mosaic.version = 11 : i64} {
  func.func @kernel(%arg0: i32, %arg1: memref<1x8x128xf32, #tpu.memory_space<vmem>>, %arg2: memref<1x128xf32, #tpu.memory_space<vmem>>, %arg3: memref<1x128xf32, #tpu.memory_space<vmem>>, %arg4: memref<3x160x128xf32, #tpu.memory_space<vmem>>, %arg5: memref<128x16xf32, #tpu.memory_space<vmem>>, %arg6: memref<1x8x128xf32, #tpu.memory_space<vmem>>, %arg7: memref<1x2x16xf32, #tpu.memory_space<vmem>>, %arg8: memref<10x160xf32, #tpu.memory_space<vmem>>) attributes {dimension_semantics = [#tpu.dimension_semantics<parallel>], iteration_bounds = array<i64: 2>, scalar_prefetch = 0 : i64, scratch_operands = 1 : i64, tpu.core_type = #tpu.core_type<tc>, window_params = [{transform_indices = @transform_0, window_bounds = array<i64: 1, 8, 128>}, {pipeline_mode = #tpu.pipeline_mode<synchronous>, transform_indices = @transform_1, window_bounds = array<i64: 1, 128>}, {pipeline_mode = #tpu.pipeline_mode<synchronous>, transform_indices = @transform_2, window_bounds = array<i64: 1, 128>}, {pipeline_mode = #tpu.pipeline_mode<synchronous>, transform_indices = @transform_3, window_bounds = array<i64: 3, 160, 128>}, {pipeline_mode = #tpu.pipeline_mode<synchronous>, transform_indices = @transform_4, window_bounds = array<i64: 128, 16>}, {transform_indices = @transform_5, window_bounds = array<i64: 1, 8, 128>}, {transform_indices = @transform_6, window_bounds = array<i64: 1, 2, 16>}]} {
    %c0 = arith.constant 0 : index
    %c0_0 = arith.constant 0 : index
    %c0_1 = arith.constant 0 : index
    %0 = vector.load %arg1[%c0, %c0_0, %c0_1] : memref<1x8x128xf32, #tpu.memory_space<vmem>>, vector<1x8x128xf32>
    %1 = vector.shape_cast %0 : vector<1x8x128xf32> to vector<8x128xf32>
    %c0_2 = arith.constant 0 : index
    %c0_3 = arith.constant 0 : index
    %2 = vector.load %arg2[%c0_2, %c0_3] : memref<1x128xf32, #tpu.memory_space<vmem>>, vector<1x128xf32>
    %3 = vector.broadcast %2 : vector<1x128xf32> to vector<8x128xf32>
    %4 = arith.mulf %1, %3 : vector<8x128xf32>
    %c0_4 = arith.constant 0 : index
    %c0_5 = arith.constant 0 : index
    %5 = vector.load %arg3[%c0_4, %c0_5] : memref<1x128xf32, #tpu.memory_space<vmem>>, vector<1x128xf32>
    %6 = vector.broadcast %5 : vector<1x128xf32> to vector<8x128xf32>
    %7 = arith.addf %4, %6 : vector<8x128xf32>
    %cst = arith.constant 0.000000e+00 : f32
    %8 = vector.broadcast %cst : f32 to vector<8x128xf32>
    %9 = arith.cmpf oge, %7, %8 : vector<8x128xf32>
    %cst_6 = arith.constant 2.000000e-01 : f32
    %10 = vector.broadcast %cst_6 : f32 to vector<8x128xf32>
    %11 = arith.mulf %10, %7 : vector<8x128xf32>
    %12 = arith.select %9, %7, %11 : vector<8x128xi1>, vector<8x128xf32>
    %cst_7 = arith.constant 0.000000e+00 : f32
    %13 = vector.broadcast %cst_7 : f32 to vector<10x160xf32>
    %c0_8 = arith.constant 0 : index
    %c0_9 = arith.constant 0 : index
    %14 = vector.load %arg8[%c0_8, %c0_9] : memref<10x160xf32, #tpu.memory_space<vmem>>, vector<10x160xf32>
    tpu.vector_store %arg8[%c0_8, %c0_9], %13 {strides = array<i32>} : memref<10x160xf32, #tpu.memory_space<vmem>>, vector<10x160xf32>,
    %c1 = arith.constant 1 : index
    %c16 = arith.constant 16 : index
    %15 = vector.load %arg8[%c1, %c16] : memref<10x160xf32, #tpu.memory_space<vmem>>, vector<8x128xf32>
    tpu.vector_store %arg8[%c1, %c16], %12 {strides = array<i32>} : memref<10x160xf32, #tpu.memory_space<vmem>>, vector<8x128xf32>,
    %cst_10 = arith.constant 0.000000e+00 : f32
    %16 = vector.broadcast %cst_10 : f32 to vector<8x128xf32>
    %c0_11 = arith.constant 0 : index
    %c0_12 = arith.constant 0 : index
    %17 = vector.load %arg8[%c0_11, %c0_12] : memref<10x160xf32, #tpu.memory_space<vmem>>, vector<8x160xf32>
    %c0_13 = arith.constant 0 : index
    %c0_14 = arith.constant 0 : index
    %c0_15 = arith.constant 0 : index
    %18 = vector.load %arg4[%c0_13, %c0_14, %c0_15] : memref<3x160x128xf32, #tpu.memory_space<vmem>>, vector<1x160x128xf32>
    %19 = vector.shape_cast %18 : vector<1x160x128xf32> to vector<160x128xf32>
    %cst_16 = arith.constant dense<0.000000e+00> : vector<8x128xf32>
    %20 = tpu.matmul %17, %19, %cst_16 {dimension_numbers = #tpu.dot_dimension_numbers<[1], [0], [0], [1], [0, 0, 1, 1], [], []>} : vector<8x160xf32>, vector<160x128xf32>, vector<8x128xf32> -> vector<8x128xf32>
    %21 = arith.addf %16, %20 : vector<8x128xf32>
    %c1_17 = arith.constant 1 : index
    %c0_18 = arith.constant 0 : index
    %22 = vector.load %arg8[%c1_17, %c0_18] : memref<10x160xf32, #tpu.memory_space<vmem>>, vector<8x160xf32>
    %c1_19 = arith.constant 1 : index
    %c0_20 = arith.constant 0 : index
    %c0_21 = arith.constant 0 : index
    %23 = vector.load %arg4[%c1_19, %c0_20, %c0_21] : memref<3x160x128xf32, #tpu.memory_space<vmem>>, vector<1x160x128xf32>
    %24 = vector.shape_cast %23 : vector<1x160x128xf32> to vector<160x128xf32>
    %cst_22 = arith.constant dense<0.000000e+00> : vector<8x128xf32>
    %25 = tpu.matmul %22, %24, %cst_22 {dimension_numbers = #tpu.dot_dimension_numbers<[1], [0], [0], [1], [0, 0, 1, 1], [], []>} : vector<8x160xf32>, vector<160x128xf32>, vector<8x128xf32> -> vector<8x128xf32>
    %26 = arith.addf %21, %25 : vector<8x128xf32>
    %c2 = arith.constant 2 : index
    %c0_23 = arith.constant 0 : index
    %27 = vector.load %arg8[%c2, %c0_23] : memref<10x160xf32, #tpu.memory_space<vmem>>, vector<8x160xf32>
    %c2_24 = arith.constant 2 : index
    %c0_25 = arith.constant 0 : index
    %c0_26 = arith.constant 0 : index
    %28 = vector.load %arg4[%c2_24, %c0_25, %c0_26] : memref<3x160x128xf32, #tpu.memory_space<vmem>>, vector<1x160x128xf32>
    %29 = vector.shape_cast %28 : vector<1x160x128xf32> to vector<160x128xf32>
    %cst_27 = arith.constant dense<0.000000e+00> : vector<8x128xf32>
    %30 = tpu.matmul %27, %29, %cst_27 {dimension_numbers = #tpu.dot_dimension_numbers<[1], [0], [0], [1], [0, 0, 1, 1], [], []>} : vector<8x160xf32>, vector<160x128xf32>, vector<8x128xf32> -> vector<8x128xf32>
    %31 = arith.addf %26, %30 : vector<8x128xf32>
    %c0_28 = arith.constant 0 : index
    %c0_29 = arith.constant 0 : index
    %c0_30 = arith.constant 0 : index
    %32 = vector.load %arg6[%c0_28, %c0_29, %c0_30] : memref<1x8x128xf32, #tpu.memory_space<vmem>>, vector<1x8x128xf32>
    %33 = vector.shape_cast %32 : vector<1x8x128xf32> to vector<8x128xf32>
    %34 = vector.shape_cast %31 : vector<8x128xf32> to vector<1x8x128xf32>
    tpu.vector_store %arg6[%c0_28, %c0_29, %c0_30], %34 {strides = array<i32>} : memref<1x8x128xf32, #tpu.memory_space<vmem>>, vector<1x8x128xf32>,
    %cst_31 = arith.constant dense<0.000000e+00> : vector<128xf32>
    %35 = vector.multi_reduction <add>, %31, %cst_31 [0] : vector<8x128xf32> to vector<128xf32>
    %36 = vector.shape_cast %35 : vector<128xf32> to vector<1x128xf32>
    %c0_32 = arith.constant 0 : index
    %c0_33 = arith.constant 0 : index
    %37 = vector.load %arg5[%c0_32, %c0_33] : memref<128x16xf32, #tpu.memory_space<vmem>>, vector<128x16xf32>
    %cst_34 = arith.constant dense<0.000000e+00> : vector<1x16xf32>
    %38 = tpu.matmul %36, %37, %cst_34 {dimension_numbers = #tpu.dot_dimension_numbers<[1], [0], [0], [1], [0, 0, 1, 1], [], []>} : vector<1x128xf32>, vector<128x16xf32>, vector<1x16xf32> -> vector<1x16xf32>
    %39 = arith.mulf %31, %31 : vector<8x128xf32>
    %cst_35 = arith.constant dense<0.000000e+00> : vector<128xf32>
    %40 = vector.multi_reduction <add>, %39, %cst_35 [0] : vector<8x128xf32> to vector<128xf32>
    %41 = vector.shape_cast %40 : vector<128xf32> to vector<1x128xf32>
    %c0_36 = arith.constant 0 : index
    %c0_37 = arith.constant 0 : index
    %42 = vector.load %arg5[%c0_36, %c0_37] : memref<128x16xf32, #tpu.memory_space<vmem>>, vector<128x16xf32>
    %cst_38 = arith.constant dense<0.000000e+00> : vector<1x16xf32>
    %43 = tpu.matmul %41, %42, %cst_38 {dimension_numbers = #tpu.dot_dimension_numbers<[1], [0], [0], [1], [0, 0, 1, 1], [], []>} : vector<1x128xf32>, vector<128x16xf32>, vector<1x16xf32> -> vector<1x16xf32>
    %c0_39 = arith.constant 0 : index
    %c0_40 = arith.constant 0 : index
    %c0_41 = arith.constant 0 : index
    %44 = vector.load %arg7[%c0_39, %c0_40, %c0_41] : memref<1x2x16xf32, #tpu.memory_space<vmem>>, vector<1x1x16xf32>
    %45 = vector.shape_cast %44 : vector<1x1x16xf32> to vector<1x16xf32>
    %46 = vector.shape_cast %38 : vector<1x16xf32> to vector<1x1x16xf32>
    tpu.vector_store %arg7[%c0_39, %c0_40, %c0_41], %46 {strides = array<i32>} : memref<1x2x16xf32, #tpu.memory_space<vmem>>, vector<1x1x16xf32>,
    %c0_42 = arith.constant 0 : index
    %c1_43 = arith.constant 1 : index
    %c0_44 = arith.constant 0 : index
    %47 = vector.load %arg7[%c0_42, %c1_43, %c0_44] : memref<1x2x16xf32, #tpu.memory_space<vmem>>, vector<1x1x16xf32>
    %48 = vector.shape_cast %47 : vector<1x1x16xf32> to vector<1x16xf32>
    %49 = vector.shape_cast %43 : vector<1x16xf32> to vector<1x1x16xf32>
    tpu.vector_store %arg7[%c0_42, %c1_43, %c0_44], %49 {strides = array<i32>} : memref<1x2x16xf32, #tpu.memory_space<vmem>>, vector<1x1x16xf32>,
    return
  }
  func.func @transform_0(%arg0: i32) -> (i32, i32, i32) {
    %c0_i32 = arith.constant 0 : i32
    %c0_i32_0 = arith.constant 0 : i32
    %c0_i32_1 = arith.constant 0 : i32
    return %arg0, %c0_i32, %c0_i32_0 : i32, i32, i32
  }
  func.func @transform_1(%arg0: i32) -> (i32, i32) {
    %c0_i32 = arith.constant 0 : i32
    %c0_i32_0 = arith.constant 0 : i32
    %c0_i32_1 = arith.constant 0 : i32
    return %c0_i32, %c0_i32_0 : i32, i32
  }
  func.func @transform_2(%arg0: i32) -> (i32, i32) {
    %c0_i32 = arith.constant 0 : i32
    %c0_i32_0 = arith.constant 0 : i32
    %c0_i32_1 = arith.constant 0 : i32
    return %c0_i32, %c0_i32_0 : i32, i32
  }
  func.func @transform_3(%arg0: i32) -> (i32, i32, i32) {
    %c0_i32 = arith.constant 0 : i32
    %c0_i32_0 = arith.constant 0 : i32
    %c0_i32_1 = arith.constant 0 : i32
    %c0_i32_2 = arith.constant 0 : i32
    return %c0_i32, %c0_i32_0, %c0_i32_1 : i32, i32, i32
  }
  func.func @transform_4(%arg0: i32) -> (i32, i32) {
    %c0_i32 = arith.constant 0 : i32
    %c0_i32_0 = arith.constant 0 : i32
    %c0_i32_1 = arith.constant 0 : i32
    return %c0_i32, %c0_i32_0 : i32, i32
  }
  func.func @transform_5(%arg0: i32) -> (i32, i32, i32) {
    %c0_i32 = arith.constant 0 : i32
    %c0_i32_0 = arith.constant 0 : i32
    %c0_i32_1 = arith.constant 0 : i32
    return %arg0, %c0_i32, %c0_i32_0 : i32, i32, i32
  }
  func.func @transform_6(%arg0: i32) -> (i32, i32, i32) {
    %c0_i32 = arith.constant 0 : i32
    %c0_i32_0 = arith.constant 0 : i32
    %c0_i32_1 = arith.constant 0 : i32
    return %arg0, %c0_i32, %c0_i32_0 : i32, i32, i32
  }
}

module attributes {stable_mosaic.version = 11 : i64} {
  func.func @kernel(%arg0: i32, %arg1: memref<1x8x128xf32, #tpu.memory_space<vmem>>, %arg2: memref<1x128xf32, #tpu.memory_space<vmem>>, %arg3: memref<1x128xf32, #tpu.memory_space<vmem>>, %arg4: memref<3x160x128xf32, #tpu.memory_space<vmem>>, %arg5: memref<128x16xf32, #tpu.memory_space<vmem>>, %arg6: memref<1x8x128xf32, #tpu.memory_space<vmem>>, %arg7: memref<1x8x128xf32, #tpu.memory_space<vmem>>, %arg8: memref<1x2x16xf32, #tpu.memory_space<vmem>>, %arg9: memref<10x160xf32, #tpu.memory_space<vmem>>) attributes {dimension_semantics = [#tpu.dimension_semantics<parallel>], iteration_bounds = array<i64: 2>, scalar_prefetch = 0 : i64, scratch_operands = 1 : i64, tpu.core_type = #tpu.core_type<tc>, window_params = [{transform_indices = @transform_0, window_bounds = array<i64: 1, 8, 128>}, {pipeline_mode = #tpu.pipeline_mode<synchronous>, transform_indices = @transform_1, window_bounds = array<i64: 1, 128>}, {pipeline_mode = #tpu.pipeline_mode<synchronous>, transform_indices = @transform_2, window_bounds = array<i64: 1, 128>}, {pipeline_mode = #tpu.pipeline_mode<synchronous>, transform_indices = @transform_3, window_bounds = array<i64: 3, 160, 128>}, {pipeline_mode = #tpu.pipeline_mode<synchronous>, transform_indices = @transform_4, window_bounds = array<i64: 128, 16>}, {transform_indices = @transform_5, window_bounds = array<i64: 1, 8, 128>}, {transform_indices = @transform_6, window_bounds = array<i64: 1, 8, 128>}, {transform_indices = @transform_7, window_bounds = array<i64: 1, 2, 16>}]} {
    %c0 = arith.constant 0 : index
    %c0_0 = arith.constant 0 : index
    %c0_1 = arith.constant 0 : index
    %0 = vector.load %arg1[%c0, %c0_0, %c0_1] : memref<1x8x128xf32, #tpu.memory_space<vmem>>, vector<1x8x128xf32>
    %1 = vector.shape_cast %0 : vector<1x8x128xf32> to vector<8x128xf32>
    %c0_2 = arith.constant 0 : index
    %c0_3 = arith.constant 0 : index
    %2 = vector.load %arg2[%c0_2, %c0_3] : memref<1x128xf32, #tpu.memory_space<vmem>>, vector<1x128xf32>
    %3 = vector.broadcast %2 : vector<1x128xf32> to vector<8x128xf32>
    %4 = arith.mulf %1, %3 : vector<8x128xf32>
    %c0_4 = arith.constant 0 : index
    %c0_5 = arith.constant 0 : index
    %5 = vector.load %arg3[%c0_4, %c0_5] : memref<1x128xf32, #tpu.memory_space<vmem>>, vector<1x128xf32>
    %6 = vector.broadcast %5 : vector<1x128xf32> to vector<8x128xf32>
    %7 = arith.addf %4, %6 : vector<8x128xf32>
    %c0_6 = arith.constant 0 : index
    %c0_7 = arith.constant 0 : index
    %c0_8 = arith.constant 0 : index
    %8 = vector.load %arg6[%c0_6, %c0_7, %c0_8] : memref<1x8x128xf32, #tpu.memory_space<vmem>>, vector<1x8x128xf32>
    %9 = vector.shape_cast %8 : vector<1x8x128xf32> to vector<8x128xf32>
    %10 = arith.addf %7, %9 : vector<8x128xf32>
    %cst = arith.constant 0.000000e+00 : f32
    %11 = vector.broadcast %cst : f32 to vector<10x160xf32>
    %c0_9 = arith.constant 0 : index
    %c0_10 = arith.constant 0 : index
    %12 = vector.load %arg9[%c0_9, %c0_10] : memref<10x160xf32, #tpu.memory_space<vmem>>, vector<10x160xf32>
    tpu.vector_store %arg9[%c0_9, %c0_10], %11 {strides = array<i32>} : memref<10x160xf32, #tpu.memory_space<vmem>>, vector<10x160xf32>,
    %c1 = arith.constant 1 : index
    %c16 = arith.constant 16 : index
    %13 = vector.load %arg9[%c1, %c16] : memref<10x160xf32, #tpu.memory_space<vmem>>, vector<8x128xf32>
    tpu.vector_store %arg9[%c1, %c16], %10 {strides = array<i32>} : memref<10x160xf32, #tpu.memory_space<vmem>>, vector<8x128xf32>,
    %cst_11 = arith.constant 0.000000e+00 : f32
    %14 = vector.broadcast %cst_11 : f32 to vector<8x128xf32>
    %c0_12 = arith.constant 0 : index
    %c0_13 = arith.constant 0 : index
    %15 = vector.load %arg9[%c0_12, %c0_13] : memref<10x160xf32, #tpu.memory_space<vmem>>, vector<8x160xf32>
    %c0_14 = arith.constant 0 : index
    %c0_15 = arith.constant 0 : index
    %c0_16 = arith.constant 0 : index
    %16 = vector.load %arg4[%c0_14, %c0_15, %c0_16] : memref<3x160x128xf32, #tpu.memory_space<vmem>>, vector<1x160x128xf32>
    %17 = vector.shape_cast %16 : vector<1x160x128xf32> to vector<160x128xf32>
    %cst_17 = arith.constant dense<0.000000e+00> : vector<8x128xf32>
    %18 = tpu.matmul %15, %17, %cst_17 {dimension_numbers = #tpu.dot_dimension_numbers<[1], [0], [0], [1], [0, 0, 1, 1], [], []>} : vector<8x160xf32>, vector<160x128xf32>, vector<8x128xf32> -> vector<8x128xf32>
    %19 = arith.addf %14, %18 : vector<8x128xf32>
    %c1_18 = arith.constant 1 : index
    %c0_19 = arith.constant 0 : index
    %20 = vector.load %arg9[%c1_18, %c0_19] : memref<10x160xf32, #tpu.memory_space<vmem>>, vector<8x160xf32>
    %c1_20 = arith.constant 1 : index
    %c0_21 = arith.constant 0 : index
    %c0_22 = arith.constant 0 : index
    %21 = vector.load %arg4[%c1_20, %c0_21, %c0_22] : memref<3x160x128xf32, #tpu.memory_space<vmem>>, vector<1x160x128xf32>
    %22 = vector.shape_cast %21 : vector<1x160x128xf32> to vector<160x128xf32>
    %cst_23 = arith.constant dense<0.000000e+00> : vector<8x128xf32>
    %23 = tpu.matmul %20, %22, %cst_23 {dimension_numbers = #tpu.dot_dimension_numbers<[1], [0], [0], [1], [0, 0, 1, 1], [], []>} : vector<8x160xf32>, vector<160x128xf32>, vector<8x128xf32> -> vector<8x128xf32>
    %24 = arith.addf %19, %23 : vector<8x128xf32>
    %c2 = arith.constant 2 : index
    %c0_24 = arith.constant 0 : index
    %25 = vector.load %arg9[%c2, %c0_24] : memref<10x160xf32, #tpu.memory_space<vmem>>, vector<8x160xf32>
    %c2_25 = arith.constant 2 : index
    %c0_26 = arith.constant 0 : index
    %c0_27 = arith.constant 0 : index
    %26 = vector.load %arg4[%c2_25, %c0_26, %c0_27] : memref<3x160x128xf32, #tpu.memory_space<vmem>>, vector<1x160x128xf32>
    %27 = vector.shape_cast %26 : vector<1x160x128xf32> to vector<160x128xf32>
    %cst_28 = arith.constant dense<0.000000e+00> : vector<8x128xf32>
    %28 = tpu.matmul %25, %27, %cst_28 {dimension_numbers = #tpu.dot_dimension_numbers<[1], [0], [0], [1], [0, 0, 1, 1], [], []>} : vector<8x160xf32>, vector<160x128xf32>, vector<8x128xf32> -> vector<8x128xf32>
    %29 = arith.addf %24, %28 : vector<8x128xf32>
    %c0_29 = arith.constant 0 : index
    %c0_30 = arith.constant 0 : index
    %c0_31 = arith.constant 0 : index
    %30 = vector.load %arg7[%c0_29, %c0_30, %c0_31] : memref<1x8x128xf32, #tpu.memory_space<vmem>>, vector<1x8x128xf32>
    %31 = vector.shape_cast %30 : vector<1x8x128xf32> to vector<8x128xf32>
    %32 = vector.shape_cast %29 : vector<8x128xf32> to vector<1x8x128xf32>
    tpu.vector_store %arg7[%c0_29, %c0_30, %c0_31], %32 {strides = array<i32>} : memref<1x8x128xf32, #tpu.memory_space<vmem>>, vector<1x8x128xf32>,
    %cst_32 = arith.constant dense<0.000000e+00> : vector<128xf32>
    %33 = vector.multi_reduction <add>, %29, %cst_32 [0] : vector<8x128xf32> to vector<128xf32>
    %34 = vector.shape_cast %33 : vector<128xf32> to vector<1x128xf32>
    %c0_33 = arith.constant 0 : index
    %c0_34 = arith.constant 0 : index
    %35 = vector.load %arg5[%c0_33, %c0_34] : memref<128x16xf32, #tpu.memory_space<vmem>>, vector<128x16xf32>
    %cst_35 = arith.constant dense<0.000000e+00> : vector<1x16xf32>
    %36 = tpu.matmul %34, %35, %cst_35 {dimension_numbers = #tpu.dot_dimension_numbers<[1], [0], [0], [1], [0, 0, 1, 1], [], []>} : vector<1x128xf32>, vector<128x16xf32>, vector<1x16xf32> -> vector<1x16xf32>
    %37 = arith.mulf %29, %29 : vector<8x128xf32>
    %cst_36 = arith.constant dense<0.000000e+00> : vector<128xf32>
    %38 = vector.multi_reduction <add>, %37, %cst_36 [0] : vector<8x128xf32> to vector<128xf32>
    %39 = vector.shape_cast %38 : vector<128xf32> to vector<1x128xf32>
    %c0_37 = arith.constant 0 : index
    %c0_38 = arith.constant 0 : index
    %40 = vector.load %arg5[%c0_37, %c0_38] : memref<128x16xf32, #tpu.memory_space<vmem>>, vector<128x16xf32>
    %cst_39 = arith.constant dense<0.000000e+00> : vector<1x16xf32>
    %41 = tpu.matmul %39, %40, %cst_39 {dimension_numbers = #tpu.dot_dimension_numbers<[1], [0], [0], [1], [0, 0, 1, 1], [], []>} : vector<1x128xf32>, vector<128x16xf32>, vector<1x16xf32> -> vector<1x16xf32>
    %c0_40 = arith.constant 0 : index
    %c0_41 = arith.constant 0 : index
    %c0_42 = arith.constant 0 : index
    %42 = vector.load %arg8[%c0_40, %c0_41, %c0_42] : memref<1x2x16xf32, #tpu.memory_space<vmem>>, vector<1x1x16xf32>
    %43 = vector.shape_cast %42 : vector<1x1x16xf32> to vector<1x16xf32>
    %44 = vector.shape_cast %36 : vector<1x16xf32> to vector<1x1x16xf32>
    tpu.vector_store %arg8[%c0_40, %c0_41, %c0_42], %44 {strides = array<i32>} : memref<1x2x16xf32, #tpu.memory_space<vmem>>, vector<1x1x16xf32>,
    %c0_43 = arith.constant 0 : index
    %c1_44 = arith.constant 1 : index
    %c0_45 = arith.constant 0 : index
    %45 = vector.load %arg8[%c0_43, %c1_44, %c0_45] : memref<1x2x16xf32, #tpu.memory_space<vmem>>, vector<1x1x16xf32>
    %46 = vector.shape_cast %45 : vector<1x1x16xf32> to vector<1x16xf32>
    %47 = vector.shape_cast %41 : vector<1x16xf32> to vector<1x1x16xf32>
    tpu.vector_store %arg8[%c0_43, %c1_44, %c0_45], %47 {strides = array<i32>} : memref<1x2x16xf32, #tpu.memory_space<vmem>>, vector<1x1x16xf32>,
    return
  }
  func.func @transform_0(%arg0: i32) -> (i32, i32, i32) {
    %c0_i32 = arith.constant 0 : i32
    %c0_i32_0 = arith.constant 0 : i32
    %c0_i32_1 = arith.constant 0 : i32
    return %arg0, %c0_i32, %c0_i32_0 : i32, i32, i32
  }
  func.func @transform_1(%arg0: i32) -> (i32, i32) {
    %c0_i32 = arith.constant 0 : i32
    %c0_i32_0 = arith.constant 0 : i32
    %c0_i32_1 = arith.constant 0 : i32
    return %c0_i32, %c0_i32_0 : i32, i32
  }
  func.func @transform_2(%arg0: i32) -> (i32, i32) {
    %c0_i32 = arith.constant 0 : i32
    %c0_i32_0 = arith.constant 0 : i32
    %c0_i32_1 = arith.constant 0 : i32
    return %c0_i32, %c0_i32_0 : i32, i32
  }
  func.func @transform_3(%arg0: i32) -> (i32, i32, i32) {
    %c0_i32 = arith.constant 0 : i32
    %c0_i32_0 = arith.constant 0 : i32
    %c0_i32_1 = arith.constant 0 : i32
    %c0_i32_2 = arith.constant 0 : i32
    return %c0_i32, %c0_i32_0, %c0_i32_1 : i32, i32, i32
  }
  func.func @transform_4(%arg0: i32) -> (i32, i32) {
    %c0_i32 = arith.constant 0 : i32
    %c0_i32_0 = arith.constant 0 : i32
    %c0_i32_1 = arith.constant 0 : i32
    return %c0_i32, %c0_i32_0 : i32, i32
  }
  func.func @transform_5(%arg0: i32) -> (i32, i32, i32) {
    %c0_i32 = arith.constant 0 : i32
    %c0_i32_0 = arith.constant 0 : i32
    %c0_i32_1 = arith.constant 0 : i32
    return %arg0, %c0_i32, %c0_i32_0 : i32, i32, i32
  }
  func.func @transform_6(%arg0: i32) -> (i32, i32, i32) {
    %c0_i32 = arith.constant 0 : i32
    %c0_i32_0 = arith.constant 0 : i32
    %c0_i32_1 = arith.constant 0 : i32
    return %arg0, %c0_i32, %c0_i32_0 : i32, i32, i32
  }
  func.func @transform_7(%arg0: i32) -> (i32, i32, i32) {
    %c0_i32 = arith.constant 0 : i32
    %c0_i32_0 = arith.constant 0 : i32
    %c0_i32_1 = arith.constant 0 : i32
    return %arg0, %c0_i32, %c0_i32_0 : i32, i32, i32
  }
}

module attributes {stable_mosaic.version = 11 : i64} {
  func.func @kernel(%arg0: i32, %arg1: memref<1x8x128xf32, #tpu.memory_space<vmem>>, %arg2: memref<1x128xf32, #tpu.memory_space<vmem>>, %arg3: memref<1x128xf32, #tpu.memory_space<vmem>>, %arg4: memref<1x8x128xf32, #tpu.memory_space<vmem>>, %arg5: memref<1x8x24xf32, #tpu.memory_space<vmem>>, %arg6: memref<7x224x24xf32, #tpu.memory_space<vmem>>, %arg7: memref<1x24xf32, #tpu.memory_space<vmem>>, %arg8: memref<1x8x24xf32, #tpu.memory_space<vmem>>, %arg9: memref<14x224xf32, #tpu.memory_space<vmem>>) attributes {dimension_semantics = [#tpu.dimension_semantics<parallel>], iteration_bounds = array<i64: 2>, scalar_prefetch = 0 : i64, scratch_operands = 1 : i64, tpu.core_type = #tpu.core_type<tc>, window_params = [{transform_indices = @transform_0, window_bounds = array<i64: 1, 8, 128>}, {pipeline_mode = #tpu.pipeline_mode<synchronous>, transform_indices = @transform_1, window_bounds = array<i64: 1, 128>}, {pipeline_mode = #tpu.pipeline_mode<synchronous>, transform_indices = @transform_2, window_bounds = array<i64: 1, 128>}, {transform_indices = @transform_3, window_bounds = array<i64: 1, 8, 128>}, {transform_indices = @transform_4, window_bounds = array<i64: 1, 8, 24>}, {pipeline_mode = #tpu.pipeline_mode<synchronous>, transform_indices = @transform_5, window_bounds = array<i64: 7, 224, 24>}, {pipeline_mode = #tpu.pipeline_mode<synchronous>, transform_indices = @transform_6, window_bounds = array<i64: 1, 24>}, {transform_indices = @transform_7, window_bounds = array<i64: 1, 8, 24>}]} {
    %c0 = arith.constant 0 : index
    %c0_0 = arith.constant 0 : index
    %c0_1 = arith.constant 0 : index
    %0 = vector.load %arg1[%c0, %c0_0, %c0_1] : memref<1x8x128xf32, #tpu.memory_space<vmem>>, vector<1x8x128xf32>
    %1 = vector.shape_cast %0 : vector<1x8x128xf32> to vector<8x128xf32>
    %c0_2 = arith.constant 0 : index
    %c0_3 = arith.constant 0 : index
    %2 = vector.load %arg2[%c0_2, %c0_3] : memref<1x128xf32, #tpu.memory_space<vmem>>, vector<1x128xf32>
    %3 = vector.broadcast %2 : vector<1x128xf32> to vector<8x128xf32>
    %4 = arith.mulf %1, %3 : vector<8x128xf32>
    %c0_4 = arith.constant 0 : index
    %c0_5 = arith.constant 0 : index
    %5 = vector.load %arg3[%c0_4, %c0_5] : memref<1x128xf32, #tpu.memory_space<vmem>>, vector<1x128xf32>
    %6 = vector.broadcast %5 : vector<1x128xf32> to vector<8x128xf32>
    %7 = arith.addf %4, %6 : vector<8x128xf32>
    %c0_6 = arith.constant 0 : index
    %c0_7 = arith.constant 0 : index
    %c0_8 = arith.constant 0 : index
    %8 = vector.load %arg4[%c0_6, %c0_7, %c0_8] : memref<1x8x128xf32, #tpu.memory_space<vmem>>, vector<1x8x128xf32>
    %9 = vector.shape_cast %8 : vector<1x8x128xf32> to vector<8x128xf32>
    %10 = arith.addf %7, %9 : vector<8x128xf32>
    %cst = arith.constant 0.000000e+00 : f32
    %11 = vector.broadcast %cst : f32 to vector<14x224xf32>
    %c0_9 = arith.constant 0 : index
    %c0_10 = arith.constant 0 : index
    %12 = vector.load %arg9[%c0_9, %c0_10] : memref<14x224xf32, #tpu.memory_space<vmem>>, vector<14x224xf32>
    tpu.vector_store %arg9[%c0_9, %c0_10], %11 {strides = array<i32>} : memref<14x224xf32, #tpu.memory_space<vmem>>, vector<14x224xf32>,
    %c3 = arith.constant 3 : index
    %c48 = arith.constant 48 : index
    %13 = vector.load %arg9[%c3, %c48] : memref<14x224xf32, #tpu.memory_space<vmem>>, vector<8x128xf32>
    tpu.vector_store %arg9[%c3, %c48], %10 {strides = array<i32>} : memref<14x224xf32, #tpu.memory_space<vmem>>, vector<8x128xf32>,
    %cst_11 = arith.constant 0.000000e+00 : f32
    %14 = vector.broadcast %cst_11 : f32 to vector<8x24xf32>
    %c0_12 = arith.constant 0 : index
    %c0_13 = arith.constant 0 : index
    %15 = vector.load %arg9[%c0_12, %c0_13] : memref<14x224xf32, #tpu.memory_space<vmem>>, vector<8x224xf32>
    %c0_14 = arith.constant 0 : index
    %c0_15 = arith.constant 0 : index
    %c0_16 = arith.constant 0 : index
    %16 = vector.load %arg6[%c0_14, %c0_15, %c0_16] : memref<7x224x24xf32, #tpu.memory_space<vmem>>, vector<1x224x24xf32>
    %17 = vector.shape_cast %16 : vector<1x224x24xf32> to vector<224x24xf32>
    %cst_17 = arith.constant dense<0.000000e+00> : vector<8x24xf32>
    %18 = tpu.matmul %15, %17, %cst_17 {dimension_numbers = #tpu.dot_dimension_numbers<[1], [0], [0], [1], [0, 0, 1, 1], [], []>} : vector<8x224xf32>, vector<224x24xf32>, vector<8x24xf32> -> vector<8x24xf32>
    %19 = arith.addf %14, %18 : vector<8x24xf32>
    %c1 = arith.constant 1 : index
    %c0_18 = arith.constant 0 : index
    %20 = vector.load %arg9[%c1, %c0_18] : memref<14x224xf32, #tpu.memory_space<vmem>>, vector<8x224xf32>
    %c1_19 = arith.constant 1 : index
    %c0_20 = arith.constant 0 : index
    %c0_21 = arith.constant 0 : index
    %21 = vector.load %arg6[%c1_19, %c0_20, %c0_21] : memref<7x224x24xf32, #tpu.memory_space<vmem>>, vector<1x224x24xf32>
    %22 = vector.shape_cast %21 : vector<1x224x24xf32> to vector<224x24xf32>
    %cst_22 = arith.constant dense<0.000000e+00> : vector<8x24xf32>
    %23 = tpu.matmul %20, %22, %cst_22 {dimension_numbers = #tpu.dot_dimension_numbers<[1], [0], [0], [1], [0, 0, 1, 1], [], []>} : vector<8x224xf32>, vector<224x24xf32>, vector<8x24xf32> -> vector<8x24xf32>
    %24 = arith.addf %19, %23 : vector<8x24xf32>
    %c2 = arith.constant 2 : index
    %c0_23 = arith.constant 0 : index
    %25 = vector.load %arg9[%c2, %c0_23] : memref<14x224xf32, #tpu.memory_space<vmem>>, vector<8x224xf32>
    %c2_24 = arith.constant 2 : index
    %c0_25 = arith.constant 0 : index
    %c0_26 = arith.constant 0 : index
    %26 = vector.load %arg6[%c2_24, %c0_25, %c0_26] : memref<7x224x24xf32, #tpu.memory_space<vmem>>, vector<1x224x24xf32>
    %27 = vector.shape_cast %26 : vector<1x224x24xf32> to vector<224x24xf32>
    %cst_27 = arith.constant dense<0.000000e+00> : vector<8x24xf32>
    %28 = tpu.matmul %25, %27, %cst_27 {dimension_numbers = #tpu.dot_dimension_numbers<[1], [0], [0], [1], [0, 0, 1, 1], [], []>} : vector<8x224xf32>, vector<224x24xf32>, vector<8x24xf32> -> vector<8x24xf32>
    %29 = arith.addf %24, %28 : vector<8x24xf32>
    %c3_28 = arith.constant 3 : index
    %c0_29 = arith.constant 0 : index
    %30 = vector.load %arg9[%c3_28, %c0_29] : memref<14x224xf32, #tpu.memory_space<vmem>>, vector<8x224xf32>
    %c3_30 = arith.constant 3 : index
    %c0_31 = arith.constant 0 : index
    %c0_32 = arith.constant 0 : index
    %31 = vector.load %arg6[%c3_30, %c0_31, %c0_32] : memref<7x224x24xf32, #tpu.memory_space<vmem>>, vector<1x224x24xf32>
    %32 = vector.shape_cast %31 : vector<1x224x24xf32> to vector<224x24xf32>
    %cst_33 = arith.constant dense<0.000000e+00> : vector<8x24xf32>
    %33 = tpu.matmul %30, %32, %cst_33 {dimension_numbers = #tpu.dot_dimension_numbers<[1], [0], [0], [1], [0, 0, 1, 1], [], []>} : vector<8x224xf32>, vector<224x24xf32>, vector<8x24xf32> -> vector<8x24xf32>
    %34 = arith.addf %29, %33 : vector<8x24xf32>
    %c4 = arith.constant 4 : index
    %c0_34 = arith.constant 0 : index
    %35 = vector.load %arg9[%c4, %c0_34] : memref<14x224xf32, #tpu.memory_space<vmem>>, vector<8x224xf32>
    %c4_35 = arith.constant 4 : index
    %c0_36 = arith.constant 0 : index
    %c0_37 = arith.constant 0 : index
    %36 = vector.load %arg6[%c4_35, %c0_36, %c0_37] : memref<7x224x24xf32, #tpu.memory_space<vmem>>, vector<1x224x24xf32>
    %37 = vector.shape_cast %36 : vector<1x224x24xf32> to vector<224x24xf32>
    %cst_38 = arith.constant dense<0.000000e+00> : vector<8x24xf32>
    %38 = tpu.matmul %35, %37, %cst_38 {dimension_numbers = #tpu.dot_dimension_numbers<[1], [0], [0], [1], [0, 0, 1, 1], [], []>} : vector<8x224xf32>, vector<224x24xf32>, vector<8x24xf32> -> vector<8x24xf32>
    %39 = arith.addf %34, %38 : vector<8x24xf32>
    %c5 = arith.constant 5 : index
    %c0_39 = arith.constant 0 : index
    %40 = vector.load %arg9[%c5, %c0_39] : memref<14x224xf32, #tpu.memory_space<vmem>>, vector<8x224xf32>
    %c5_40 = arith.constant 5 : index
    %c0_41 = arith.constant 0 : index
    %c0_42 = arith.constant 0 : index
    %41 = vector.load %arg6[%c5_40, %c0_41, %c0_42] : memref<7x224x24xf32, #tpu.memory_space<vmem>>, vector<1x224x24xf32>
    %42 = vector.shape_cast %41 : vector<1x224x24xf32> to vector<224x24xf32>
    %cst_43 = arith.constant dense<0.000000e+00> : vector<8x24xf32>
    %43 = tpu.matmul %40, %42, %cst_43 {dimension_numbers = #tpu.dot_dimension_numbers<[1], [0], [0], [1], [0, 0, 1, 1], [], []>} : vector<8x224xf32>, vector<224x24xf32>, vector<8x24xf32> -> vector<8x24xf32>
    %44 = arith.addf %39, %43 : vector<8x24xf32>
    %c6 = arith.constant 6 : index
    %c0_44 = arith.constant 0 : index
    %45 = vector.load %arg9[%c6, %c0_44] : memref<14x224xf32, #tpu.memory_space<vmem>>, vector<8x224xf32>
    %c6_45 = arith.constant 6 : index
    %c0_46 = arith.constant 0 : index
    %c0_47 = arith.constant 0 : index
    %46 = vector.load %arg6[%c6_45, %c0_46, %c0_47] : memref<7x224x24xf32, #tpu.memory_space<vmem>>, vector<1x224x24xf32>
    %47 = vector.shape_cast %46 : vector<1x224x24xf32> to vector<224x24xf32>
    %cst_48 = arith.constant dense<0.000000e+00> : vector<8x24xf32>
    %48 = tpu.matmul %45, %47, %cst_48 {dimension_numbers = #tpu.dot_dimension_numbers<[1], [0], [0], [1], [0, 0, 1, 1], [], []>} : vector<8x224xf32>, vector<224x24xf32>, vector<8x24xf32> -> vector<8x24xf32>
    %49 = arith.addf %44, %48 : vector<8x24xf32>
    %c0_49 = arith.constant 0 : index
    %c0_50 = arith.constant 0 : index
    %50 = vector.load %arg7[%c0_49, %c0_50] : memref<1x24xf32, #tpu.memory_space<vmem>>, vector<1x24xf32>
    %51 = vector.broadcast %50 : vector<1x24xf32> to vector<8x24xf32>
    %52 = arith.addf %49, %51 : vector<8x24xf32>
    %c0_51 = arith.constant 0 : index
    %c0_52 = arith.constant 0 : index
    %c0_53 = arith.constant 0 : index
    %53 = vector.load %arg5[%c0_51, %c0_52, %c0_53] : memref<1x8x24xf32, #tpu.memory_space<vmem>>, vector<1x8x24xf32>
    %54 = vector.shape_cast %53 : vector<1x8x24xf32> to vector<8x24xf32>
    %55 = arith.addf %52, %54 : vector<8x24xf32>
    %c0_54 = arith.constant 0 : index
    %c0_55 = arith.constant 0 : index
    %c0_56 = arith.constant 0 : index
    %56 = vector.load %arg8[%c0_54, %c0_55, %c0_56] : memref<1x8x24xf32, #tpu.memory_space<vmem>>, vector<1x8x24xf32>
    %57 = vector.shape_cast %56 : vector<1x8x24xf32> to vector<8x24xf32>
    %58 = vector.shape_cast %55 : vector<8x24xf32> to vector<1x8x24xf32>
    tpu.vector_store %arg8[%c0_54, %c0_55, %c0_56], %58 {strides = array<i32>} : memref<1x8x24xf32, #tpu.memory_space<vmem>>, vector<1x8x24xf32>,
    return
  }
  func.func @transform_0(%arg0: i32) -> (i32, i32, i32) {
    %c0_i32 = arith.constant 0 : i32
    %c0_i32_0 = arith.constant 0 : i32
    %c0_i32_1 = arith.constant 0 : i32
    return %arg0, %c0_i32, %c0_i32_0 : i32, i32, i32
  }
  func.func @transform_1(%arg0: i32) -> (i32, i32) {
    %c0_i32 = arith.constant 0 : i32
    %c0_i32_0 = arith.constant 0 : i32
    %c0_i32_1 = arith.constant 0 : i32
    return %c0_i32, %c0_i32_0 : i32, i32
  }
  func.func @transform_2(%arg0: i32) -> (i32, i32) {
    %c0_i32 = arith.constant 0 : i32
    %c0_i32_0 = arith.constant 0 : i32
    %c0_i32_1 = arith.constant 0 : i32
    return %c0_i32, %c0_i32_0 : i32, i32
  }
  func.func @transform_3(%arg0: i32) -> (i32, i32, i32) {
    %c0_i32 = arith.constant 0 : i32
    %c0_i32_0 = arith.constant 0 : i32
    %c0_i32_1 = arith.constant 0 : i32
    return %arg0, %c0_i32, %c0_i32_0 : i32, i32, i32
  }
  func.func @transform_4(%arg0: i32) -> (i32, i32, i32) {
    %c0_i32 = arith.constant 0 : i32
    %c0_i32_0 = arith.constant 0 : i32
    %c0_i32_1 = arith.constant 0 : i32
    return %arg0, %c0_i32, %c0_i32_0 : i32, i32, i32
  }
  func.func @transform_5(%arg0: i32) -> (i32, i32, i32) {
    %c0_i32 = arith.constant 0 : i32
    %c0_i32_0 = arith.constant 0 : i32
    %c0_i32_1 = arith.constant 0 : i32
    %c0_i32_2 = arith.constant 0 : i32
    return %c0_i32, %c0_i32_0, %c0_i32_1 : i32, i32, i32
  }
  func.func @transform_6(%arg0: i32) -> (i32, i32) {
    %c0_i32 = arith.constant 0 : i32
    %c0_i32_0 = arith.constant 0 : i32
    %c0_i32_1 = arith.constant 0 : i32
    return %c0_i32, %c0_i32_0 : i32, i32
  }
  func.func @transform_7(%arg0: i32) -> (i32, i32, i32) {
    %c0_i32 = arith.constant 0 : i32
    %c0_i32_0 = arith.constant 0 : i32
    %c0_i32_1 = arith.constant 0 : i32
    return %arg0, %c0_i32, %c0_i32_0 : i32, i32, i32
  }
}

</mosaic_0001>

<bundles_post_ra>
// kernel: tile.58
= control target key start
LH: loop header
LB: loop body
LE: loop exit
PB: predicated region body
PF: predicated region fallthrough
CT: control target
= control target key end

     0   :  { %s28_s0 = inlined_call_operand.vmem [shape: f32[16], index: 0, kind: input, shape index: {}]   ;;  %s29_s1 = inlined_call_operand.vmem [shape: f32[16,16], index: 1, kind: output, shape index: {}]  }
   0x1   :  { %v4_v0 = vld [vmem:[%s28_s0] ss:$0 sm:$0xff] }
   0x2   :  { %5 = vst [vmem:[%s29_s1] sm:$0xff] %v4_v0  ;;  %8 = vst [vmem:[%s29_s1 + $0x8] sm:$0xff] %v4_v0 }

// kernel: tile.59
= control target key start
LH: loop header
LB: loop body
LE: loop exit
PB: predicated region body
PF: predicated region fallthrough
CT: control target
= control target key end

     0   :  { %s7_s6 = smov 3  ;;  %s21_s9 = smov 3  ;;  %vm4_vm0 = vcmask 130048   ;;  %vm11_vm1 = vcmask 1048448   ;;  %vm18_vm2 = vcmask 917248   ;;  %vm25_vm3 = vcmask 786048   ;;  %s128_s0 = inlined_call_operand.vmem [shape: f32[16,16], index: 0, kind: input, shape index: {}]   ;;  %s129_s1 = inlined_call_operand.vmem [shape: f32[1,256], index: 1, kind: output, shape index: {}]  }
   0x1   :  { %v66_v0 = vld [vmem:[%s128_s0 + $0x7] ss:$8 sm:%s7_s6]   ;;  %s81_s10 = smov 112   ;;  %v68_v1 = vld [vmem:[%s128_s0 + $0x5] ss:$8 sm:%s21_s9]   ;;  %s14_s13 = smov 3 }
   0x2   :  { %9 = vrot.lane.b32.xlu0 %v66_v0, %s81_s10  ;;  %s82_s14 = smov 80   ;;  %v67_v2 = vld [vmem:[%s128_s0 + $0x6] ss:$8 sm:%s14_s13]   ;;  %s28_s17 = smov 3  ;;  %vm32_vm4 = vcmask 654848   ;;  %vm39_vm5 = vcmask 523648  }
   0x3   :  { %23 = vrot.lane.b32.xlu1 %v68_v1, %s82_s14  ;;  %v69_v3 = vld [vmem:[%s128_s0 + $0x4] ss:$8 sm:%s28_s17]   ;;  %s35_s20 = smov 3  ;;  %s42_s21 = smov 3  ;;  %vm46_vm6 = vcmask 392448   ;;  %vm53_vm7 = vcmask 261248  }
   0x4   :  { %s83_s22 = smov 96   ;;  %s84_s23 = smov 64   ;;  %v70_v4 = vld [vmem:[%s128_s0 + $0x3] ss:$8 sm:%s35_s20]   ;;  %v71_v5 = vld [vmem:[%s128_s0 + $0x2] ss:$8 sm:%s42_s21]  }
   0x5   :  { %s2_s26 = smov 3  ;;  %s49_s29 = smov 3 }
   0x6   :  { %16 = vrot.lane.b32.xlu0 %v67_v2, %s83_s22  ;;  %v3_v6 = vld [vmem:[%s128_s0] ss:$8 sm:%s2_s26]   ;;  %s85_s3 = smov 48   ;;  %s86_s4 = smov 32  }
   0x7   :  { %30 = vrot.lane.b32.xlu1 %v69_v3, %s84_s23  ;;  %5 = vst.msk [vmem:[#allocation0] ss:$8 sm:$0x3] %vm4_vm0, %v3_v6   ;;  %v72_v7 = vld [vmem:[%s128_s0 + $0x1] ss:$8 sm:%s49_s29]   ;;  %s87_s0 = smov 16  }
   0xa   :  { %37 = vrot.lane.b32.xlu0 %v70_v4, %s85_s3 }
   0xb   :  { %44 = vrot.lane.b32.xlu1 %v71_v5, %s86_s4 }
   0xe   :  { %51 = vrot.lane.b32.xlu0 %v72_v7, %s87_s0 }
  0x74   :  { %v10_v8 = vpop.permute.xlu0 %9  }
  0x75   :  { %12 = vst.msk [vmem:[#allocation0] ss:$8 sm:$0x3] %vm11_vm1, %v10_v8   ;;  %v24_v9 = vpop.permute.xlu1 %23  }
  0x78   :  { %v17_v10 = vpop.permute.xlu0 %16  }
  0x79   :  { %19 = vst.msk [vmem:[#allocation0] ss:$8 sm:$0x3] %vm18_vm2, %v17_v10   ;;  %v31_v11 = vpop.permute.xlu1 %30  }
  0x7a   :  { %26 = vst.msk [vmem:[#allocation0] ss:$8 sm:$0x3] %vm25_vm3, %v24_v9  }
  0x7b   :  { %33 = vst.msk [vmem:[#allocation0] ss:$8 sm:$0x3] %vm32_vm4, %v31_v11  }
  0x7c   :  { %v38_v12 = vpop.permute.xlu0 %37  }
  0x7d   :  { %40 = vst.msk [vmem:[#allocation0] ss:$8 sm:$0x3] %vm39_vm5, %v38_v12   ;;  %v45_v13 = vpop.permute.xlu1 %44  }
  0x7e   :  { %47 = vst.msk [vmem:[#allocation0] ss:$8 sm:$0x3] %vm46_vm6, %v45_v13  }
  0x80   :  { %v52_v14 = vpop.permute.xlu0 %51  }
  0x81   :  { %54 = vst.msk [vmem:[#allocation0] ss:$8 sm:$0x3] %vm53_vm7, %v52_v14  }
  0x88   :  { %v58_v15 = vld [vmem:[#allocation0] sm:$0x1]  ;;  %v62_v16 = vld [vmem:[#allocation0 + $0x8] sm:$0x1] }
  0x89   :  { %60 = vst [vmem:[%s129_s1] sm:$0x1] %v58_v15  ;;  %73 = vst [vmem:[%s129_s1 + $0x1] sm:$0x1] %v62_v16 }

// kernel: tile.68
= control target key start
LH: loop header
LB: loop body
LE: loop exit
PB: predicated region body
PF: predicated region fallthrough
CT: control target
= control target key end

     0   :  { %s22_s0 = inlined_call_operand.vmem [shape: f32[16], index: 0, kind: input, shape index: {}]   ;;  %s23_s1 = inlined_call_operand.vmem [shape: f32[8,16], index: 1, kind: output, shape index: {}]  }
   0x1   :  { %v4_v0 = vld [vmem:[%s22_s0] ss:$0 sm:$0xff] }
   0x2   :  { %5 = vst [vmem:[%s23_s1] sm:$0xff] %v4_v0 }

// kernel: tile.69
= control target key start
LH: loop header
LB: loop body
LE: loop exit
PB: predicated region body
PF: predicated region fallthrough
CT: control target
= control target key end

     0   :  { %s67_s10 = smov 112   ;;  %s68_s11 = smov 80   ;;  %vm3_vm0 = vcmask 130048   ;;  %vm9_vm1 = vcmask 1048448   ;;  %vm15_vm2 = vcmask 917248   ;;  %vm21_vm3 = vcmask 786048   ;;  %s111_s0 = inlined_call_operand.vmem [shape: f32[8,16], index: 0, kind: input, shape index: {}]   ;;  %s112_s1 = inlined_call_operand.vmem [shape: f32[1,128], index: 1, kind: output, shape index: {}]  }
   0x1   :  { %v53_v0 = vld [vmem:[%s111_s0 + $0x7] sm:$0x1]   ;;  %v55_v1 = vld [vmem:[%s111_s0 + $0x5] sm:$0x1]   ;;  %v54_v2 = vld [vmem:[%s111_s0 + $0x6] sm:$0x1]  }
   0x2   :  { %7 = vrot.lane.b32.xlu0 %v53_v0, %s67_s10  ;;  %19 = vrot.lane.b32.xlu1 %v55_v1, %s68_s11  ;;  %v56_v3 = vld [vmem:[%s111_s0 + $0x4] sm:$0x1]   ;;  %v2_v4 = vld [vmem:[%s111_s0] sm:$0x1]   ;;  %s69_s18 = smov 96   ;;  %s70_s19 = smov 64  }
   0x3   :  { %4 = vst.msk [vmem:[#allocation0] sm:$0x1] %vm3_vm0, %v2_v4   ;;  %v57_v5 = vld [vmem:[%s111_s0 + $0x3] sm:$0x1]   ;;  %v58_v6 = vld [vmem:[%s111_s0 + $0x2] sm:$0x1]  }
   0x4   :  { %s71_s24 = smov 48   ;;  %s72_s25 = smov 32   ;;  %v59_v7 = vld [vmem:[%s111_s0 + $0x1] sm:$0x1]   ;;  %vm27_vm4 = vcmask 654848   ;;  %vm33_vm5 = vcmask 523648  }
   0x5   :  { %s73_s0 = smov 16   ;;  %vm39_vm6 = vcmask 392448   ;;  %vm45_vm7 = vcmask 261248  }
   0x6   :  { %13 = vrot.lane.b32.xlu0 %v54_v2, %s69_s18  ;;  %25 = vrot.lane.b32.xlu1 %v56_v3, %s70_s19 }
   0xa   :  { %31 = vrot.lane.b32.xlu0 %v57_v5, %s71_s24  ;;  %37 = vrot.lane.b32.xlu1 %v58_v6, %s72_s25 }
   0xe   :  { %43 = vrot.lane.b32.xlu0 %v59_v7, %s73_s0 }
  0x74   :  { %v8_v8 = vpop.permute.xlu0 %7   ;;  %v20_v9 = vpop.permute.xlu1 %19  }
  0x75   :  { %10 = vst.msk [vmem:[#allocation0] sm:$0x1] %vm9_vm1, %v8_v8  }
  0x78   :  { %v14_v10 = vpop.permute.xlu0 %13   ;;  %v26_v11 = vpop.permute.xlu1 %25  }
  0x79   :  { %16 = vst.msk [vmem:[#allocation0] sm:$0x1] %vm15_vm2, %v14_v10  }
  0x7a   :  { %22 = vst.msk [vmem:[#allocation0] sm:$0x1] %vm21_vm3, %v20_v9  }
  0x7b   :  { %28 = vst.msk [vmem:[#allocation0] sm:$0x1] %vm27_vm4, %v26_v11  }
  0x7c   :  { %v32_v12 = vpop.permute.xlu0 %31   ;;  %v38_v13 = vpop.permute.xlu1 %37  }
  0x7d   :  { %34 = vst.msk [vmem:[#allocation0] sm:$0x1] %vm33_vm5, %v32_v12  }
  0x7e   :  { %40 = vst.msk [vmem:[#allocation0] sm:$0x1] %vm39_vm6, %v38_v13  }
  0x80   :  { %v44_v14 = vpop.permute.xlu0 %43  }
  0x81   :  { %46 = vst.msk [vmem:[#allocation0] sm:$0x1] %vm45_vm7, %v44_v14  }
  0x88   :  { %v50_v15 = vld [vmem:[#allocation0] sm:$0x1] }
  0x89   :  { %52 = vst [vmem:[%s112_s1] sm:$0x1] %v50_v15 }

// kernel: resizer_forward.5
= control target key start
LH: loop header
LB: loop body
LE: loop exit
PB: predicated region body
PF: predicated region fallthrough
CT: control target
= control target key end

     0   :  { %s2749_s17 = smov 0   ;;  %s3715_s0 = inlined_call_operand.vmem [shape: f32[2,16,48], index: 0, kind: input, shape index: {}]   ;;  %s3716_s1 = inlined_call_operand.vmem [shape: f32[7,66,256], index: 1, kind: input, shape index: {}]   ;;  %s3717_s2 = inlined_call_operand.vmem [shape: f32[1,256], index: 2, kind: input, shape index: {}]   ;;  %s3718_s3 = inlined_call_operand.vmem [shape: f32[256,256], index: 3, kind: input, shape index: {}]   ;;  %s3719_s4 = inlined_call_operand.vmem [shape: f32[1,256], index: 4, kind: input, shape index: {}]   ;;  %s3720_s5 = inlined_call_operand.vmem [shape: f32[8,16], index: 5, kind: input, shape index: {}]   ;;  %s3721_s6 = inlined_call_operand.vmem [shape: f32[256,128], index: 6, kind: input, shape index: {}]   ;;  %s3722_s7 = inlined_call_operand.vmem [shape: f32[48,24], index: 7, kind: input, shape index: {}]   ;;  %s3723_s8 = inlined_call_operand.vmem [shape: f32[256,16], index: 8, kind: input, shape index: {}]   ;;  %s3724_s9 = inlined_call_operand.vmem [shape: f32[2,8,128], index: 9, kind: output, shape index: {0}]   ;;  %s3725_s10 = inlined_call_operand.vmem [shape: f32[2,8,24], index: 10, kind: output, shape index: {1}]   ;;  %s3726_s11 = inlined_call_operand.vmem [shape: f32[2,2,16], index: 11, kind: output, shape index: {2}]  }
   0x1 LB: > { %s2064_s18 = sadd.s32 4294967295, %s2683_s17   ;;  %p2068_p0 = scmp.ge.s32.totalorder %s2683_s17, 1  ;;  %s2683_s17 = sphi %s2749_s17, %s22_s17  }
   0x2   : > { %p342_p1 = scmp.lt.s32.totalorder %s2683_s17, 3 }
   0x4   : > { %p343_p2 = pnand %p2068_p0, %p342_p1 }
   0x5   : > { %p389_p3 = scmp.lt.s32.totalorder (!%p343_p2), %s2064_s18, 1  ;;  %v2075_v0 = vld [vmem:[%s3716_s1 + $0x98] sm:$0xff] (!%p343_p2)  ;;  %v2077_v1 = vld [vmem:[%s3716_s1 + $0xa8] sm:$0xff] (!%p343_p2)  ;;  %v2074_v2 = vld [vmem:[%s3716_s1 + $0x90] sm:$0xff] (!%p343_p2)  ;;  %vm406_vm0 = vcmask (!%p343_p2), 539648   ;;  %vm409_vm1 = vcmask (!%p343_p2), 537600  }
   0x6   : > { %346 = sbr.rel (%p343_p2) target bundleno = 1170 (0x492), region = 56  ;;  %v2353_v3 = vpack.c.bf16 (!%p343_p2), %v2077_v1, %v2075_v0  ;;  %v2076_v4 = vld [vmem:[%s3716_s1 + $0xa0] sm:$0xff] (!%p343_p2)  ;;  %v2079_v5 = vld [vmem:[%s3716_s1 + $0xb8] sm:$0xff] (!%p343_p2)  ;;  %v2081_v6 = vld [vmem:[%s3716_s1 + $0xc8] sm:$0xff] (!%p343_p2)  ;;  %v2685_v12 = vmov (!%p343_p2), 0.0   ;;  %s2686_s15 = smov (!%p343_p2), 9  }
   0x7   : > { %v2355_v7 = vpack.c.bf16 (!%p343_p2), %v2076_v4, %v2074_v2  ;;  %v2357_v8 = vpack.c.bf16 (!%p343_p2), %v2081_v6, %v2079_v5  ;;  %v2078_v9 = vld [vmem:[%s3716_s1 + $0xb0] sm:$0xff] (!%p343_p2)  ;;  %v2080_v10 = vld [vmem:[%s3716_s1 + $0xc0] sm:$0xff] (!%p343_p2)  ;;  %v2083_v11 = vld [vmem:[%s3716_s1 + $0xd8] sm:$0xff] (!%p343_p2)  ;;  %407 = vst.msk [vmem:[#allocation2] sm:$0xff] (!%p343_p2), %vm406_vm0, %v2685_v12  ;;  %542 = vmatprep.mubr.f32.mxu0 (!%p343_p2), %v2685_v12  ;;  %vm471_vm2 = vcmask (!%p343_p2), 1041408   ;;  %vm421_vm3 = vcmask (!%p343_p2), 465992  }
   0x8   : > { %408 = vst.msk [vmem:[#allocation2 + $0x8] sm:$0xff] (!%p343_p2), %vm406_vm0, %v2685_v12  ;;  %2354 = vmatprep.subr.bf16.mxu0 (!%p343_p2), %v2353_v3  ;;  %v2085_v13 = vld [vmem:[%s3716_s1 + $0xe8] sm:$0xff] (!%p343_p2)  ;;  %v2359_v14 = vpack.c.bf16 (!%p343_p2), %v2080_v10, %v2078_v9  ;;  %v2082_v16 = vld [vmem:[%s3716_s1 + $0xd0] sm:$0xff] (!%p343_p2)  ;;  %v2084_v17 = vld [vmem:[%s3716_s1 + $0xe0] sm:$0xff] (!%p343_p2)  ;;  %vm1615_vm12 = vcmask (!%p343_p2), 130048   ;;  %vm2688_vm13 = vmmov (!%p343_p2), 0  }
   0x9   : > { %410 = vst.msk [vmem:[#allocation2 + $0x10] sm:$0x3f] (!%p343_p2), %vm409_vm1, %v2685_v12  ;;  %2356 = vmatpush1.bf16.msra.mxu0 (!%p343_p2), %v2355_v7  ;;  %v2361_v15 = vpack.c.bf16 (!%p343_p2), %v2085_v13, %v2083_v11  ;;  %v2087_v18 = vld [vmem:[%s3716_s1 + $0xf8] sm:$0xff] (!%p343_p2)  ;;  %v2089_v21 = vld [vmem:[%s3716_s1 + $0x108] sm:$0xff] (!%p343_p2)  ;;  %v2363_v23 = vpack.c.bf16 (!%p343_p2), %v2084_v17, %v2082_v16  ;;  %v2086_v25 = vld [vmem:[%s3716_s1 + $0xf0] sm:$0xff] (!%p343_p2)  ;;  %vm1611_vm14 = vcmask (!%p343_p2), 122880  }
   0xa   : > { %2358 = vmatprep.subr.bf16.mxu0 (!%p343_p2), %v2357_v8  ;;  %v2365_v24 = vpack.c.bf16 (!%p343_p2), %v2089_v21, %v2087_v18  ;;  %v2088_v26 = vld [vmem:[%s3716_s1 + $0x100] sm:$0xff] (!%p343_p2)  ;;  %v2091_v28 = vld [vmem:[%s3716_s1 + $0x118] sm:$0x3] (!%p343_p2)  ;;  %v427_v29 = vld [vmem:[%s3716_s1 + $0x8] sm:$0xff] (!%p343_p2)  ;;  %vm1873_vm15 = vcmask (!%p343_p2), 392192  }
   0xb   : > { %v2367_v27 = vpack.c.bf16 (!%p343_p2), %v2088_v26, %v2086_v25  ;;  %v429_v30 = vld [vmem:[%s3716_s1 + $0x18] sm:$0xff] (!%p343_p2)  ;;  %v2090_v31 = vld [vmem:[%s3716_s1 + $0x110] sm:$0x3] (!%p343_p2)  ;;  %v1243_v33 = vld [vmem:[%s3718_s3 + $0x8] sm:$0xff] (!%p343_p2) }
   0xc   : > { %v2369_v32 = vpack.c.bf16 (!%p343_p2), %v429_v30, %v427_v29  ;;  %v1245_v34 = vld [vmem:[%s3718_s3 + $0x18] sm:$0xff] (!%p343_p2)  ;;  %v1242_v35 = vld [vmem:[%s3718_s3] sm:$0xff] (!%p343_p2)  ;;  %v1244_v37 = vld [vmem:[%s3718_s3 + $0x10] sm:$0xff] (!%p343_p2) }
   0xd   : > { %s3728_s18 = smov (!%p389_p3, %s2064_s18), 1  ;;  %2360 = vmatpush1.bf16.msra.mxu0 %v2359_v14  ;;  %v2465_v36 = vpack.c.bf16 %v1245_v34, %v1243_v33  ;;  %v1247_v38 = vld [vmem:[%s3718_s3 + $0x28] sm:$0xff]  ;;  %v1249_v39 = vld [vmem:[%s3718_s3 + $0x38] sm:$0xff]  ;;  %v2467_v40 = vpack.c.bf16 %v1244_v37, %v1242_v35  ;;  %v1246_v42 = vld [vmem:[%s3718_s3 + $0x20] sm:$0xff] }
   0xe   : > { %s2215_s22 = sshll.u32 %s3728_s18, 4  ;;  %2362 = vmatprep.subr.bf16.mxu0 %v2361_v15  ;;  %v2469_v41 = vpack.c.bf16 %v1249_v39, %v1247_v38  ;;  %v1248_v43 = vld [vmem:[%s3718_s3 + $0x30] sm:$0xff]  ;;  %v1251_v44 = vld [vmem:[%s3718_s3 + $0x48] sm:$0xff]  ;;  %v1253_v45 = vld [vmem:[%s3718_s3 + $0x58] sm:$0xff]  ;;  %s2073_s23 = sshll.u32 %s3728_s18, 1 }
   0xf   : > { %s393_s25 = scalar_lea.vmem %s3715_s0, %s2215_s22  ;;  %2466 = vmatprep.subr.bf16.mxu1 %v2465_v36  ;;  %v2471_v46 = vpack.c.bf16 %v1248_v43, %v1246_v42  ;;  %v2473_v47 = vpack.c.bf16 %v1253_v45, %v1251_v44  ;;  %v1250_v48 = vld [vmem:[%s3718_s3 + $0x40] sm:$0xff]  ;;  %v1252_v49 = vld [vmem:[%s3718_s3 + $0x50] sm:$0xff]  ;;  %v1255_v50 = vld [vmem:[%s3718_s3 + $0x68] sm:$0xff]  ;;  %s405_s26 = scalar_lea.vmem %s3726_s11, %s2073_s23 }
  0x10   : > { %v2808_v19 = vld [vmem:[%s393_s25] sm:$0xff]  ;;  %v2810_v20 = vld [vmem:[%s393_s25 + $0x8] sm:$0xff]  ;;  %2468 = vmatpush1.bf16.msra.mxu1 %v2467_v40  ;;  %v1257_v51 = vld [vmem:[%s3718_s3 + $0x78] sm:$0xff]  ;;  %v2475_v53 = vpack.c.bf16 %v1252_v49, %v1250_v48  ;;  %s2071_s27 = sshll.u32 %s3728_s18, 3 }
  0x11   : > { %415 = vrot.lane.b32.xlu0 %v2808_v19, %s2686_s15  ;;  %v2630_v22 = vpack.c.bf16 %v2810_v20, %v2808_v19  ;;  %2364 = vmatpush1.bf16.msra.mxu0 %v2363_v23  ;;  %v2477_v54 = vpack.c.bf16 %v1257_v51, %v1255_v50  ;;  %v1254_v55 = vld [vmem:[%s3718_s3 + $0x60] sm:$0xff]  ;;  %v1256_v56 = vld [vmem:[%s3718_s3 + $0x70] sm:$0xff]  ;;  %v431_v59 = vld [vmem:[%s3716_s1 + $0x28] sm:$0xff]  ;;  %s401_s30 = scalar_lea.vmem %s3725_s10, %s2071_s27  ;;  %s397_s14 = scalar_lea.vmem %s3724_s9, %s2071_s27 }
  0x12   : > { %2366 = vmatprep.subr.bf16.mxu0 %v2365_v24  ;;  %2470 = vmatprep.subr.bf16.mxu1 %v2469_v41  ;;  %v426_v57 = vld [vmem:[%s3716_s1] sm:$0xff]  ;;  %v428_v58 = vld [vmem:[%s3716_s1 + $0x10] sm:$0xff]  ;;  %v433_v61 = vld [vmem:[%s3716_s1 + $0x38] sm:$0xff]  ;;  %v2479_v0 = vpack.c.bf16 %v1256_v56, %v1254_v55 }
  0x13   : > { %v1259_v62 = vld [vmem:[%s3718_s3 + $0x88] sm:$0xff]  ;;  %v1261_v63 = vld [vmem:[%s3718_s3 + $0x98] sm:$0xff]  ;;  %v2371_v1 = vpack.c.bf16 %v428_v58, %v426_v57  ;;  %v430_v2 = vld [vmem:[%s3716_s1 + $0x20] sm:$0xff]  ;;  %v2373_v5 = vpack.c.bf16 %v433_v61, %v431_v59 }
  0x14   : > { %2472 = vmatpush1.bf16.msra.mxu1 %v2471_v46  ;;  %v1258_v3 = vld [vmem:[%s3718_s3 + $0x80] sm:$0xff]  ;;  %v1260_v4 = vld [vmem:[%s3718_s3 + $0x90] sm:$0xff]  ;;  %v435_v7 = vld [vmem:[%s3716_s1 + $0x48] sm:$0xff]  ;;  %v2481_v9 = vpack.c.bf16 %v1261_v63, %v1259_v62 }
  0x15   : > { %417 = vrot.lane.b32.xlu0 %v2810_v20, %s2686_s15  ;;  %2368 = vmatpush1.bf16.msra.mxu0 %v2367_v27  ;;  %v432_v6 = vld [vmem:[%s3716_s1 + $0x30] sm:$0xff]  ;;  %v437_v8 = vld [vmem:[%s3716_s1 + $0x58] sm:$0xff]  ;;  %v1263_v11 = vld [vmem:[%s3718_s3 + $0xa8] sm:$0xff]  ;;  %v2483_v14 = vpack.c.bf16 %v1260_v4, %v1258_v3 }
  0x16   : > { %2092 = vmatprep.subr.msk.mxu0 %vm471_vm2, %v2091_v28  ;;  %2474 = vmatprep.subr.bf16.mxu1 %v2473_v47  ;;  %v1265_v13 = vld [vmem:[%s3718_s3 + $0xb8] sm:$0xff]  ;;  %v2375_v15 = vpack.c.bf16 %v432_v6, %v430_v2  ;;  %v434_v16 = vld [vmem:[%s3716_s1 + $0x40] sm:$0xff]  ;;  %v1264_v18 = vld [vmem:[%s3718_s3 + $0xb0] sm:$0xff]  ;;  %v2377_v21 = vpack.c.bf16 %v437_v8, %v435_v7 }
  0x17   : > { %v1262_v17 = vld [vmem:[%s3718_s3 + $0xa0] sm:$0xff]  ;;  %v436_v23 = vld [vmem:[%s3716_s1 + $0x50] sm:$0xff]  ;;  %v2485_v24 = vpack.c.bf16 %v1265_v13, %v1263_v11  ;;  %v1267_v25 = vld [vmem:[%s3718_s3 + $0xc8] sm:$0xff] }
  0x18   : > { %2476 = vmatpush1.bf16.msra.mxu1 %v2475_v53  ;;  %v1269_v26 = vld [vmem:[%s3718_s3 + $0xd8] sm:$0xff]  ;;  %v439_v28 = vld [vmem:[%s3716_s1 + $0x68] sm:$0xff]  ;;  %v2487_v30 = vpack.c.bf16 %v1264_v18, %v1262_v17  ;;  %v1266_v34 = vld [vmem:[%s3718_s3 + $0xc0] sm:$0xff] }
  0x19   : > { %2093 = vmatpush1.msk.msra.mxu0 %vm471_vm2, %v2090_v31  ;;  %2478 = vmatprep.subr.bf16.mxu1 %v2477_v54  ;;  %v441_v29 = vld [vmem:[%s3716_s1 + $0x78] sm:$0xff]  ;;  %v2379_v31 = vpack.c.bf16 %v436_v23, %v434_v16  ;;  %v2489_v33 = vpack.c.bf16 %v1269_v26, %v1267_v25  ;;  %v1268_v35 = vld [vmem:[%s3718_s3 + $0xd0] sm:$0xff]  ;;  %v1271_v38 = vld [vmem:[%s3718_s3 + $0xe8] sm:$0xff] }
  0x1a   : > { %2370 = vmatprep.subr.bf16.mxu0 %v2369_v32  ;;  %v438_v32 = vld [vmem:[%s3716_s1 + $0x60] sm:$0xff]  ;;  %v2381_v36 = vpack.c.bf16 %v441_v29, %v439_v28  ;;  %v440_v37 = vld [vmem:[%s3716_s1 + $0x70] sm:$0xff]  ;;  %v1273_v39 = vld [vmem:[%s3718_s3 + $0xf8] sm:$0xff]  ;;  %v2491_v40 = vpack.c.bf16 %v1268_v35, %v1266_v34 }
  0x1b   : > { %v2383_v41 = vpack.c.bf16 %v440_v37, %v438_v32  ;;  %v2493_v42 = vpack.c.bf16 %v1273_v39, %v1271_v38  ;;  %v1270_v43 = vld [vmem:[%s3718_s3 + $0xe0] sm:$0xff]  ;;  %v1272_v44 = vld [vmem:[%s3718_s3 + $0xf0] sm:$0xff]  ;;  %v1275_v45 = vld [vmem:[%s3718_s3 + $0x108] sm:$0xff] }
  0x1c   : > { %2480 = vmatpush1.bf16.msra.mxu1 %v2479_v0  ;;  %v1277_v46 = vld [vmem:[%s3718_s3 + $0x118] sm:$0xff]  ;;  %v443_v47 = vld [vmem:[%s3716_s1 + $0x88] sm:$0x3]  ;;  %v2100_v50 = vld [vmem:[%s3716_s1 + $0x120] sm:$0xff]  ;;  %v2495_v53 = vpack.c.bf16 %v1272_v44, %v1270_v43 }
  0x1d   : > { %2482 = vmatprep.subr.bf16.mxu1 %v2481_v9  ;;  %v2101_v48 = vld [vmem:[%s3716_s1 + $0x128] sm:$0xff]  ;;  %v2103_v49 = vld [vmem:[%s3716_s1 + $0x138] sm:$0xff]  ;;  %v2102_v51 = vld [vmem:[%s3716_s1 + $0x130] sm:$0xff]  ;;  %v2497_v55 = vpack.c.bf16 %v1277_v46, %v1275_v45 }
  0x1e   : > { %v2107_v54 = vld [vmem:[%s3716_s1 + $0x158] sm:$0xff]  ;;  %v1274_v56 = vld [vmem:[%s3718_s3 + $0x100] sm:$0xff]  ;;  %v1276_v57 = vld [vmem:[%s3718_s3 + $0x110] sm:$0xff]  ;;  %v2385_v59 = vpack.c.bf16 %v2103_v49, %v2101_v48  ;;  %v2387_v62 = vpack.c.bf16 %v2102_v51, %v2100_v50 }
  0x1f   : > { %v442_v58 = vld [vmem:[%s3716_s1 + $0x80] sm:$0x3]  ;;  %v1281_v61 = vld [vmem:[%s3718_s3 + $0x138] sm:$0xff]  ;;  %v2109_v2 = vld [vmem:[%s3716_s1 + $0x168] sm:$0xff]  ;;  %v2499_v4 = vpack.c.bf16 %v1276_v57, %v1274_v56 }
  0x20   : > { %2484 = vmatpush1.bf16.msra.mxu1 %v2483_v14  ;;  %v2104_v63 = vld [vmem:[%s3716_s1 + $0x140] sm:$0xff]  ;;  %v2111_v3 = vld [vmem:[%s3716_s1 + $0x178] sm:$0xff]  ;;  %v1280_v8 = vld [vmem:[%s3718_s3 + $0x130] sm:$0xff] }
  0x21   : > { %2486 = vmatprep.subr.bf16.mxu1 %v2485_v24  ;;  %v1278_v7 = vld [vmem:[%s3718_s3 + $0x120] sm:$0xff]  ;;  %v1283_v9 = vld [vmem:[%s3718_s3 + $0x148] sm:$0xff]  ;;  %v2393_v14 = vpack.c.bf16 %v2111_v3, %v2109_v2  ;;  %v2115_v17 = vld [vmem:[%s3716_s1 + $0x198] sm:$0xff] }
  0x22   : > { %v2108_v13 = vld [vmem:[%s3716_s1 + $0x160] sm:$0xff]  ;;  %v2113_v16 = vld [vmem:[%s3716_s1 + $0x188] sm:$0xff]  ;;  %v2503_v18 = vpack.c.bf16 %v1280_v8, %v1278_v7  ;;  %v1284_v25 = vld [vmem:[%s3718_s3 + $0x150] sm:$0xff] }
  0x23   : > { %v1282_v24 = vld [vmem:[%s3718_s3 + $0x140] sm:$0xff]  ;;  %v1287_v26 = vld [vmem:[%s3718_s3 + $0x168] sm:$0xff]  ;;  %v2397_v29 = vpack.c.bf16 %v2115_v17, %v2113_v16  ;;  %v1288_v35 = vld [vmem:[%s3718_s3 + $0x170] sm:$0xff] }
  0x24   : > { %2488 = vmatpush1.bf16.msra.mxu1 %v2487_v30  ;;  %v2112_v30 = vld [vmem:[%s3716_s1 + $0x180] sm:$0xff]  ;;  %v2507_v32 = vpack.c.bf16 %v1284_v25, %v1282_v24  ;;  %v1293_v37 = vld [vmem:[%s3718_s3 + $0x198] sm:$0xff]  ;;  %v2122_v44 = vld [vmem:[%s3716_s1 + $0x1b0] sm:$0xff] }
  0x25   : > { %2490 = vmatprep.subr.bf16.mxu1 %v2489_v33  ;;  %v1286_v34 = vld [vmem:[%s3718_s3 + $0x160] sm:$0xff]  ;;  %v2127_v46 = vld [vmem:[%s3716_s1 + $0x1d8] sm:$0xff]  ;;  %v1292_v49 = vld [vmem:[%s3718_s3 + $0x190] sm:$0xff] }
  0x26   : > { %v2511_v39 = vpack.c.bf16 %v1288_v35, %v1286_v34  ;;  %v2124_v45 = vld [vmem:[%s3716_s1 + $0x1c0] sm:$0xff]  ;;  %v2130_v3 = vld [vmem:[%s3716_s1 + $0x1f0] sm:$0xff]  ;;  %v2135_v7 = vld [vmem:[%s3716_s1 + $0x218] sm:$0xff] }
  0x27   : > { %v1290_v48 = vld [vmem:[%s3718_s3 + $0x180] sm:$0xff]  ;;  %v2137_v8 = vld [vmem:[%s3716_s1 + $0x228] sm:$0xff]  ;;  %v2147_v17 = vld [vmem:[%s3716_s1 + $0x258] sm:$0xff] }
  0x28   : > { %2492 = vmatpush1.bf16.msra.mxu1 %v2491_v40  ;;  %v2117_v40 = vld [vmem:[%s3716_s1 + $0x1a8] sm:$0x3]  ;;  %v2116_v50 = vld [vmem:[%s3716_s1 + $0x1a0] sm:$0x3]  ;;  %v2151_v24 = vld [vmem:[%s3716_s1 + $0x278] sm:$0xff] }
  0x29   : > { %2494 = vmatprep.subr.bf16.mxu1 %v2493_v42  ;;  %v2125_v42 = vld [vmem:[%s3716_s1 + $0x1c8] sm:$0xff]  ;;  %v2128_v57 = vld [vmem:[%s3716_s1 + $0x1e0] sm:$0xff]  ;;  %v2138_v25 = vld [vmem:[%s3716_s1 + $0x230] sm:$0x3] }
  0x2a   : > { %v2145_v16 = vld [vmem:[%s3716_s1 + $0x248] sm:$0xff]  ;;  %v1690_v19 = vld [vmem:[%s3721_s6] sm:$0xff] }
  0x2c   : > { %2496 = vmatpush1.bf16.msra.mxu1 %v2495_v53  ;;  %v1297_v53 = vld [vmem:[%s3718_s3 + $0x1b8] sm:$0xff] }
  0x2d   : > { %2498 = vmatprep.subr.bf16.mxu1 %v2497_v55  ;;  %v2126_v55 = vld [vmem:[%s3716_s1 + $0x1d0] sm:$0xff] }
  0x30   : > { %2500 = vmatpush1.bf16.msra.mxu1 %v2499_v4  ;;  %v2132_v4 = vld [vmem:[%s3716_s1 + $0x200] sm:$0xff] }
  0x83   : > { %v416_v52 = vpop.permute.xlu0 %415 }
  0x84   : > { %422 = vst.msk [vmem:[#allocation2 + $0x3] sm:$0xff] %vm421_vm3, %v416_v52  ;;  %v2105_v52 = vld [vmem:[%s3716_s1 + $0x148] sm:$0xff] }
  0x85   : > { %v2389_v0 = vpack.c.bf16 %v2107_v54, %v2105_v52  ;;  %v1295_v52 = vld [vmem:[%s3718_s3 + $0x1a8] sm:$0xff]  ;;  %v2403_v54 = vpack.c.bf16 %v2124_v45, %v2122_v44  ;;  %v2158_v44 = vld [vmem:[%s3716_s1 + $0x2b0] sm:$0xff] }
  0x87   : > { %v418_v60 = vpop.permute.xlu0 %417 }
  0x88   : > { %423 = vst.msk [vmem:[#allocation2 + $0xb] sm:$0xff] %vm421_vm3, %v418_v60  ;;  %v1279_v60 = vld [vmem:[%s3718_s3 + $0x128] sm:$0xff] }
  0x89   : > { %v2501_v6 = vpack.c.bf16 %v1281_v61, %v1279_v60  ;;  %v2515_v60 = vpack.c.bf16 %v1292_v49, %v1290_v48  ;;  %v2169_v48 = vld [vmem:[%s3716_s1 + $0x2e8] sm:$0xff]  ;;  %v2166_v49 = vld [vmem:[%s3716_s1 + $0x2d0] sm:$0xff] }
  0x8b   : > { %v444_v10 = vld [vmem:[#allocation2 + $0x1] sm:$0xff]  ;;  %2502 = vmatprep.subr.bf16.mxu1 %v2501_v6 }
  0x8c   : > { %2094 = vmatmul.mubr.msk.f32.vlgmr.msra.gmra.mrb[0].mxu0 %vm406_vm0, %v444_v10  ;;  %v1285_v10 = vld [vmem:[%s3718_s3 + $0x158] sm:$0xff]  ;;  %2504 = vmatpush1.bf16.msra.mxu1 %v2503_v18  ;;  %v644_v61 = vld [vmem:[#allocation2 + $0x2] sm:$0xff] }
  0x8d   : > { %2372 = vmatpush1.bf16.msra.mxu0 %v2371_v1  ;;  %548 = vmatprep.mubr.f32.mxu0 %v2685_v12  ;;  %v2106_v1 = vld [vmem:[%s3716_s1 + $0x150] sm:$0xff]  ;;  %v2505_v23 = vpack.c.bf16 %v1285_v10, %v1283_v9  ;;  %v2411_v9 = vpack.c.bf16 %v2132_v4, %v2130_v3  ;;  %v2413_v10 = vpack.c.bf16 %v2137_v8, %v2135_v7  ;;  %v2144_v18 = vld [vmem:[%s3716_s1 + $0x240] sm:$0xff]  ;;  %v2179_v3 = vld [vmem:[%s3716_s1 + $0x338] sm:$0xff] }
  0x8e   : > { %2374 = vmatprep.subr.bf16.mxu0 %v2373_v5  ;;  %v424_v5 = vld [vmem:[#allocation2] sm:$0xff]  ;;  %v2391_v11 = vpack.c.bf16 %v2106_v1, %v2104_v63  ;;  %v2407_v1 = vpack.c.bf16 %v2128_v57, %v2126_v55  ;;  %v2170_v57 = vld [vmem:[%s3716_s1 + $0x2f0] sm:$0xff]  ;;  %v2181_v4 = vld [vmem:[%s3716_s1 + $0x348] sm:$0xff] }
  0x8f   : > { %v445_v27 = vld [vmem:[#allocation2 + $0x9] sm:$0xff]  ;;  %2506 = vmatprep.subr.bf16.mxu1 %v2505_v23  ;;  %v1294_v63 = vld [vmem:[%s3718_s3 + $0x1a0] sm:$0xff] }
  0x90   : > { %2095 = vmatmul.mubr.msk.f32.gmra.mrb[2].mxu0 %vm406_vm0, %v445_v27  ;;  %v1289_v27 = vld [vmem:[%s3718_s3 + $0x178] sm:$0xff]  ;;  %2508 = vmatpush1.bf16.msra.mxu1 %v2507_v32  ;;  %v645_v6 = vld [vmem:[#allocation2 + $0xa] sm:$0xff]  ;;  %v2180_v8 = vld [vmem:[%s3716_s1 + $0x340] sm:$0xff] }
  0x91   : > { %2376 = vmatpush1.bf16.msra.mxu0 %v2375_v15  ;;  %631 = vmatprep.mubr.f32.mxu0 %v2685_v12  ;;  %v2110_v15 = vld [vmem:[%s3716_s1 + $0x170] sm:$0xff]  ;;  %v2509_v33 = vpack.c.bf16 %v1289_v27, %v1287_v26  ;;  %v2149_v23 = vld [vmem:[%s3716_s1 + $0x268] sm:$0xff]  ;;  %v2417_v26 = vpack.c.bf16 %v2147_v17, %v2145_v16  ;;  %v2195_v17 = vld [vmem:[%s3716_s1 + $0x398] sm:$0xff] }
  0x92   : > { %2378 = vmatprep.subr.bf16.mxu0 %v2377_v21  ;;  %v425_v21 = vld [vmem:[#allocation2 + $0x8] sm:$0xff]  ;;  %v2395_v28 = vpack.c.bf16 %v2110_v15, %v2108_v13  ;;  %v2136_v13 = vld [vmem:[%s3716_s1 + $0x220] sm:$0xff]  ;;  %v2139_v15 = vld [vmem:[%s3716_s1 + $0x238] sm:$0x3] }
  0x93   : > { %2510 = vmatprep.subr.bf16.mxu1 %v2509_v33  ;;  %v2153_v32 = vld [vmem:[%s3716_s1 + $0x288] sm:$0xff]  ;;  %v2155_v33 = vld [vmem:[%s3716_s1 + $0x298] sm:$0xff]  ;;  %v2178_v7 = vld [vmem:[%s3716_s1 + $0x330] sm:$0xff] }
  0x94   : > { %2512 = vmatpush1.bf16.msra.mxu1 %v2511_v39  ;;  %v2425_v35 = vpack.c.bf16 %v2155_v33, %v2153_v32  ;;  %v2157_v39 = vld [vmem:[%s3716_s1 + $0x2a8] sm:$0xff]  ;;  %v2196_v32 = vld [vmem:[%s3716_s1 + $0x3a0] sm:$0xff]  ;;  %v2198_v33 = vld [vmem:[%s3716_s1 + $0x3b0] sm:$0xff] }
  0x95   : > { %2380 = vmatpush1.bf16.msra.mxu0 %v2379_v31  ;;  %v2114_v31 = vld [vmem:[%s3716_s1 + $0x190] sm:$0xff]  ;;  %v2193_v16 = vld [vmem:[%s3716_s1 + $0x388] sm:$0xff] }
  0x96   : > { %2382 = vmatprep.subr.bf16.mxu0 %v2381_v36  ;;  %v1291_v36 = vld [vmem:[%s3718_s3 + $0x188] sm:$0xff]  ;;  %v2399_v38 = vpack.c.bf16 %v2114_v31, %v2112_v30  ;;  %v2150_v30 = vld [vmem:[%s3716_s1 + $0x270] sm:$0xff] }
  0x97   : > { %v2513_v43 = vpack.c.bf16 %v1293_v37, %v1291_v36  ;;  %v758_v31 = vld [vmem:[#allocation2 + $0x3] sm:$0xff]  ;;  %v2154_v37 = vld [vmem:[%s3716_s1 + $0x290] sm:$0xff] }
  0x98   : > { %v2152_v36 = vld [vmem:[%s3716_s1 + $0x280] sm:$0xff] }
  0x99   : > { %2384 = vmatpush1.bf16.msra.mxu0 %v2383_v41  ;;  %v2123_v41 = vld [vmem:[%s3716_s1 + $0x1b8] sm:$0xff]  ;;  %2514 = vmatprep.subr.bf16.mxu1 %v2513_v43  ;;  %v2156_v43 = vld [vmem:[%s3716_s1 + $0x2a0] sm:$0xff] }
  0x9a   : > { %2096 = vmatprep.subr.msk.mxu0 %vm471_vm2, %v443_v47  ;;  %v2129_v47 = vld [vmem:[%s3716_s1 + $0x1e8] sm:$0xff]  ;;  %v2401_v51 = vpack.c.bf16 %v2125_v42, %v2123_v41  ;;  %2516 = vmatpush1.bf16.msra.mxu1 %v2515_v60  ;;  %v2427_v41 = vpack.c.bf16 %v2154_v37, %v2152_v36  ;;  %v2431_v45 = vpack.c.bf16 %v2158_v44, %v2156_v43  ;;  %v2175_v60 = vld [vmem:[%s3716_s1 + $0x318] sm:$0xff]  ;;  %v2204_v43 = vld [vmem:[%s3716_s1 + $0x3e0] sm:$0x3] }
  0x9b   : > { %v2405_v56 = vpack.c.bf16 %v2129_v47, %v2127_v46  ;;  %v2161_v46 = vld [vmem:[%s3716_s1 + $0x2c8] sm:$0x3]  ;;  %v2167_v47 = vld [vmem:[%s3716_s1 + $0x2d8] sm:$0xff]  ;;  %v2459_v37 = vpack.c.bf16 %v2198_v33, %v2196_v32  ;;  %v1441_v33 = vld [vmem:[%s3723_s8 + $0xa0] sm:$0xff] }
  0x9c   : > { %v2203_v36 = vld [vmem:[%s3716_s1 + $0x3d8] sm:$0xff]  ;;  %v1100_v44 = vld [vmem:[#allocation2 + $0x6] sm:$0xff] }
  0x9d   : > { %2097 = vmatpush1.msk.msra.mxu0 %vm471_vm2, %v442_v58  ;;  %v2131_v58 = vld [vmem:[%s3716_s1 + $0x1f8] sm:$0xff] }
  0x9e   : > { %2098 = vmatmul.mubr.msk.f32.vlgmr.msra.gmra.mrb[0].mxu0 %vm406_vm0, %v424_v5  ;;  %2386 = vmatprep.subr.bf16.mxu0 %v2385_v59  ;;  %v2133_v59 = vld [vmem:[%s3716_s1 + $0x208] sm:$0xff] }
  0x9f   : > { %2388 = vmatpush1.bf16.msra.mxu0 %v2387_v62  ;;  %637 = vmatprep.mubr.f32.mxu0 %v2685_v12  ;;  %v2517_v62 = vpack.c.bf16 %v1297_v53, %v1295_v52  ;;  %v2409_v2 = vpack.c.bf16 %v2133_v59, %v2131_v58  ;;  %v2173_v52 = vld [vmem:[%s3716_s1 + $0x308] sm:$0xff]  ;;  %v2160_v53 = vld [vmem:[%s3716_s1 + $0x2c0] sm:$0x3] }
  0xa0   : > { %2390 = vmatprep.subr.bf16.mxu0 %v2389_v0  ;;  %v1296_v0 = vld [vmem:[%s3718_s3 + $0x1b0] sm:$0xff]  ;;  %v2172_v58 = vld [vmem:[%s3716_s1 + $0x300] sm:$0xff] }
  0xa1   : > { %v2519_v5 = vpack.c.bf16 %v1296_v0, %v1294_v63  ;;  %2518 = vmatprep.subr.bf16.mxu1 %v2517_v62  ;;  %v872_v59 = vld [vmem:[#allocation2 + $0x4] sm:$0xff]  ;;  %v2439_v62 = vpack.c.bf16 %v2172_v58, %v2170_v57  ;;  %v2174_v0 = vld [vmem:[%s3716_s1 + $0x310] sm:$0xff] }
  0xa2   : > { %2099 = vmatmul.mubr.msk.f32.gmra.mrb[2].mxu0 %vm406_vm0, %v425_v21  ;;  %v2146_v21 = vld [vmem:[%s3716_s1 + $0x250] sm:$0xff]  ;;  %v1437_v58 = vld [vmem:[%s3723_s8 + $0x80] sm:$0xff] }
  0xa3   : > { %2392 = vmatpush1.bf16.msra.mxu0 %v2391_v11  ;;  %741 = vmatprep.mubr.f32.mxu0 %v2685_v12  ;;  %v2134_v11 = vld [vmem:[%s3716_s1 + $0x210] sm:$0xff]  ;;  %v2419_v27 = vpack.c.bf16 %v2146_v21, %v2144_v18 }
  0xa4   : > { %2394 = vmatprep.subr.bf16.mxu0 %v2393_v14  ;;  %2520 = vmatpush1.bf16.msra.mxu1 %v2519_v5  ;;  %v2415_v14 = vpack.c.bf16 %v2136_v13, %v2134_v11  ;;  %v2189_v11 = vld [vmem:[%s3716_s1 + $0x368] sm:$0xff]  ;;  %v2191_v13 = vld [vmem:[%s3716_s1 + $0x378] sm:$0xff]  ;;  %v2182_v18 = vld [vmem:[%s3716_s1 + $0x350] sm:$0x3] }
  0xa5   : > { %v2449_v21 = vpack.c.bf16 %v2191_v13, %v2189_v11  ;;  %v1439_v11 = vld [vmem:[%s3723_s8 + $0x90] sm:$0xff]  ;;  %v1440_v13 = vld [vmem:[%s3723_s8 + $0x98] sm:$0xff] }
  0xa7   : > { %2396 = vmatpush1.bf16.msra.mxu0 %v2395_v28  ;;  %v2421_v28 = vpack.c.bf16 %v2151_v24, %v2149_v23  ;;  %v2453_v24 = vpack.c.bf16 %v2195_v17, %v2193_v16 }
  0xa8   : > { %2398 = vmatprep.subr.bf16.mxu0 %v2397_v29  ;;  %v2148_v29 = vld [vmem:[%s3716_s1 + $0x260] sm:$0xff] }
  0xa9   : > { %v2423_v34 = vpack.c.bf16 %v2150_v30, %v2148_v29  ;;  %v2199_v29 = vld [vmem:[%s3716_s1 + $0x3b8] sm:$0xff] }
  0xab   : > { %2400 = vmatpush1.bf16.msra.mxu0 %v2399_v38  ;;  %v759_v38 = vld [vmem:[#allocation2 + $0xb] sm:$0xff] }
  0xac   : > { %2118 = vmatprep.subr.msk.mxu0 %vm471_vm2, %v2117_v40  ;;  %v2159_v40 = vld [vmem:[%s3716_s1 + $0x2b8] sm:$0xff] }
  0xad   : > { %v2429_v42 = vpack.c.bf16 %v2159_v40, %v2157_v39  ;;  %v2200_v39 = vld [vmem:[%s3716_s1 + $0x3c0] sm:$0xff]  ;;  %v2202_v40 = vld [vmem:[%s3716_s1 + $0x3d0] sm:$0xff] }
  0xaf   : > { %2119 = vmatpush1.msk.msra.mxu0 %vm471_vm2, %v2116_v50  ;;  %v2168_v50 = vld [vmem:[%s3716_s1 + $0x2e0] sm:$0xff] }
  0xb0   : > { %2120 = vmatmul.mubr.msk.f32.vlgmr.msra.gmra.mrb[0].mxu0 %vm406_vm0, %v644_v61  ;;  %2402 = vmatprep.subr.bf16.mxu0 %v2401_v51  ;;  %v2171_v51 = vld [vmem:[%s3716_s1 + $0x2f8] sm:$0xff]  ;;  %v2435_v55 = vpack.c.bf16 %v2168_v50, %v2166_v49  ;;  %v2177_v61 = vld [vmem:[%s3716_s1 + $0x328] sm:$0xff]  ;;  %v1298_v49 = vld [vmem:[%s3718_s3 + $0x1c0] sm:$0xff] }
  0xb1   : > { %2404 = vmatpush1.bf16.msra.mxu0 %v2403_v54  ;;  %747 = vmatprep.mubr.f32.mxu0 %v2685_v12  ;;  %v2433_v54 = vpack.c.bf16 %v2169_v48, %v2167_v47  ;;  %v2441_v63 = vpack.c.bf16 %v2177_v61, %v2175_v60  ;;  %v1301_v47 = vld [vmem:[%s3718_s3 + $0x1d8] sm:$0xff]  ;;  %v1300_v50 = vld [vmem:[%s3718_s3 + $0x1d0] sm:$0xff]  ;;  %v1216_v61 = vlaneseq }
  0xb2   : > { %2406 = vmatprep.subr.bf16.mxu0 %v2405_v56  ;;  %v2437_v56 = vpack.c.bf16 %v2173_v52, %v2171_v51  ;;  %v2523_v51 = vpack.c.bf16 %v1300_v50, %v1298_v49  ;;  %v1303_v52 = vld [vmem:[%s3718_s3 + $0x1e8] sm:$0xff] }
  0xb3   : > { %v1430_v49 = vld [vmem:[%s3723_s8 + $0x48] sm:$0xff] }
  0xb4   : > { %2121 = vmatmul.mubr.msk.f32.gmra.mrb[2].mxu0 %vm406_vm0, %v645_v6  ;;  %v2445_v6 = vpack.c.bf16 %v2181_v4, %v2179_v3 }
  0xb5   : > { %2408 = vmatpush1.bf16.msra.mxu0 %v2407_v1  ;;  %855 = vmatprep.mubr.f32.mxu0 %v2685_v12  ;;  %v2176_v1 = vld [vmem:[%s3716_s1 + $0x320] sm:$0xff] }
  0xb6   : > { %2410 = vmatprep.subr.bf16.mxu0 %v2409_v2  ;;  %v873_v2 = vld [vmem:[#allocation2 + $0xc] sm:$0xff]  ;;  %v2443_v5 = vpack.c.bf16 %v2176_v1, %v2174_v0  ;;  %v1214_v0 = vld [vmem:[%s3717_s2] sm:$0x3] }
  0xb9   : > { %2412 = vmatpush1.bf16.msra.mxu0 %v2411_v9  ;;  %v2447_v9 = vpack.c.bf16 %v2180_v8, %v2178_v7  ;;  %v1421_v8 = vld [vmem:[%s3723_s8] sm:$0xff] }
  0xba   : > { %2414 = vmatprep.subr.bf16.mxu0 %v2413_v10  ;;  %v2183_v10 = vld [vmem:[%s3716_s1 + $0x358] sm:$0x3] }
  0xbd   : > { %2416 = vmatpush1.bf16.msra.mxu0 %v2415_v14  ;;  %v2188_v14 = vld [vmem:[%s3716_s1 + $0x360] sm:$0xff] }
  0xbe   : > { %2140 = vmatprep.subr.msk.mxu0 %vm471_vm2, %v2139_v15  ;;  %v2190_v15 = vld [vmem:[%s3716_s1 + $0x370] sm:$0xff] }
  0xbf   : > { %v2451_v23 = vpack.c.bf16 %v2190_v15, %v2188_v14 }
  0xc1   : > { %2141 = vmatpush1.msk.msra.mxu0 %vm471_vm2, %v2138_v25  ;;  %v2192_v25 = vld [vmem:[%s3716_s1 + $0x380] sm:$0xff] }
  0xc2   : > { %2142 = vmatmul.mubr.msk.f32.vlgmr.msra.gmra.mrb[0].mxu0 %vm406_vm0, %v758_v31  ;;  %2418 = vmatprep.subr.bf16.mxu0 %v2417_v26  ;;  %v2194_v26 = vld [vmem:[%s3716_s1 + $0x390] sm:$0xff] }
  0xc3   : > { %2420 = vmatpush1.bf16.msra.mxu0 %v2419_v27  ;;  %861 = vmatprep.mubr.f32.mxu0 %v2685_v12  ;;  %v986_v27 = vld [vmem:[#allocation2 + $0x5] sm:$0xff]  ;;  %v2455_v30 = vpack.c.bf16 %v2194_v26, %v2192_v25  ;;  %v1423_v25 = vld [vmem:[%s3723_s8 + $0x10] sm:$0xff]  ;;  %v1424_v26 = vld [vmem:[%s3723_s8 + $0x18] sm:$0xff] }
  0xc4   : > { %2422 = vmatprep.subr.bf16.mxu0 %v2421_v28  ;;  %v2197_v28 = vld [vmem:[%s3716_s1 + $0x3a8] sm:$0xff] }
  0xc5   : > { %v2457_v31 = vpack.c.bf16 %v2199_v29, %v2197_v28 }
  0xc6   : > { %2143 = vmatmul.mubr.msk.f32.gmra.mrb[2].mxu0 %vm406_vm0, %v759_v38 }
  0xc7   : > { %2424 = vmatpush1.bf16.msra.mxu0 %v2423_v34  ;;  %969 = vmatprep.mubr.f32.mxu0 %v2685_v12  ;;  %v987_v34 = vld [vmem:[#allocation2 + $0xd] sm:$0xff] }
  0xc8   : > { %2426 = vmatprep.subr.bf16.mxu0 %v2425_v35  ;;  %v2201_v35 = vld [vmem:[%s3716_s1 + $0x3c8] sm:$0xff] }
  0xc9   : > { %v2461_v38 = vpack.c.bf16 %v2203_v36, %v2201_v35  ;;  %v1425_v36 = vld [vmem:[%s3723_s8 + $0x20] sm:$0xff] }
  0xcb   : > { %2428 = vmatpush1.bf16.msra.mxu0 %v2427_v41  ;;  %v2463_v41 = vpack.c.bf16 %v2202_v40, %v2200_v39  ;;  %v1443_v39 = vld [vmem:[%s3723_s8 + $0xb0] sm:$0xff]  ;;  %v1444_v40 = vld [vmem:[%s3723_s8 + $0xb8] sm:$0xff] }
  0xcc   : > { %2430 = vmatprep.subr.bf16.mxu0 %v2429_v42  ;;  %v2205_v42 = vld [vmem:[%s3716_s1 + $0x3e8] sm:$0x3] }
  0xcf   : > { %2432 = vmatpush1.bf16.msra.mxu0 %v2431_v45  ;;  %v1101_v45 = vld [vmem:[#allocation2 + $0xe] sm:$0xff] }
  0xd0   : > { %2162 = vmatprep.subr.msk.mxu0 %vm471_vm2, %v2161_v46  ;;  %v1299_v46 = vld [vmem:[%s3718_s3 + $0x1c8] sm:$0xff] }
  0xd1   : > { %v2521_v48 = vpack.c.bf16 %v1301_v47, %v1299_v46  ;;  %v1446_v46 = vld [vmem:[%s3723_s8 + $0xc8] sm:$0xff] }
  0xd3   : > { %2163 = vmatpush1.msk.msra.mxu0 %vm471_vm2, %v2160_v53  ;;  %2522 = vmatprep.subr.bf16.mxu1 %v2521_v48  ;;  %v1305_v53 = vld [vmem:[%s3718_s3 + $0x1f8] sm:$0xff]  ;;  %v1429_v48 = vld [vmem:[%s3723_s8 + $0x40] sm:$0xff] }
  0xd4   : > { %2164 = vmatmul.mubr.msk.f32.vlgmr.msra.gmra.mrb[0].mxu0 %vm406_vm0, %v872_v59  ;;  %2434 = vmatprep.subr.bf16.mxu0 %v2433_v54  ;;  %v2525_v54 = vpack.c.bf16 %v1305_v53, %v1303_v52  ;;  %v1438_v59 = vld [vmem:[%s3723_s8 + $0x88] sm:$0xff]  ;;  %v3487_v50 = vpack.c.bf16 %v1430_v49, %v1429_v48  ;;  %v1448_v52 = vld [vmem:[%s3723_s8 + $0xd8] sm:$0xff] }
  0xd5   : > { %2436 = vmatpush1.bf16.msra.mxu0 %v2435_v55  ;;  %975 = vmatprep.mubr.f32.mxu0 %v2685_v12  ;;  %v1302_v55 = vld [vmem:[%s3718_s3 + $0x1e0] sm:$0xff]  ;;  %v3396_v60 = vpack.c.bf16 %v1438_v59, %v1437_v58  ;;  %v1450_v58 = vld [vmem:[%s3723_s8 + $0xe8] sm:$0xff] }
  0xd6   : > { %2438 = vmatprep.subr.bf16.mxu0 %v2437_v56  ;;  %2524 = vmatpush1.bf16.msra.mxu1 %v2523_v51  ;;  %v1304_v56 = vld [vmem:[%s3718_s3 + $0x1f0] sm:$0xff] }
  0xd7   : > { %v2527_v57 = vpack.c.bf16 %v1304_v56, %v1302_v55  ;;  %2526 = vmatprep.subr.bf16.mxu1 %v2525_v54  ;;  %v1447_v51 = vld [vmem:[%s3723_s8 + $0xd0] sm:$0xff]  ;;  %v1432_v55 = vld [vmem:[%s3723_s8 + $0x58] sm:$0xff] }
  0xd8   : > { %2165 = vmatmul.mubr.msk.f32.gmra.mrb[2].mxu0 %vm406_vm0, %v873_v2  ;;  %v3497_v53 = vpack.c.bf16 %v1448_v52, %v1447_v51  ;;  %v1431_v54 = vld [vmem:[%s3723_s8 + $0x50] sm:$0xff] }
  0xd9   : > { %2440 = vmatpush1.bf16.msra.mxu0 %v2439_v62  ;;  %1083 = vmatprep.mubr.f32.mxu0 %v2685_v12  ;;  %v3399_v62 = vshrl.u32 %v1216_v61, 7  ;;  %v3505_v56 = vpack.c.bf16 %v1432_v55, %v1431_v54  ;;  %v1433_v61 = vld [vmem:[%s3723_s8 + $0x60] sm:$0xff] }
  0xda   : > { %2442 = vmatprep.subr.bf16.mxu0 %v2441_v63  ;;  %2528 = vmatpush1.bf16.msra.mxu1 %v2527_v57  ;;  %v1449_v57 = vld [vmem:[%s3723_s8 + $0xe0] sm:$0xff] }
  0xdb   : > { %2530 = vmatprep.subr.bf16.mxu1 %v3396_v60  ;;  %v1218_v63 = vsub.s32 0, %v3399_v62  ;;  %v1222_v1 = vsub.s32 1, %v3399_v62  ;;  %v3515_v59 = vpack.c.bf16 %v1450_v58, %v1449_v57 }
  0xdd   : > { %2444 = vmatpush1.bf16.msra.mxu0 %v2443_v5  ;;  %v1219_v2 = vrot.slane %v1214_v0, %v1218_v63  ;;  %v1223_v3 = vrot.slane %v1214_v0, %v1222_v1  ;;  %v1434_v0 = vld [vmem:[%s3723_s8 + $0x68] sm:$0xff] }
  0xde   : > { %2446 = vmatprep.subr.bf16.mxu0 %v2445_v6 }
  0xe1   : > { %2448 = vmatpush1.bf16.msra.mxu0 %v2447_v9  ;;  %v1422_v9 = vld [vmem:[%s3723_s8 + $0x8] sm:$0xff] }
  0xe2   : > { %2184 = vmatprep.subr.msk.mxu0 %vm471_vm2, %v2183_v10 }
  0xe5   : > { %2185 = vmatpush1.msk.msra.mxu0 %vm471_vm2, %v2182_v18  ;;  %v3422_v18 = vpack.c.bf16 %v1422_v9, %v1421_v8  ;;  %v1306_v9 = vld [vmem:[%s3719_s4] sm:$0x3] }
  0xe6   : > { %2186 = vmatmul.mubr.msk.f32.vlgmr.msra.gmra.mrb[0].mxu0 %vm406_vm0, %v986_v27  ;;  %2450 = vmatprep.subr.bf16.mxu0 %v2449_v21 }
  0xe7   : > { %2452 = vmatpush1.bf16.msra.mxu0 %v2451_v23  ;;  %1089 = vmatprep.mubr.f32.mxu0 %v2685_v12 }
  0xe8   : > { %2454 = vmatprep.subr.bf16.mxu0 %v2453_v24  ;;  %v3424_v24 = vpack.c.bf16 %v1440_v13, %v1439_v11  ;;  %v1315_v11 = vrot.slane %v1306_v9, %v1222_v1 }
  0xea   : > { %2187 = vmatmul.mubr.msk.f32.gmra.mrb[2].mxu0 %vm406_vm0, %v987_v34  ;;  %v1442_v34 = vld [vmem:[%s3723_s8 + $0xa8] sm:$0xff] }
  0xeb   : > { %2456 = vmatpush1.bf16.msra.mxu0 %v2455_v30  ;;  %1197 = vmatprep.mubr.f32.mxu0 %v2685_v12  ;;  %v3433_v30 = vpack.c.bf16 %v1424_v26, %v1423_v25  ;;  %v3443_v35 = vpack.c.bf16 %v1442_v34, %v1441_v33 }
  0xec   : > { %2458 = vmatprep.subr.bf16.mxu0 %v2457_v31 }
  0xef   : > { %2460 = vmatpush1.bf16.msra.mxu0 %v2459_v37  ;;  %v1426_v37 = vld [vmem:[%s3723_s8 + $0x28] sm:$0xff] }
  0xf0   : > { %2462 = vmatprep.subr.bf16.mxu0 %v2461_v38  ;;  %v3451_v38 = vpack.c.bf16 %v1426_v37, %v1425_v36 }
  0xf3   : > { %2464 = vmatpush1.bf16.msra.mxu0 %v2463_v41  ;;  %v3461_v41 = vpack.c.bf16 %v1444_v40, %v1443_v39 }
  0xf4   : > { %2206 = vmatprep.subr.msk.mxu0 %vm471_vm2, %v2205_v42  ;;  %v1427_v42 = vld [vmem:[%s3723_s8 + $0x30] sm:$0xff] }
  0xf7   : > { %2207 = vmatpush1.msk.msra.mxu0 %vm471_vm2, %v2204_v43  ;;  %v1428_v43 = vld [vmem:[%s3723_s8 + $0x38] sm:$0xff] }
  0xf8   : > { %2208 = vmatmul.mubr.msk.f32.vlgmr.msra.gmra.mrb[0].mxu0 %vm406_vm0, %v1100_v44  ;;  %v3469_v44 = vpack.c.bf16 %v1428_v43, %v1427_v42 }
  0xf9   : > { %1203 = vmatprep.mubr.f32.mxu0 %v2685_v12 }
  0xfc   : > { %2209 = vmatmul.mubr.msk.f32.gmra.mrb[2].mxu0 %vm406_vm0, %v1101_v45  ;;  %v1445_v45 = vld [vmem:[%s3723_s8 + $0xc0] sm:$0xff]  ;;  %vm1947_vm0 = vcmask 195584  }
  0xfd   : > { %v3479_v47 = vpack.c.bf16 %v1446_v46, %v1445_v45 }
 0x1cb   : > { %v1199_v4 = vpop.f32.mrb[0].mxu0 }
 0x1cc   : > { %v1226_v5 = vadd.f32 %v1219_v2, %v1199_v4  ;;  %v1201_v6 = vpop.f32.mrb[1].mxu0  ;;  %v1452_v4 = vld [vmem:[%s3723_s8 + $0xf8] sm:$0xff] }
 0x1cd   : > { %v1227_v7 = vadd.f32 %v1223_v3, %v1201_v6  ;;  %v1435_v6 = vld [vmem:[%s3723_s8 + $0x70] sm:$0xff] }
 0x1ce   : > { %v1234_v10 = vmul.f32 0.2, %v1226_v5  ;;  %vm1230_vm5 = vcmp.ge.f32.partialorder %v1226_v5, 0.0 }
 0x1cf   : > { %v1205_v14 = vpop.f32.mrb[2].mxu0  ;;  %vm1231_vm4 = vcmp.ge.f32.partialorder %v1227_v7, 0.0  ;;  %v1235_v15 = vmul.f32 0.2, %v1227_v7 }
 0x1d0   : > { %v1228_v16 = vadd.f32 %v1219_v2, %v1205_v14  ;;  %v1207_v17 = vpop.f32.mrb[3].mxu0  ;;  %v1238_v28 = vsel %vm1230_vm5, %v1226_v5, %v1234_v10  ;;  %v3523_v2 = vpack.c.bf16 %v1434_v0, %v1433_v61  ;;  %v1311_v10 = vrot.slane %v1306_v9, %v1218_v63 }
 0x1d1   : > { %v1229_v21 = vadd.f32 %v1223_v3, %v1207_v17  ;;  %v1239_v23 = vsel %vm1231_vm4, %v1227_v7, %v1235_v15  ;;  %v1451_v3 = vld [vmem:[%s3723_s8 + $0xf0] sm:$0xff]  ;;  %v1436_v7 = vld [vmem:[%s3723_s8 + $0x78] sm:$0xff] }
 0x1d2   : > { %v1236_v27 = vmul.f32 0.2, %v1228_v16  ;;  %1382 = vmatprep.mubr.f32.mxu1 %v1239_v23  ;;  %vm1232_vm7 = vcmp.ge.f32.partialorder %v1228_v16, 0.0  ;;  %v3533_v5 = vpack.c.bf16 %v1452_v4, %v1451_v3  ;;  %v3541_v8 = vpack.c.bf16 %v1436_v7, %v1435_v6 }
 0x1d3   : > { %v1237_v29 = vmul.f32 0.2, %v1229_v21  ;;  %1383 = vmatmul.mubr.f32.vlgmr.msra.gmra.mrb[0].mxu1 %v1238_v28  ;;  %vm1233_vm6 = vcmp.ge.f32.partialorder %v1229_v21, 0.0 }
 0x1d4   : > { %2532 = vmatpush3.bf16.msra.mxu1 %v3422_v18  ;;  %v1240_v32 = vsel %vm1232_vm7, %v1228_v16, %v1236_v27 }
 0x1d5   : > { %v1241_v31 = vsel %vm1233_vm6, %v1229_v21, %v1237_v29  ;;  %2534 = vmatprep.subr.bf16.mxu1 %v3424_v24 }
 0x1d6   : > { %1388 = vmatprep.mubr.f32.mxu1 %v1241_v31 }
 0x1d7   : > { %1389 = vmatmul.mubr.f32.gmra.mrb[2].mxu1 %v1240_v32 }
 0x1d8   : > { %2536 = vmatpush3.bf16.msra.mxu1 %v3433_v30 }
 0x1d9   : > { %2538 = vmatprep.subr.bf16.mxu1 %v3443_v35 }
 0x1dc   : > { %2540 = vmatpush3.bf16.msra.mxu1 %v3451_v38 }
 0x1dd   : > { %2542 = vmatprep.subr.bf16.mxu1 %v3461_v41 }
 0x1e0   : > { %2544 = vmatpush3.bf16.msra.mxu1 %v3469_v44 }
 0x1e1   : > { %2546 = vmatprep.subr.bf16.mxu1 %v3479_v47 }
 0x1e4   : > { %2548 = vmatpush3.bf16.msra.mxu1 %v3487_v50 }
 0x1e5   : > { %2550 = vmatprep.subr.bf16.mxu1 %v3497_v53 }
 0x1e8   : > { %2552 = vmatpush3.bf16.msra.mxu1 %v3505_v56 }
 0x1e9   : > { %2554 = vmatprep.subr.bf16.mxu1 %v3515_v59 }
 0x1ec   : > { %2556 = vmatpush3.bf16.msra.mxu1 %v3523_v2 }
 0x1ed   : > { %2558 = vmatprep.subr.bf16.mxu1 %v3533_v5 }
 0x1f0   : > { %2560 = vmatpush3.bf16.msra.mxu1 %v3541_v8 }
 0x1f1   : > { %2562 = vmatprep.subr.bf16.mxu1 %v3396_v60 }
 0x2a6   : > { %v1384_v13 = vpop.f32.mrb[0].mxu1 }
 0x2a7   : > { %v1385_v14 = vadd.f32 %v1384_v13, %v1311_v10  ;;  %v1386_v15 = vpop.f32.mrb[1].mxu1 }
 0x2a8   : > { %v1387_v16 = vadd.f32 %v1386_v15, %v1315_v11 }
 0x2a9   : > { %vm1395_vm8 = vcmp.ge.f32.partialorder %v1385_v14, 0.0  ;;  %v1399_v17 = vmul.f32 0.2, %v1385_v14 }
 0x2aa   : > { %v1400_v21 = vmul.f32 0.2, %v1387_v16  ;;  %v1390_v23 = vpop.f32.mrb[2].mxu1  ;;  %vm1396_vm9 = vcmp.ge.f32.partialorder %v1387_v16, 0.0 }
 0x2ab   : > { %v1391_v60 = vadd.f32 %v1390_v23, %v1311_v10  ;;  %v1392_v25 = vpop.f32.mrb[3].mxu1  ;;  %v3553_v26 = vsel %vm1395_vm8, %v1385_v14, %v1399_v17  ;;  %v1695_v17 = vld [vmem:[%s3721_s6 + $0x28] sm:$0xff]  ;;  %v1713_v23 = vld [vmem:[%s3721_s6 + $0xb8] sm:$0xff] }
 0x2ac   : > { %v1393_v27 = vadd.f32 %v1392_v25, %v1315_v11  ;;  %v1404_v63 = vsel %vm1396_vm9, %v1387_v16, %v1400_v21  ;;  %v1523_v1 = vmul.f32 %v3553_v26, %v3553_v26  ;;  %v1694_v16 = vld [vmem:[%s3721_s6 + $0x20] sm:$0xff]  ;;  %v1712_v21 = vld [vmem:[%s3721_s6 + $0xb0] sm:$0xff] }
 0x2ad   : > { %vm1397_vm10 = vcmp.ge.f32.partialorder %v1391_v60, 0.0  ;;  %v1401_v28 = vmul.f32 0.2, %v1391_v60  ;;  %v1524_v36 = vmul.f32 %v1404_v63, %v1404_v63  ;;  %v1867_v25 = vld [vmem:[%s3722_s7] sm:$0xff] }
 0x2ae   : > { %vm1398_vm11 = vcmp.ge.f32.partialorder %v1393_v27, 0.0  ;;  %v1402_v62 = vmul.f32 0.2, %v1393_v27 }
 0x2af   : > { %v1405_v29 = vsel %vm1397_vm10, %v1391_v60, %v1401_v28  ;;  %v2607_v60 = vpack.c.bf16 %v1695_v17, %v1694_v16  ;;  %v1697_v28 = vld [vmem:[%s3721_s6 + $0x38] sm:$0xff] }
 0x2b0   : > { %v1407_v31 = vadd.f32 %v1405_v29, %v3553_v26  ;;  %v1525_v32 = vmul.f32 %v1405_v29, %v1405_v29  ;;  %v2595_v33 = vpack.c.bf16 %v1405_v29, %v3553_v26  ;;  %v1406_v34 = vsel %vm1398_vm11, %v1393_v27, %v1402_v62  ;;  %v1696_v27 = vld [vmem:[%s3721_s6 + $0x30] sm:$0xff]  ;;  %v1714_v62 = vld [vmem:[%s3721_s6 + $0xc0] sm:$0xff] }
 0x2b1   : > { %v1414_v37 = vadd.f32 %v1406_v34, %v1404_v63  ;;  %v1526_v39 = vmul.f32 %v1406_v34, %v1406_v34  ;;  %v2593_v40 = vpack.c.bf16 %v1406_v34, %v1404_v63  ;;  %v2609_v26 = vpack.c.bf16 %v1713_v23, %v1712_v21  ;;  %v1868_v63 = vld [vmem:[%s3722_s7 + $0x8] sm:$0xff] }
 0x2b2   : > { %v1408_v42 = vrot.slane %v1407_v31, 4  ;;  %v1527_v43 = vadd.f32 %v1525_v32, %v1523_v1  ;;  %v1715_v1 = vld [vmem:[%s3721_s6 + $0xc8] sm:$0xff]  ;;  %v2633_v29 = vpack.c.bf16 %v1868_v63, %v1867_v25 }
 0x2b3   : > { %v1415_v45 = vrot.slane %v1414_v37, 4  ;;  %v1534_v46 = vadd.f32 %v1526_v39, %v1524_v36  ;;  %v2613_v32 = vpack.c.bf16 %v1715_v1, %v1714_v62  ;;  %v1699_v34 = vld [vmem:[%s3721_s6 + $0x48] sm:$0xff]  ;;  %v1716_v36 = vld [vmem:[%s3721_s6 + $0xd0] sm:$0xff] }
 0x2b4   : > { %v1409_v48 = vadd.f32 %v1408_v42, %v1407_v31  ;;  %v1528_v11 = vrot.slane %v1527_v43, 4  ;;  %v2611_v31 = vpack.c.bf16 %v1697_v28, %v1696_v27  ;;  %v1700_v42 = vld [vmem:[%s3721_s6 + $0x50] sm:$0xff] }
 0x2b5   : > { %v1416_v49 = vadd.f32 %v1415_v45, %v1414_v37  ;;  %v1535_v51 = vrot.slane %v1534_v46, 4  ;;  %v1717_v37 = vld [vmem:[%s3721_s6 + $0xd8] sm:$0xff]  ;;  %v1718_v45 = vld [vmem:[%s3721_s6 + $0xe0] sm:$0xff] }
 0x2b6   : > { %v1410_v52 = vrot.slane %v1409_v48, 2  ;;  %v1529_v13 = vadd.f32 %v1528_v11, %v1527_v43  ;;  %v1701_v43 = vld [vmem:[%s3721_s6 + $0x58] sm:$0xff] }
 0x2b7   : > { %v1417_v54 = vrot.slane %v1416_v49, 2  ;;  %v1536_v55 = vadd.f32 %v1535_v51, %v1534_v46  ;;  %v1719_v46 = vld [vmem:[%s3721_s6 + $0xe8] sm:$0xff]  ;;  %v1702_v51 = vld [vmem:[%s3721_s6 + $0x60] sm:$0xff] }
 0x2b8   : > { %v1411_v57 = vadd.f32 %v1410_v52, %v1409_v48  ;;  %v2619_v48 = vpack.c.bf16 %v1701_v43, %v1700_v42  ;;  %v1703_v52 = vld [vmem:[%s3721_s6 + $0x68] sm:$0xff] }
 0x2b9   : > { %v1418_v58 = vadd.f32 %v1417_v54, %v1416_v49  ;;  %v1537_v61 = vrot.slane %v1536_v55, 2  ;;  %v2621_v49 = vpack.c.bf16 %v1719_v46, %v1718_v45  ;;  %v2623_v54 = vpack.c.bf16 %v1703_v52, %v1702_v51 }
 0x2ba   : > { %v1412_v0 = vrot.slane %v1411_v57, 1 }
 0x2bb   : > { %v1419_v3 = vrot.slane %v1418_v58, 1  ;;  %v1538_v4 = vadd.f32 %v1537_v61, %v1536_v55  ;;  %v1869_v55 = vld [vmem:[%s3722_s7 + $0x10] sm:$0xff]  ;;  %v1721_v61 = vld [vmem:[%s3721_s6 + $0xf8] sm:$0xff] }
 0x2bc   : > { %v1413_v9 = vadd.f32 %v1412_v0, %v1411_v57  ;;  %v1870_v57 = vld [vmem:[%s3722_s7 + $0x18] sm:$0xff] }
 0x2bd   : > { %v1420_v6 = vadd.f32 %v1419_v3, %v1418_v58  ;;  %v1539_v7 = vrot.slane %v1538_v4, 1  ;;  %v1720_v58 = vld [vmem:[%s3721_s6 + $0xf0] sm:$0xff]  ;;  %v2636_v0 = vpack.c.bf16 %v1870_v57, %v1869_v55 }
 0x2be   : > { %v2625_v3 = vpack.c.bf16 %v1721_v61, %v1720_v58 }
 0x2bf   : > { %1517 = vmatprep.mubr.f32.mxu1 %v1420_v6  ;;  %v1540_v10 = vadd.f32 %v1539_v7, %v1538_v4  ;;  %v1704_v4 = vld [vmem:[%s3721_s6 + $0x70] sm:$0xff]  ;;  %v1705_v6 = vld [vmem:[%s3721_s6 + $0x78] sm:$0xff] }
 0x2c0   : > { %1518 = vmatmul.mubr.f32.vlgmr.msra.gmra.mrb[4].mxu1 %v1413_v9  ;;  %v2627_v7 = vpack.c.bf16 %v1705_v6, %v1704_v4  ;;  %v1871_v9 = vld [vmem:[%s3722_s7 + $0x20] sm:$0xff] }
 0x2c1   : > { %2564 = vmatpush3.bf16.msra.mxu1 %v3422_v18  ;;  %1605 = vmatprep.mubr.f32.mxu1 %v1540_v10  ;;  %v1530_v18 = vrot.slane %v1529_v13, 2  ;;  %v1872_v10 = vld [vmem:[%s3722_s7 + $0x28] sm:$0xff] }
 0x2c2   : > { %2566 = vmatprep.subr.bf16.mxu1 %v3424_v24  ;;  %v2639_v11 = vpack.c.bf16 %v1872_v10, %v1871_v9 }
 0x2c3   : > { %v1531_v24 = vadd.f32 %v1530_v18, %v1529_v13 }
 0x2c5   : > { %2568 = vmatpush3.bf16.msra.mxu1 %v3433_v30  ;;  %v1532_v30 = vrot.slane %v1531_v24, 1 }
 0x2c6   : > { %2570 = vmatprep.subr.bf16.mxu1 %v3443_v35 }
 0x2c7   : > { %v1533_v35 = vadd.f32 %v1532_v30, %v1531_v24 }
 0x2c9   : > { %2572 = vmatpush3.bf16.msra.mxu1 %v3451_v38  ;;  %v1614_v38 = vld [vmem:[%s3720_s5] sm:$0xff] }
 0x2ca   : > { %2574 = vmatprep.subr.bf16.mxu1 %v3461_v41  ;;  %v2687_v41 = vmov 0.0|0.0  }
 0x2cd   : > { %2576 = vmatpush3.bf16.msra.mxu1 %v3469_v44  ;;  %v1706_v44 = vld [vmem:[%s3721_s6 + $0x80] sm:$0xff] }
 0x2ce   : > { %2578 = vmatprep.subr.bf16.mxu1 %v3479_v47  ;;  %v1707_v47 = vld [vmem:[%s3721_s6 + $0x88] sm:$0xff] }
 0x2cf   : > { %v2597_v20 = vpack.c.bf16 %v1707_v47, %v1706_v44 }
 0x2d1   : > { %2580 = vmatpush3.bf16.msra.mxu1 %v3487_v50  ;;  %v1709_v50 = vld [vmem:[%s3721_s6 + $0x98] sm:$0xff]  ;;  %2598 = vmatprep.subr.bf16.mxu0 %v2597_v20 }
 0x2d2   : > { %2582 = vmatprep.subr.bf16.mxu1 %v3497_v53 }
 0x2d5   : > { %2584 = vmatpush3.bf16.msra.mxu1 %v3505_v56 }
 0x2d6   : > { %2586 = vmatprep.subr.bf16.mxu1 %v3515_v59  ;;  %v1692_v59 = vld [vmem:[%s3721_s6 + $0x10] sm:$0xff] }
 0x2d9   : > { %2588 = vmatpush3.bf16.msra.mxu1 %v3523_v2  ;;  %v1693_v2 = vld [vmem:[%s3721_s6 + $0x18] sm:$0xff] }
 0x2da   : > { %2590 = vmatprep.subr.bf16.mxu1 %v3533_v5  ;;  %v1710_v5 = vld [vmem:[%s3721_s6 + $0xa0] sm:$0xff]  ;;  %v2603_v14 = vpack.c.bf16 %v1693_v2, %v1692_v59 }
 0x2dd   : > { %2592 = vmatpush3.bf16.msra.mxu1 %v3541_v8  ;;  %v1711_v8 = vld [vmem:[%s3721_s6 + $0xa8] sm:$0xff] }
 0x2de   : > { %2594 = vmatprep.subr.bf16.mxu1 %v2593_v40  ;;  %v2605_v15 = vpack.c.bf16 %v1711_v8, %v1710_v5  ;;  %v2617_v40 = vpack.c.bf16 %v1717_v37, %v1716_v36 }
 0x2e0   : > { %1606 = vmatmul.mubr.f32.vlgmr.msra.gmra.mrb[6].mxu1 %v1533_v35 }
 0x2e1   : > { %2596 = vmatpush1.bf16.msra.mxu1 %v2595_v33  ;;  %1683 = vmatprep.mubr.f32.mxu1 %v2685_v12  ;;  %v1698_v33 = vld [vmem:[%s3721_s6 + $0x40] sm:$0xff] }
 0x2e2   : > { %2629 = vmatprep.subr.bf16.mxu1 %v2687_v41  ;;  %v2615_v39 = vpack.c.bf16 %v1699_v34, %v1698_v33 }
 0x2e4   : > { %2210 = vmatmul.mubr.msk.f32.vlgmr.msra.gmra.mrb[8].mxu1 %vm1615_vm12, %v1614_v38 }
 0x2e5   : > { %2631 = vmatpush3.bf16.msra.mxu1 %v2630_v22  ;;  %2335 = vmatprep.mubr.msk.f32.mxu1 %vm2688_vm13, %v2685_v12  ;;  %v1691_v22 = vld [vmem:[%s3721_s6 + $0x8] sm:$0xff] }
 0x2e6   : > { %2632 = vmatprep.subr.bf16.mxu1 %v2687_v41  ;;  %v2599_v53 = vpack.c.bf16 %v1691_v22, %v1690_v19 }
 0x2e8   : > { %2336 = vmatmul.mubr.msk.f32.vlgmr.msra.gmra.mrb[10].mxu1 %vm1615_vm12, %v1614_v38  ;;  %2600 = vmatpush3.bf16.msra.mxu0 %v2599_v53 }
 0x2e9   : > { %2350 = vmatprep.mubr.msk.f32.mxu1 %vm2688_vm13, %v2685_v12  ;;  %v1708_v12 = vld [vmem:[%s3721_s6 + $0x90] sm:$0xff]  ;;  %2634 = vmatpush3.bf16.msra.mxu1 %v2633_v29 }
 0x2ea   : > { %v2601_v56 = vpack.c.bf16 %v1709_v50, %v1708_v12  ;;  %2635 = vmatprep.subr.bf16.mxu1 %v2687_v41 }
 0x2ec   : > { %2602 = vmatprep.subr.bf16.mxu0 %v2601_v56 }
 0x2ed   : > { %2604 = vmatpush3.bf16.msra.mxu0 %v2603_v14  ;;  %2637 = vmatpush3.bf16.msra.mxu1 %v2636_v0 }
 0x2ee   : > { %2606 = vmatprep.subr.bf16.mxu0 %v2605_v15  ;;  %2638 = vmatprep.subr.bf16.mxu1 %v2687_v41 }
 0x2f1   : > { %2608 = vmatpush3.bf16.msra.mxu0 %v2607_v60  ;;  %2640 = vmatpush3.bf16.msra.mxu1 %v2639_v11 }
 0x2f2   : > { %2610 = vmatprep.subr.bf16.mxu0 %v2609_v26 }
 0x2f5   : > { %2612 = vmatpush3.bf16.msra.mxu0 %v2611_v31 }
 0x2f6   : > { %2614 = vmatprep.subr.bf16.mxu0 %v2613_v32 }
 0x2f9   : > { %2616 = vmatpush3.bf16.msra.mxu0 %v2615_v39 }
 0x2fa   : > { %2618 = vmatprep.subr.bf16.mxu0 %v2617_v40 }
 0x2fd   : > { %2620 = vmatpush3.bf16.msra.mxu0 %v2619_v48 }
 0x2fe   : > { %2622 = vmatprep.subr.bf16.mxu0 %v2621_v49 }
 0x301   : > { %2624 = vmatpush3.bf16.msra.mxu0 %v2623_v54 }
 0x302   : > { %2626 = vmatprep.subr.bf16.mxu0 %v2625_v3 }
 0x305   : > { %2628 = vmatpush3.bf16.msra.mxu0 %v2627_v7 }
 0x393   : > { %v2248_v13 = vpop.f32.mrb[4].mxu1 }
 0x394   : > { %v2249_v18 = vpop.f32.mrb[5].mxu1 }
 0x395   : > { %v2250_v24 = vadd.f32 %v2249_v18, %v2248_v13 }
 0x397   : > { %1612 = vst.msk [vmem:[%s405_s26] sm:$0x1] %vm1611_vm14, %v2250_v24 }
 0x3b3   : > { %v2283_v30 = vpop.f32.mrb[6].mxu1 }
 0x3b4   : > { %v2284_v35 = vpop.f32.mrb[7].mxu1 }
 0x3b5   : > { %v2285_v38 = vadd.f32 %v2284_v35, %v2283_v30 }
 0x3b7   : > { %1613 = vst.msk [vmem:[%s405_s26 + $0x1] sm:$0x1] %vm1611_vm14, %v2285_v38  ;;  %v1685_v41 = vpop.f32.mrb[8].mxu1 }
 0x3b8   : > { %v1687_v44 = vpop.f32.mrb[9].mxu1 }
 0x3b9   : > { %1786 = vmatprep.mubr.f32.mxu0 %v1687_v44 }
 0x3ba   : > { %1787 = vmatmul.mubr.f32.vlgmr.msra.gmra.mrb[4].mxu0 %v1685_v41 }
 0x3bb   : > { %v1863_v47 = vpop.f32.mrb[10].mxu1 }
 0x3bc   : > { %v2337_v19 = vpop.f32.mrb[11].mxu1  ;;  %2351 = vmatmul.mubr.msk.f32.vlgmr.msra.gmra.mrb[12].mxu1 %vm1873_vm15, %v1863_v47 }
 0x48d   : > { %v2318_v20 = vpop.f32.mrb[4].mxu0 }
 0x48e   : > { %v2319_v22 = vpop.f32.mrb[5].mxu0 }
 0x48f   : > { %v2320_v12 = vadd.f32 %v2319_v22, %v2318_v20  ;;  %v1943_v50 = vpop.f32.mrb[12].mxu1 }
 0x490   : > { %1948 = vst.msk [vmem:[%s401_s30] sm:$0xff] %vm1947_vm0, %v1943_v50  ;;  %v2352_v53 = vpop.f32.mrb[13].mxu1 }
 0x491   : > { %1792 = vst [vmem:[%s397_s14] sm:$0xff] %v2320_v12 }
 0x492 PF: > { %s22_s17 = sadd.s32 1, %s2683_s17  }
 0x493   : > { %p19_p4 = scmp.ge.s32.totalorder %s22_s17, 4  }
 0x495   :  { %21 = sbr.rel (!%p19_p4) target bundleno = 1 (0x1), region = 116 }

// kernel: resizer_forward.6
= control target key start
LH: loop header
LB: loop body
LE: loop exit
PB: predicated region body
PF: predicated region fallthrough
CT: control target
= control target key end

     0   :  { %s1298_s24 = smov 0   ;;  %s1629_s0 = inlined_call_operand.vmem [shape: f32[2,8,128], index: 0, kind: input, shape index: {}]   ;;  %s1630_s1 = inlined_call_operand.vmem [shape: f32[1,128], index: 1, kind: input, shape index: {}]   ;;  %s1631_s2 = inlined_call_operand.vmem [shape: f32[1,128], index: 2, kind: input, shape index: {}]   ;;  %s1632_s3 = inlined_call_operand.vmem [shape: f32[3,160,128], index: 3, kind: input, shape index: {}]   ;;  %s1633_s4 = inlined_call_operand.vmem [shape: f32[128,16], index: 4, kind: input, shape index: {}]   ;;  %s1634_s5 = inlined_call_operand.vmem [shape: f32[2,8,128], index: 5, kind: output, shape index: {0}]   ;;  %s1635_s6 = inlined_call_operand.vmem [shape: f32[2,8,128], index: 6, kind: output, shape index: {1}]   ;;  %s1636_s7 = inlined_call_operand.vmem [shape: f32[2,2,16], index: 7, kind: output, shape index: {2}]  }
   0x1 LB: > { %s933_s25 = sadd.s32 4294967295, %s1252_s24   ;;  %p937_p0 = scmp.ge.s32.totalorder %s1252_s24, 1  ;;  %s1252_s24 = sphi %s1298_s24, %s18_s24  }
   0x2   : > { %p241_p1 = scmp.lt.s32.totalorder %s1252_s24, 3 }
   0x4   : > { %p242_p2 = pnand %p937_p0, %p241_p1 }
   0x5   : > { %p279_p3 = scmp.lt.s32.totalorder (!%p242_p2), %s933_s25, 1  ;;  %v334_v0 = vld [vmem:[%s1632_s3] sm:$0xff] (!%p242_p2)  ;;  %v335_v1 = vld [vmem:[%s1632_s3 + $0x8] sm:$0xff] (!%p242_p2)  ;;  %vm314_vm0 = vcmask (!%p242_p2), 261120   ;;  %v1254_v3 = vmov (!%p242_p2), 0.0|0.0   ;;  %v336_v6 = vld [vmem:[%s1632_s3 + $0x10] sm:$0xff] (!%p242_p2) }
   0x6   : > { %245 = sbr.rel (%p242_p2) target bundleno = 660 (0x294), region = 40  ;;  %v944_v2 = vld [vmem:[%s1632_s3 + $0xa0] sm:$0xff] (!%p242_p2)  ;;  %1123 = vmatprep.subr.bf16.mxu0 (!%p242_p2), %v1254_v3  ;;  %v1124_v4 = vpack.c.bf16 (!%p242_p2), %v335_v1, %v334_v0  ;;  %1093 = vmatprep.subr.bf16.mxu1 (!%p242_p2), %v1254_v3  ;;  %v945_v5 = vld [vmem:[%s1632_s3 + $0xa8] sm:$0xff] (!%p242_p2)  ;;  %v337_v7 = vld [vmem:[%s1632_s3 + $0x18] sm:$0xff] (!%p242_p2)  ;;  %v1255_v8 = vmov (!%p242_p2), 0.0   ;;  %vm317_vm1 = vcmask (!%p242_p2), 254976  }
   0x7   : > { %313 = vst [vmem:[#allocation2] sm:$0xff] (!%p242_p2), %v1255_v8  ;;  %315 = vst.msk [vmem:[#allocation2 + $0x8] sm:$0xff] (!%p242_p2), %vm314_vm0, %v1255_v8  ;;  %v1094_v9 = vpack.c.bf16 (!%p242_p2), %v945_v5, %v944_v2  ;;  %v946_v10 = vld [vmem:[%s1632_s3 + $0xb0] sm:$0xff] (!%p242_p2)  ;;  %v947_v11 = vld [vmem:[%s1632_s3 + $0xb8] sm:$0xff] (!%p242_p2)  ;;  %v1127_v13 = vpack.c.bf16 (!%p242_p2), %v337_v7, %v336_v6  ;;  %s1256_s28 = smov (!%p242_p2), 16   ;;  %vm324_vm2 = vcmask (!%p242_p2), 1047681  }
   0x8   : > { %316 = vst [vmem:[#allocation2 + $0x10] sm:$0x3] (!%p242_p2), %v1255_v8  ;;  %318 = vst.msk [vmem:[#allocation2 + $0x18] sm:$0x3] (!%p242_p2), %vm317_vm1, %v1255_v8  ;;  %v942_v12 = vld [vmem:[%s1630_s1] ss:$0 sm:$0xff] (!%p242_p2)  ;;  %1125 = vmatpush1.bf16.msra.mxu0 (!%p242_p2), %v1124_v4  ;;  %v1097_v14 = vpack.c.bf16 (!%p242_p2), %v947_v11, %v946_v10 }
   0x9   : > { %1126 = vmatprep.subr.bf16.mxu0 (!%p242_p2), %v1254_v3  ;;  %1095 = vmatpush1.bf16.msra.mxu1 (!%p242_p2), %v1094_v9  ;;  %v338_v15 = vld [vmem:[%s1632_s3 + $0x20] sm:$0xff] (!%p242_p2)  ;;  %v339_v16 = vld [vmem:[%s1632_s3 + $0x28] sm:$0xff] (!%p242_p2)  ;;  %v340_v24 = vld [vmem:[%s1632_s3 + $0x30] sm:$0xff] (!%p242_p2)  ;;  %vm326_vm3 = vcmask (!%p242_p2), 130049   ;;  %vm328_vm4 = vcmask (!%p242_p2), 1040512   ;;  %vm330_vm5 = vcmask (!%p242_p2), 122880  }
   0xa   : > { %v943_v18 = vld [vmem:[%s1631_s2] ss:$0 sm:$0xff] (!%p242_p2)  ;;  %1096 = vmatprep.subr.bf16.mxu1 (!%p242_p2), %v1254_v3  ;;  %v949_v21 = vld [vmem:[%s1632_s3 + $0xc8] sm:$0xff] (!%p242_p2)  ;;  %v1130_v22 = vpack.c.bf16 (!%p242_p2), %v339_v16, %v338_v15  ;;  %v341_v25 = vld [vmem:[%s1632_s3 + $0x38] sm:$0xff] (!%p242_p2)  ;;  %vm383_vm6 = vcmask (!%p242_p2), 1046528   ;;  %vm565_vm7 = vcmask (!%p242_p2), 1045504  }
   0xb   : > { %v948_v20 = vld [vmem:[%s1632_s3 + $0xc0] sm:$0xff] (!%p242_p2)  ;;  %v950_v28 = vld [vmem:[%s1632_s3 + $0xd0] sm:$0xff] (!%p242_p2)  ;;  %v951_v29 = vld [vmem:[%s1632_s3 + $0xd8] sm:$0xff] (!%p242_p2)  ;;  %v1133_v30 = vpack.c.bf16 (!%p242_p2), %v341_v25, %v340_v24  ;;  %vm1257_vm8 = vmmov (!%p242_p2), 0  }
   0xc   : > { %1128 = vmatpush1.bf16.msra.mxu0 (!%p242_p2), %v1127_v13  ;;  %v1100_v26 = vpack.c.bf16 (!%p242_p2), %v949_v21, %v948_v20  ;;  %v342_v31 = vld [vmem:[%s1632_s3 + $0x40] sm:$0xff] (!%p242_p2)  ;;  %v343_v32 = vld [vmem:[%s1632_s3 + $0x48] sm:$0xff] (!%p242_p2)  ;;  %v1103_v33 = vpack.c.bf16 (!%p242_p2), %v951_v29, %v950_v28  ;;  %v344_v37 = vld [vmem:[%s1632_s3 + $0x50] sm:$0xff] (!%p242_p2) }
   0xd   : > { %s1638_s25 = smov (!%p279_p3, %s933_s25), 1  ;;  %1129 = vmatprep.subr.bf16.mxu0 %v1254_v3  ;;  %1098 = vmatpush1.bf16.msra.mxu1 %v1097_v14  ;;  %v952_v34 = vld [vmem:[%s1632_s3 + $0xe0] sm:$0xff]  ;;  %v953_v35 = vld [vmem:[%s1632_s3 + $0xe8] sm:$0xff]  ;;  %v1136_v36 = vpack.c.bf16 %v343_v32, %v342_v31  ;;  %v345_v38 = vld [vmem:[%s1632_s3 + $0x58] sm:$0xff] }
   0xe   : > { %s1340_s19 = sshll.u32 %s1638_s25, 3  ;;  %1099 = vmatprep.subr.bf16.mxu1 %v1254_v3  ;;  %v1106_v39 = vpack.c.bf16 %v953_v35, %v952_v34  ;;  %v954_v40 = vld [vmem:[%s1632_s3 + $0xf0] sm:$0xff]  ;;  %v955_v41 = vld [vmem:[%s1632_s3 + $0xf8] sm:$0xff]  ;;  %v1139_v42 = vpack.c.bf16 %v345_v38, %v344_v37  ;;  %v346_v43 = vld [vmem:[%s1632_s3 + $0x60] sm:$0xff] }
   0xf   : > { %s282_s26 = scalar_lea.vmem %s1629_s0, %s1340_s19  ;;  %s286_s16 = scalar_lea.vmem %s1634_s5, %s1340_s19  ;;  %v347_v44 = vld [vmem:[%s1632_s3 + $0x68] sm:$0xff]  ;;  %v1109_v45 = vpack.c.bf16 %v955_v41, %v954_v40  ;;  %v956_v46 = vld [vmem:[%s1632_s3 + $0x100] sm:$0xff]  ;;  %v348_v49 = vld [vmem:[%s1632_s3 + $0x70] sm:$0xff] }
  0x10   : > { %v295_v17 = vld [vmem:[%s282_s26] sm:$0xff]  ;;  %1131 = vmatpush1.bf16.msra.mxu0 %v1130_v22  ;;  %v957_v47 = vld [vmem:[%s1632_s3 + $0x108] sm:$0xff]  ;;  %v1142_v48 = vpack.c.bf16 %v347_v44, %v346_v43  ;;  %v349_v50 = vld [vmem:[%s1632_s3 + $0x78] sm:$0xff]  ;;  %s290_s8 = scalar_lea.vmem %s1635_s6, %s1340_s19  ;;  %s941_s19 = sshll.u32 %s1638_s25, 1 }
  0x11   : > { %v303_v19 = vmul.f32 %v942_v12, %v295_v17  ;;  %1132 = vmatprep.subr.bf16.mxu0 %v1254_v3  ;;  %1101 = vmatpush1.bf16.msra.mxu1 %v1100_v26  ;;  %v1112_v51 = vpack.c.bf16 %v957_v47, %v956_v46  ;;  %v958_v52 = vld [vmem:[%s1632_s3 + $0x110] sm:$0xff]  ;;  %v959_v53 = vld [vmem:[%s1632_s3 + $0x118] sm:$0xff]  ;;  %v1145_v54 = vpack.c.bf16 %v349_v50, %v348_v49  ;;  %v350_v55 = vld [vmem:[%s1632_s3 + $0x80] sm:$0xff]  ;;  %s294_s11 = scalar_lea.vmem %s1636_s7, %s941_s19 }
  0x12   : > { %1102 = vmatprep.subr.bf16.mxu1 %v1254_v3  ;;  %v351_v56 = vld [vmem:[%s1632_s3 + $0x88] sm:$0xff]  ;;  %v1115_v57 = vpack.c.bf16 %v959_v53, %v958_v52  ;;  %v960_v58 = vld [vmem:[%s1632_s3 + $0x120] sm:$0xff]  ;;  %v352_v61 = vld [vmem:[%s1632_s3 + $0x90] sm:$0xff] }
  0x13   : > { %v311_v23 = vadd.f32 %v943_v18, %v303_v19  ;;  %v961_v59 = vld [vmem:[%s1632_s3 + $0x128] sm:$0xff]  ;;  %v1148_v60 = vpack.c.bf16 %v351_v56, %v350_v55  ;;  %v353_v62 = vld [vmem:[%s1632_s3 + $0x98] sm:$0xff]  ;;  %v962_v0 = vld [vmem:[%s1632_s3 + $0x130] sm:$0xff] }
  0x14   : > { %1134 = vmatpush1.bf16.msra.mxu0 %v1133_v30  ;;  %v1118_v63 = vpack.c.bf16 %v961_v59, %v960_v58  ;;  %v963_v1 = vld [vmem:[%s1632_s3 + $0x138] sm:$0xff]  ;;  %v1151_v2 = vpack.c.bf16 %v353_v62, %v352_v61  ;;  %v966_v6 = vld [vmem:[%s1632_s3 + $0x140] sm:$0xff]  ;;  %v967_v7 = vld [vmem:[%s1632_s3 + $0x148] sm:$0xff] }
  0x15   : > { %312 = vst [vmem:[%s286_s16] sm:$0xff] %v311_v23  ;;  %v320_v27 = vrot.slane %v311_v23, 7  ;;  %1135 = vmatprep.subr.bf16.mxu0 %v1254_v3  ;;  %1104 = vmatpush1.bf16.msra.mxu1 %v1103_v33  ;;  %v1121_v4 = vpack.c.bf16 %v963_v1, %v962_v0  ;;  %v1154_v9 = vpack.c.bf16 %v967_v7, %v966_v6  ;;  %v968_v10 = vld [vmem:[%s1632_s3 + $0x150] sm:$0xff]  ;;  %v969_v11 = vld [vmem:[%s1632_s3 + $0x158] sm:$0xff]  ;;  %v970_v28 = vld [vmem:[%s1632_s3 + $0x160] sm:$0xff] }
  0x16   : > { %1105 = vmatprep.subr.bf16.mxu1 %v1254_v3  ;;  %v1157_v25 = vpack.c.bf16 %v969_v11, %v968_v10  ;;  %v971_v29 = vld [vmem:[%s1632_s3 + $0x168] sm:$0xff]  ;;  %v972_v33 = vld [vmem:[%s1632_s3 + $0x170] sm:$0xff]  ;;  %v973_v34 = vld [vmem:[%s1632_s3 + $0x178] sm:$0xff] }
  0x17   : > { %321 = vrot.lane.b32.xlu0 %v320_v27, %s1256_s28  ;;  %v1160_v32 = vpack.c.bf16 %v971_v29, %v970_v28  ;;  %v1163_v35 = vpack.c.bf16 %v973_v34, %v972_v33  ;;  %v975_v37 = vld [vmem:[%s1632_s3 + $0x188] sm:$0xff]  ;;  %v977_v40 = vld [vmem:[%s1632_s3 + $0x198] sm:$0xff]  ;;  %v653_v59 = vld [vmem:[%s1633_s4] sm:$0xff] }
  0x18   : > { %1137 = vmatpush1.bf16.msra.mxu0 %v1136_v36  ;;  %v974_v36 = vld [vmem:[%s1632_s3 + $0x180] sm:$0xff]  ;;  %v979_v43 = vld [vmem:[%s1632_s3 + $0x1a8] sm:$0xff]  ;;  %v981_v46 = vld [vmem:[%s1632_s3 + $0x1b8] sm:$0xff] }
  0x19   : > { %1138 = vmatprep.subr.bf16.mxu0 %v1254_v3  ;;  %1107 = vmatpush1.bf16.msra.mxu1 %v1106_v39  ;;  %v1166_v38 = vpack.c.bf16 %v975_v37, %v974_v36  ;;  %v976_v39 = vld [vmem:[%s1632_s3 + $0x190] sm:$0xff]  ;;  %v983_v49 = vld [vmem:[%s1632_s3 + $0x1c8] sm:$0xff]  ;;  %v985_v52 = vld [vmem:[%s1632_s3 + $0x1d8] sm:$0xff] }
  0x1a   : > { %1108 = vmatprep.subr.bf16.mxu1 %v1254_v3  ;;  %v1169_v41 = vpack.c.bf16 %v977_v40, %v976_v39  ;;  %v655_v61 = vld [vmem:[%s1633_s4 + $0x10] sm:$0xff]  ;;  %v657_v1 = vld [vmem:[%s1633_s4 + $0x20] sm:$0xff]  ;;  %v660_v6 = vld [vmem:[%s1633_s4 + $0x38] sm:$0xff] }
  0x1b   : > { %v662_v10 = vld [vmem:[%s1633_s4 + $0x48] sm:$0xff] }
  0x1c   : > { %1140 = vmatpush1.bf16.msra.mxu0 %v1139_v42  ;;  %v978_v42 = vld [vmem:[%s1632_s3 + $0x1a0] sm:$0xff] }
  0x1d   : > { %1141 = vmatprep.subr.bf16.mxu0 %v1254_v3  ;;  %1110 = vmatpush1.bf16.msra.mxu1 %v1109_v45  ;;  %v1172_v44 = vpack.c.bf16 %v979_v43, %v978_v42  ;;  %v980_v45 = vld [vmem:[%s1632_s3 + $0x1b0] sm:$0xff] }
  0x1e   : > { %1111 = vmatprep.subr.bf16.mxu1 %v1254_v3  ;;  %v1175_v47 = vpack.c.bf16 %v981_v46, %v980_v45 }
  0x20   : > { %1143 = vmatpush1.bf16.msra.mxu0 %v1142_v48  ;;  %v982_v48 = vld [vmem:[%s1632_s3 + $0x1c0] sm:$0xff] }
  0x21   : > { %1144 = vmatprep.subr.bf16.mxu0 %v1254_v3  ;;  %1113 = vmatpush1.bf16.msra.mxu1 %v1112_v51  ;;  %v1178_v50 = vpack.c.bf16 %v983_v49, %v982_v48  ;;  %v984_v51 = vld [vmem:[%s1632_s3 + $0x1d0] sm:$0xff] }
  0x22   : > { %1114 = vmatprep.subr.bf16.mxu1 %v1254_v3  ;;  %v1181_v55 = vpack.c.bf16 %v985_v52, %v984_v51 }
  0x24   : > { %1146 = vmatpush1.bf16.msra.mxu0 %v1145_v54 }
  0x25   : > { %1147 = vmatprep.subr.bf16.mxu0 %v1254_v3  ;;  %1116 = vmatpush1.bf16.msra.mxu1 %v1115_v57 }
  0x26   : > { %1117 = vmatprep.subr.bf16.mxu1 %v1254_v3 }
  0x28   : > { %1149 = vmatpush1.bf16.msra.mxu0 %v1148_v60  ;;  %v654_v60 = vld [vmem:[%s1633_s4 + $0x8] sm:$0xff] }
  0x29   : > { %1150 = vmatprep.subr.bf16.mxu0 %v1254_v3  ;;  %1119 = vmatpush1.bf16.msra.mxu1 %v1118_v63  ;;  %v1184_v62 = vpack.c.bf16 %v654_v60, %v653_v59  ;;  %v656_v63 = vld [vmem:[%s1633_s4 + $0x18] sm:$0xff] }
  0x2a   : > { %1120 = vmatprep.subr.bf16.mxu1 %v1254_v3  ;;  %v1187_v0 = vpack.c.bf16 %v656_v63, %v655_v61 }
  0x2c   : > { %1152 = vmatpush1.bf16.msra.mxu0 %v1151_v2  ;;  %v658_v2 = vld [vmem:[%s1633_s4 + $0x28] sm:$0xff] }
  0x2d   : > { %1153 = vmatprep.subr.bf16.mxu0 %v1254_v3  ;;  %1122 = vmatpush1.bf16.msra.mxu1 %v1121_v4  ;;  %v1190_v4 = vpack.c.bf16 %v658_v2, %v657_v1 }
  0x2e   : > { %1183 = vmatprep.subr.bf16.mxu1 %v1254_v3 }
  0x89   : > { %v322_v5 = vpop.permute.xlu0 %321 }
  0x8a   : > { %325 = vst.msk [vmem:[#allocation2] sm:$0xfe] %vm324_vm2, %v322_v5 }
  0x8b   : > { %327 = vst.msk [vmem:[#allocation2 + $0x8] sm:$0xfe] %vm326_vm3, %v322_v5 }
  0x8c   : > { %329 = vst.msk [vmem:[#allocation2 + $0x10] sm:$0x1] %vm328_vm4, %v322_v5 }
  0x8d   : > { %331 = vst.msk [vmem:[#allocation2 + $0x18] sm:$0x1] %vm330_vm5, %v322_v5  ;;  %v659_v5 = vld [vmem:[%s1633_s4 + $0x30] sm:$0xff] }
  0x8e   : > { %v1193_v7 = vpack.c.bf16 %v660_v6, %v659_v5 }
  0x91   : > { %v332_v13 = vld [vmem:[#allocation2] sm:$0xff] }
  0x92   : > { %v333_v12 = vld [vmem:[#allocation2 + $0x8] sm:$0xff]  ;;  %v354_v21 = vld [vmem:[#allocation2] sm:$0xfe] }
  0x93   : > { %v355_v14 = vld [vmem:[#allocation2 + $0x8] sm:$0xfe]  ;;  %965 = vmatprep.mubr.msk.f32.mxu0 %vm314_vm0, %v333_v12  ;;  %v356_v23 = vld [vmem:[#allocation2 + $0x10] sm:$0x1]  ;;  %v384_v24 = vrot.slane %v354_v21, 1 }
  0x94   : > { %v357_v15 = vld [vmem:[#allocation2 + $0x18] sm:$0x1]  ;;  %v387_v16 = vrot.slane %v355_v14, 1  ;;  %v537_v17 = vld [vmem:[#allocation2 + $0x8] sm:$0xfc]  ;;  %531 = vmatmul.mubr.f32.vlgmr.msra.gmra.mrb[0].mxu0 %v332_v13  ;;  %v385_v27 = vrot.slane %v356_v23, 1 }
  0x95   : > { %v388_v18 = vrot.slane %v357_v15, 1  ;;  %v539_v19 = vld [vmem:[#allocation2 + $0x18] sm:$0x3]  ;;  %v569_v20 = vrot.slane %v537_v17, 2  ;;  %1155 = vmatpush1.bf16.msra.mxu0 %v1154_v9  ;;  %v536_v53 = vld [vmem:[#allocation2] sm:$0xfc] }
  0x96   : > { %v570_v22 = vrot.slane %v539_v19, 2  ;;  %1156 = vmatprep.subr.bf16.mxu0 %v1254_v3  ;;  %v386_v31 = vsel %vm383_vm6, %v384_v24, %v385_v27  ;;  %v538_v54 = vld [vmem:[#allocation2 + $0x10] sm:$0x3]  ;;  %v566_v56 = vrot.slane %v536_v53, 2  ;;  %v661_v9 = vld [vmem:[%s1633_s4 + $0x40] sm:$0xff]  ;;  %v664_v13 = vld [vmem:[%s1633_s4 + $0x58] sm:$0xff] }
  0x97   : > { %v389_v26 = vsel %vm383_vm6, %v387_v16, %v388_v18  ;;  %v567_v57 = vrot.slane %v538_v54, 2  ;;  %v1196_v11 = vpack.c.bf16 %v662_v10, %v661_v9  ;;  %v663_v12 = vld [vmem:[%s1633_s4 + $0x50] sm:$0xff]  ;;  %v665_v15 = vld [vmem:[%s1633_s4 + $0x60] sm:$0xff]  ;;  %v666_v16 = vld [vmem:[%s1633_s4 + $0x68] sm:$0xff] }
  0x98   : > { %964 = vmatprep.mubr.msk.f32.mxu1 %vm314_vm0, %v389_v26  ;;  %v571_v30 = vsel %vm565_vm7, %v569_v20, %v570_v22  ;;  %v1199_v14 = vpack.c.bf16 %v664_v13, %v663_v12  ;;  %v667_v17 = vld [vmem:[%s1633_s4 + $0x70] sm:$0xff]  ;;  %v1202_v18 = vpack.c.bf16 %v666_v16, %v665_v15  ;;  %v668_v19 = vld [vmem:[%s1633_s4 + $0x78] sm:$0xff] }
  0x99   : > { %986 = vmatprep.mubr.msk.f32.mxu0 %vm314_vm0, %v571_v30  ;;  %458 = vmatmul.mubr.f32.vlgmr.msra.gmra.mrb[0].mxu1 %v386_v31  ;;  %v568_v58 = vsel %vm565_vm7, %v566_v56, %v567_v57  ;;  %v1205_v20 = vpack.c.bf16 %v668_v19, %v667_v17 }
  0x9a   : > { %1158 = vmatpush1.bf16.msra.mxu0 %v1157_v25  ;;  %1185 = vmatpush3.bf16.msra.mxu1 %v1184_v62 }
  0x9b   : > { %1159 = vmatprep.subr.bf16.mxu0 %v1254_v3  ;;  %1186 = vmatprep.subr.bf16.mxu1 %v1254_v3 }
  0x9c   : > { %1055 = vmatprep.mubr.msk.f32.mxu1 %vm1257_vm8, %v1255_v8 }
  0x9e   : > { %1161 = vmatpush1.bf16.msra.mxu0 %v1160_v32  ;;  %1188 = vmatpush3.bf16.msra.mxu1 %v1187_v0 }
  0x9f   : > { %1162 = vmatprep.subr.bf16.mxu0 %v1254_v3  ;;  %1189 = vmatprep.subr.bf16.mxu1 %v1254_v3 }
  0xa2   : > { %1164 = vmatpush1.bf16.msra.mxu0 %v1163_v35  ;;  %1191 = vmatpush3.bf16.msra.mxu1 %v1190_v4 }
  0xa3   : > { %1165 = vmatprep.subr.bf16.mxu0 %v1254_v3  ;;  %1192 = vmatprep.subr.bf16.mxu1 %v1254_v3 }
  0xa6   : > { %1167 = vmatpush1.bf16.msra.mxu0 %v1166_v38  ;;  %1194 = vmatpush3.bf16.msra.mxu1 %v1193_v7 }
  0xa7   : > { %1168 = vmatprep.subr.bf16.mxu0 %v1254_v3  ;;  %1195 = vmatprep.subr.bf16.mxu1 %v1254_v3 }
  0xaa   : > { %1170 = vmatpush1.bf16.msra.mxu0 %v1169_v41  ;;  %1197 = vmatpush3.bf16.msra.mxu1 %v1196_v11 }
  0xab   : > { %1171 = vmatprep.subr.bf16.mxu0 %v1254_v3  ;;  %1198 = vmatprep.subr.bf16.mxu1 %v1254_v3 }
  0xae   : > { %1173 = vmatpush1.bf16.msra.mxu0 %v1172_v44  ;;  %1200 = vmatpush3.bf16.msra.mxu1 %v1199_v14 }
  0xaf   : > { %1174 = vmatprep.subr.bf16.mxu0 %v1254_v3  ;;  %1201 = vmatprep.subr.bf16.mxu1 %v1254_v3 }
  0xb2   : > { %1176 = vmatpush1.bf16.msra.mxu0 %v1175_v47  ;;  %1203 = vmatpush3.bf16.msra.mxu1 %v1202_v18 }
  0xb3   : > { %1177 = vmatprep.subr.bf16.mxu0 %v1254_v3  ;;  %1204 = vmatprep.subr.bf16.mxu1 %v1254_v3 }
  0xb6   : > { %1179 = vmatpush1.bf16.msra.mxu0 %v1178_v50  ;;  %1206 = vmatpush3.bf16.msra.mxu1 %v1205_v20 }
  0xb7   : > { %1180 = vmatprep.subr.bf16.mxu0 %v1254_v3  ;;  %1207 = vmatprep.subr.bf16.mxu1 %v1254_v3 }
  0xba   : > { %1182 = vmatpush1.bf16.msra.mxu0 %v1181_v55 }
  0xbd   : > { %640 = vmatmul.mubr.f32.vlgmr.msra.gmra.mrb[0].mxu0 %v568_v58 }
 0x16c   : > { %v459_v21 = vpop.f32.mrb[0].mxu1 }
 0x16d   : > { %v461_v22 = vpop.f32.mrb[1].mxu1 }
 0x190   : > { %v641_v23 = vpop.f32.mrb[0].mxu0 }
 0x191   : > { %v1231_v24 = vadd.f32 %v641_v23, %v459_v21  ;;  %v643_v25 = vpop.f32.mrb[1].mxu0 }
 0x193   : > { %646 = vst [vmem:[%s290_s8] sm:$0xff] %v1231_v24  ;;  %v647_v26 = vrot.slane %v1231_v24, 4  ;;  %v739_v32 = vmul.f32 %v1231_v24, %v1231_v24 }
 0x195   : > { %v648_v27 = vadd.f32 %v1231_v24, %v647_v26  ;;  %v740_v33 = vrot.slane %v739_v32, 4 }
 0x197   : > { %v649_v28 = vrot.slane %v648_v27, 2  ;;  %v741_v34 = vadd.f32 %v740_v33, %v739_v32 }
 0x199   : > { %v650_v29 = vadd.f32 %v649_v28, %v648_v27  ;;  %v742_v35 = vrot.slane %v741_v34, 2 }
 0x19b   : > { %v651_v30 = vrot.slane %v650_v29, 1 }
 0x19d   : > { %v652_v31 = vadd.f32 %v651_v30, %v650_v29 }
 0x19f   : > { %1056 = vmatmul.mubr.f32.vlgmr.msra.gmra.mrb[2].mxu1 %v652_v31 }
 0x1a0   : > { %1209 = vmatpush3.bf16.msra.mxu1 %v1184_v62  ;;  %1090 = vmatprep.mubr.msk.f32.mxu1 %vm1257_vm8, %v1255_v8  ;;  %v743_v8 = vadd.f32 %v742_v35, %v741_v34 }
 0x1a1   : > { %1210 = vmatprep.subr.bf16.mxu1 %v1254_v3 }
 0x1a2   : > { %v744_v36 = vrot.slane %v743_v8, 1 }
 0x1a4   : > { %1212 = vmatpush3.bf16.msra.mxu1 %v1187_v0  ;;  %v745_v37 = vadd.f32 %v744_v36, %v743_v8 }
 0x1a5   : > { %1213 = vmatprep.subr.bf16.mxu1 %v1254_v3 }
 0x1a8   : > { %1215 = vmatpush3.bf16.msra.mxu1 %v1190_v4 }
 0x1a9   : > { %1216 = vmatprep.subr.bf16.mxu1 %v1254_v3 }
 0x1ac   : > { %1218 = vmatpush3.bf16.msra.mxu1 %v1193_v7 }
 0x1ad   : > { %1219 = vmatprep.subr.bf16.mxu1 %v1254_v3 }
 0x1b0   : > { %1221 = vmatpush3.bf16.msra.mxu1 %v1196_v11 }
 0x1b1   : > { %1222 = vmatprep.subr.bf16.mxu1 %v1254_v3 }
 0x1b4   : > { %1224 = vmatpush3.bf16.msra.mxu1 %v1199_v14 }
 0x1b5   : > { %1225 = vmatprep.subr.bf16.mxu1 %v1254_v3 }
 0x1b8   : > { %1227 = vmatpush3.bf16.msra.mxu1 %v1202_v18 }
 0x1b9   : > { %1228 = vmatprep.subr.bf16.mxu1 %v1254_v3 }
 0x1bc   : > { %1230 = vmatpush3.bf16.msra.mxu1 %v1205_v20 }
 0x1bf   : > { %1091 = vmatmul.mubr.f32.vlgmr.msra.gmra.mrb[4].mxu1 %v745_v37 }
 0x272   : > { %v735_v38 = vpop.f32.mrb[2].mxu1 }
 0x273   : > { %816 = vst.msk [vmem:[%s294_s11] sm:$0x1] %vm330_vm5, %v735_v38  ;;  %v1057_v39 = vpop.f32.mrb[3].mxu1 }
 0x292   : > { %v812_v40 = vpop.f32.mrb[4].mxu1 }
 0x293   : > { %817 = vst.msk [vmem:[%s294_s11 + $0x1] sm:$0x1] %vm330_vm5, %v812_v40  ;;  %v1092_v41 = vpop.f32.mrb[5].mxu1 }
 0x294 PF: > { %s18_s24 = sadd.s32 1, %s1252_s24  }
 0x295   : > { %p15_p4 = scmp.ge.s32.totalorder %s18_s24, 4  }
 0x297   :  { %17 = sbr.rel (!%p15_p4) target bundleno = 1 (0x1), region = 96 }

// kernel: resizer_forward.7
= control target key start
LH: loop header
LB: loop body
LE: loop exit
PB: predicated region body
PF: predicated region fallthrough
CT: control target
= control target key end

     0   :  { %s1226_s21 = smov 0   ;;  %s1553_s0 = inlined_call_operand.vmem [shape: f32[2,8,128], index: 0, kind: input, shape index: {}]   ;;  %s1554_s1 = inlined_call_operand.vmem [shape: f32[1,128], index: 1, kind: input, shape index: {}]   ;;  %s1555_s2 = inlined_call_operand.vmem [shape: f32[1,128], index: 2, kind: input, shape index: {}]   ;;  %s1556_s3 = inlined_call_operand.vmem [shape: f32[3,160,128], index: 3, kind: input, shape index: {}]   ;;  %s1557_s4 = inlined_call_operand.vmem [shape: f32[128,16], index: 4, kind: input, shape index: {}]   ;;  %s1558_s5 = inlined_call_operand.vmem [shape: f32[2,8,128], index: 5, kind: output, shape index: {0}]   ;;  %s1559_s6 = inlined_call_operand.vmem [shape: f32[2,2,16], index: 6, kind: output, shape index: {1}]  }
   0x1 LB: > { %s867_s22 = sadd.s32 4294967295, %s1185_s21   ;;  %p871_p0 = scmp.ge.s32.totalorder %s1185_s21, 1  ;;  %s1185_s21 = sphi %s1226_s21, %s17_s21  }
   0x2   : > { %p214_p1 = scmp.lt.s32.totalorder %s1185_s21, 3 }
   0x4   : > { %p215_p2 = pnand %p871_p0, %p214_p1 }
   0x5   : > { %p246_p3 = scmp.lt.s32.totalorder (!%p215_p2), %s867_s22, 1  ;;  %v299_v0 = vld [vmem:[%s1556_s3] sm:$0xff] (!%p215_p2)  ;;  %v300_v1 = vld [vmem:[%s1556_s3 + $0x8] sm:$0xff] (!%p215_p2)  ;;  %vm279_vm0 = vcmask (!%p215_p2), 261120   ;;  %v1187_v3 = vmov (!%p215_p2), 0.0|0.0   ;;  %v301_v6 = vld [vmem:[%s1556_s3 + $0x10] sm:$0xff] (!%p215_p2) }
   0x6   : > { %218 = sbr.rel (%p215_p2) target bundleno = 663 (0x297), region = 40  ;;  %v877_v2 = vld [vmem:[%s1556_s3 + $0xa0] sm:$0xff] (!%p215_p2)  ;;  %1056 = vmatprep.subr.bf16.mxu0 (!%p215_p2), %v1187_v3  ;;  %v1057_v4 = vpack.c.bf16 (!%p215_p2), %v300_v1, %v299_v0  ;;  %1026 = vmatprep.subr.bf16.mxu1 (!%p215_p2), %v1187_v3  ;;  %v878_v5 = vld [vmem:[%s1556_s3 + $0xa8] sm:$0xff] (!%p215_p2)  ;;  %v302_v7 = vld [vmem:[%s1556_s3 + $0x18] sm:$0xff] (!%p215_p2)  ;;  %v1188_v8 = vmov (!%p215_p2), 0.0   ;;  %vm282_vm1 = vcmask (!%p215_p2), 254976  }
   0x7   : > { %278 = vst [vmem:[#allocation2] sm:$0xff] (!%p215_p2), %v1188_v8  ;;  %280 = vst.msk [vmem:[#allocation2 + $0x8] sm:$0xff] (!%p215_p2), %vm279_vm0, %v1188_v8  ;;  %v1027_v9 = vpack.c.bf16 (!%p215_p2), %v878_v5, %v877_v2  ;;  %v879_v10 = vld [vmem:[%s1556_s3 + $0xb0] sm:$0xff] (!%p215_p2)  ;;  %v880_v11 = vld [vmem:[%s1556_s3 + $0xb8] sm:$0xff] (!%p215_p2)  ;;  %v1060_v13 = vpack.c.bf16 (!%p215_p2), %v302_v7, %v301_v6  ;;  %s1189_s28 = smov (!%p215_p2), 16   ;;  %vm289_vm3 = vcmask (!%p215_p2), 1047681  }
   0x8   : > { %281 = vst [vmem:[#allocation2 + $0x10] sm:$0x3] (!%p215_p2), %v1188_v8  ;;  %283 = vst.msk [vmem:[#allocation2 + $0x18] sm:$0x3] (!%p215_p2), %vm282_vm1, %v1188_v8  ;;  %v875_v12 = vld [vmem:[%s1554_s1] ss:$0 sm:$0xff] (!%p215_p2)  ;;  %1058 = vmatpush1.bf16.msra.mxu0 (!%p215_p2), %v1057_v4  ;;  %v1030_v15 = vpack.c.bf16 (!%p215_p2), %v880_v11, %v879_v10 }
   0x9   : > { %v876_v14 = vld [vmem:[%s1555_s2] ss:$0 sm:$0xff] (!%p215_p2)  ;;  %1059 = vmatprep.subr.bf16.mxu0 (!%p215_p2), %v1187_v3  ;;  %1028 = vmatpush1.bf16.msra.mxu1 (!%p215_p2), %v1027_v9  ;;  %v304_v17 = vld [vmem:[%s1556_s3 + $0x28] sm:$0xff] (!%p215_p2)  ;;  %v305_v25 = vld [vmem:[%s1556_s3 + $0x30] sm:$0xff] (!%p215_p2)  ;;  %vm291_vm4 = vcmask (!%p215_p2), 130049   ;;  %vm293_vm5 = vcmask (!%p215_p2), 1040512  }
   0xa   : > { %v303_v16 = vld [vmem:[%s1556_s3 + $0x20] sm:$0xff] (!%p215_p2)  ;;  %1029 = vmatprep.subr.bf16.mxu1 (!%p215_p2), %v1187_v3  ;;  %v882_v20 = vld [vmem:[%s1556_s3 + $0xc8] sm:$0xff] (!%p215_p2)  ;;  %v306_v26 = vld [vmem:[%s1556_s3 + $0x38] sm:$0xff] (!%p215_p2)  ;;  %vm295_vm6 = vcmask (!%p215_p2), 122880   ;;  %vm348_vm7 = vcmask (!%p215_p2), 1046528   ;;  %vm530_vm8 = vcmask (!%p215_p2), 1045504  }
   0xb   : > { %v881_v19 = vld [vmem:[%s1556_s3 + $0xc0] sm:$0xff] (!%p215_p2)  ;;  %v1063_v22 = vpack.c.bf16 (!%p215_p2), %v304_v17, %v303_v16  ;;  %v883_v27 = vld [vmem:[%s1556_s3 + $0xd0] sm:$0xff] (!%p215_p2)  ;;  %v884_v28 = vld [vmem:[%s1556_s3 + $0xd8] sm:$0xff] (!%p215_p2)  ;;  %v1066_v30 = vpack.c.bf16 (!%p215_p2), %v306_v26, %v305_v25  ;;  %vm1190_vm9 = vmmov (!%p215_p2), 0  }
   0xc   : > { %1061 = vmatpush1.bf16.msra.mxu0 (!%p215_p2), %v1060_v13  ;;  %v1033_v24 = vpack.c.bf16 (!%p215_p2), %v882_v20, %v881_v19  ;;  %v1036_v32 = vpack.c.bf16 (!%p215_p2), %v884_v28, %v883_v27  ;;  %v307_v33 = vld [vmem:[%s1556_s3 + $0x40] sm:$0xff] (!%p215_p2)  ;;  %v308_v34 = vld [vmem:[%s1556_s3 + $0x48] sm:$0xff] (!%p215_p2)  ;;  %v309_v40 = vld [vmem:[%s1556_s3 + $0x50] sm:$0xff] (!%p215_p2) }
   0xd   : > { %s1561_s22 = smov (!%p246_p3, %s867_s22), 1  ;;  %1062 = vmatprep.subr.bf16.mxu0 %v1187_v3  ;;  %1031 = vmatpush1.bf16.msra.mxu1 %v1030_v15  ;;  %v885_v36 = vld [vmem:[%s1556_s3 + $0xe0] sm:$0xff]  ;;  %v886_v37 = vld [vmem:[%s1556_s3 + $0xe8] sm:$0xff]  ;;  %v1069_v38 = vpack.c.bf16 %v308_v34, %v307_v33  ;;  %v310_v41 = vld [vmem:[%s1556_s3 + $0x58] sm:$0xff] }
   0xe   : > { %s872_s15 = sshll.u32 %s1561_s22, 3  ;;  %1032 = vmatprep.subr.bf16.mxu1 %v1187_v3  ;;  %v1039_v39 = vpack.c.bf16 %v886_v37, %v885_v36  ;;  %v887_v42 = vld [vmem:[%s1556_s3 + $0xf0] sm:$0xff]  ;;  %v888_v43 = vld [vmem:[%s1556_s3 + $0xf8] sm:$0xff]  ;;  %v1072_v44 = vpack.c.bf16 %v310_v41, %v309_v40  ;;  %v311_v46 = vld [vmem:[%s1556_s3 + $0x60] sm:$0xff] }
   0xf   : > { %s249_s20 = scalar_lea.vmem %s1553_s0, %s872_s15  ;;  %v1042_v45 = vpack.c.bf16 %v888_v43, %v887_v42  ;;  %v312_v47 = vld [vmem:[%s1556_s3 + $0x68] sm:$0xff]  ;;  %v889_v48 = vld [vmem:[%s1556_s3 + $0x100] sm:$0xff]  ;;  %v313_v52 = vld [vmem:[%s1556_s3 + $0x70] sm:$0xff]  ;;  %s253_s14 = scalar_lea.vmem %s1558_s5, %s872_s15 }
  0x10   : > { %v258_v18 = vld [vmem:[%s249_s20] sm:$0xff]  ;;  %1064 = vmatpush1.bf16.msra.mxu0 %v1063_v22  ;;  %v890_v49 = vld [vmem:[%s1556_s3 + $0x108] sm:$0xff]  ;;  %v1075_v50 = vpack.c.bf16 %v312_v47, %v311_v46  ;;  %v314_v53 = vld [vmem:[%s1556_s3 + $0x78] sm:$0xff]  ;;  %s874_s15 = sshll.u32 %s1561_s22, 1 }
  0x11   : > { %v266_v21 = vmul.f32 %v875_v12, %v258_v18  ;;  %1065 = vmatprep.subr.bf16.mxu0 %v1187_v3  ;;  %1034 = vmatpush1.bf16.msra.mxu1 %v1033_v24  ;;  %v1045_v51 = vpack.c.bf16 %v890_v49, %v889_v48  ;;  %v891_v54 = vld [vmem:[%s1556_s3 + $0x110] sm:$0xff]  ;;  %v892_v55 = vld [vmem:[%s1556_s3 + $0x118] sm:$0xff]  ;;  %v1078_v56 = vpack.c.bf16 %v314_v53, %v313_v52  ;;  %v315_v58 = vld [vmem:[%s1556_s3 + $0x80] sm:$0xff]  ;;  %s257_s18 = scalar_lea.vmem %s1559_s6, %s874_s15 }
  0x12   : > { %1035 = vmatprep.subr.bf16.mxu1 %v1187_v3  ;;  %v1048_v57 = vpack.c.bf16 %v892_v55, %v891_v54  ;;  %v316_v59 = vld [vmem:[%s1556_s3 + $0x88] sm:$0xff]  ;;  %v893_v60 = vld [vmem:[%s1556_s3 + $0x120] sm:$0xff]  ;;  %v317_v0 = vld [vmem:[%s1556_s3 + $0x90] sm:$0xff] }
  0x13   : > { %v274_v23 = vadd.f32 %v876_v14, %v266_v21  ;;  %v894_v61 = vld [vmem:[%s1556_s3 + $0x128] sm:$0xff]  ;;  %v1081_v62 = vpack.c.bf16 %v316_v59, %v315_v58  ;;  %v318_v1 = vld [vmem:[%s1556_s3 + $0x98] sm:$0xff]  ;;  %v895_v2 = vld [vmem:[%s1556_s3 + $0x130] sm:$0xff] }
  0x14   : > { %1067 = vmatpush1.bf16.msra.mxu0 %v1066_v30  ;;  %v1051_v63 = vpack.c.bf16 %v894_v61, %v893_v60  ;;  %v896_v4 = vld [vmem:[%s1556_s3 + $0x138] sm:$0xff]  ;;  %v1084_v5 = vpack.c.bf16 %v318_v1, %v317_v0  ;;  %v899_v9 = vld [vmem:[%s1556_s3 + $0x140] sm:$0xff]  ;;  %v900_v10 = vld [vmem:[%s1556_s3 + $0x148] sm:$0xff] }
  0x15   : > { %vm275_vm2 = vcmp.ge.f32.partialorder %v274_v23, 0.0  ;;  %v276_v29 = vmul.f32 0.2, %v274_v23  ;;  %1068 = vmatprep.subr.bf16.mxu0 %v1187_v3  ;;  %1037 = vmatpush1.bf16.msra.mxu1 %v1036_v32  ;;  %v1054_v6 = vpack.c.bf16 %v896_v4, %v895_v2  ;;  %v1087_v11 = vpack.c.bf16 %v900_v10, %v899_v9  ;;  %v901_v12 = vld [vmem:[%s1556_s3 + $0x150] sm:$0xff]  ;;  %v902_v13 = vld [vmem:[%s1556_s3 + $0x158] sm:$0xff]  ;;  %v903_v30 = vld [vmem:[%s1556_s3 + $0x160] sm:$0xff] }
  0x16   : > { %1038 = vmatprep.subr.bf16.mxu1 %v1187_v3  ;;  %v1090_v27 = vpack.c.bf16 %v902_v13, %v901_v12  ;;  %v906_v36 = vld [vmem:[%s1556_s3 + $0x178] sm:$0xff]  ;;  %v909_v41 = vld [vmem:[%s1556_s3 + $0x190] sm:$0xff]  ;;  %v618_v61 = vld [vmem:[%s1557_s4] sm:$0xff] }
  0x17   : > { %v277_v31 = vsel %vm275_vm2, %v274_v23, %v276_v29  ;;  %v910_v42 = vld [vmem:[%s1556_s3 + $0x198] sm:$0xff]  ;;  %v913_v47 = vld [vmem:[%s1556_s3 + $0x1b0] sm:$0xff]  ;;  %v622_v4 = vld [vmem:[%s1557_s4 + $0x20] sm:$0xff] }
  0x18   : > { %v285_v35 = vrot.slane %v277_v31, 7  ;;  %1070 = vmatpush1.bf16.msra.mxu0 %v1069_v38  ;;  %v904_v31 = vld [vmem:[%s1556_s3 + $0x168] sm:$0xff]  ;;  %v907_v38 = vld [vmem:[%s1556_s3 + $0x180] sm:$0xff]  ;;  %v1102_v43 = vpack.c.bf16 %v910_v42, %v909_v41  ;;  %v914_v48 = vld [vmem:[%s1556_s3 + $0x1b8] sm:$0xff] }
  0x19   : > { %1071 = vmatprep.subr.bf16.mxu0 %v1187_v3  ;;  %1040 = vmatpush1.bf16.msra.mxu1 %v1039_v39  ;;  %v1093_v34 = vpack.c.bf16 %v904_v31, %v903_v30  ;;  %v908_v39 = vld [vmem:[%s1556_s3 + $0x188] sm:$0xff]  ;;  %v1108_v49 = vpack.c.bf16 %v914_v48, %v913_v47  ;;  %v917_v53 = vld [vmem:[%s1556_s3 + $0x1d0] sm:$0xff]  ;;  %v918_v54 = vld [vmem:[%s1556_s3 + $0x1d8] sm:$0xff] }
  0x1a   : > { %286 = vrot.lane.b32.xlu0 %v285_v35, %s1189_s28  ;;  %1041 = vmatprep.subr.bf16.mxu1 %v1187_v3  ;;  %v905_v35 = vld [vmem:[%s1556_s3 + $0x170] sm:$0xff]  ;;  %v1099_v40 = vpack.c.bf16 %v908_v39, %v907_v38  ;;  %v621_v1 = vld [vmem:[%s1557_s4 + $0x18] sm:$0xff]  ;;  %v627_v12 = vld [vmem:[%s1557_s4 + $0x48] sm:$0xff] }
  0x1b   : > { %v1096_v37 = vpack.c.bf16 %v906_v36, %v905_v35  ;;  %v625_v9 = vld [vmem:[%s1557_s4 + $0x38] sm:$0xff] }
  0x1c   : > { %1073 = vmatpush1.bf16.msra.mxu0 %v1072_v44  ;;  %v911_v44 = vld [vmem:[%s1556_s3 + $0x1a0] sm:$0xff] }
  0x1d   : > { %1074 = vmatprep.subr.bf16.mxu0 %v1187_v3  ;;  %1043 = vmatpush1.bf16.msra.mxu1 %v1042_v45  ;;  %v912_v45 = vld [vmem:[%s1556_s3 + $0x1a8] sm:$0xff] }
  0x1e   : > { %1044 = vmatprep.subr.bf16.mxu1 %v1187_v3  ;;  %v1105_v46 = vpack.c.bf16 %v912_v45, %v911_v44 }
  0x20   : > { %1076 = vmatpush1.bf16.msra.mxu0 %v1075_v50  ;;  %v915_v50 = vld [vmem:[%s1556_s3 + $0x1c0] sm:$0xff] }
  0x21   : > { %1077 = vmatprep.subr.bf16.mxu0 %v1187_v3  ;;  %1046 = vmatpush1.bf16.msra.mxu1 %v1045_v51  ;;  %v916_v51 = vld [vmem:[%s1556_s3 + $0x1c8] sm:$0xff] }
  0x22   : > { %1047 = vmatprep.subr.bf16.mxu1 %v1187_v3  ;;  %v1111_v52 = vpack.c.bf16 %v916_v51, %v915_v50 }
  0x24   : > { %1079 = vmatpush1.bf16.msra.mxu0 %v1078_v56 }
  0x25   : > { %1080 = vmatprep.subr.bf16.mxu0 %v1187_v3  ;;  %1049 = vmatpush1.bf16.msra.mxu1 %v1048_v57  ;;  %v1114_v57 = vpack.c.bf16 %v918_v54, %v917_v53 }
  0x26   : > { %1050 = vmatprep.subr.bf16.mxu1 %v1187_v3 }
  0x28   : > { %1082 = vmatpush1.bf16.msra.mxu0 %v1081_v62  ;;  %v619_v62 = vld [vmem:[%s1557_s4 + $0x8] sm:$0xff] }
  0x29   : > { %1083 = vmatprep.subr.bf16.mxu0 %v1187_v3  ;;  %1052 = vmatpush1.bf16.msra.mxu1 %v1051_v63  ;;  %v620_v63 = vld [vmem:[%s1557_s4 + $0x10] sm:$0xff]  ;;  %v1117_v0 = vpack.c.bf16 %v619_v62, %v618_v61 }
  0x2a   : > { %1053 = vmatprep.subr.bf16.mxu1 %v1187_v3  ;;  %v1120_v2 = vpack.c.bf16 %v621_v1, %v620_v63 }
  0x2c   : > { %1085 = vmatpush1.bf16.msra.mxu0 %v1084_v5  ;;  %v623_v5 = vld [vmem:[%s1557_s4 + $0x28] sm:$0xff] }
  0x2d   : > { %1086 = vmatprep.subr.bf16.mxu0 %v1187_v3  ;;  %1055 = vmatpush1.bf16.msra.mxu1 %v1054_v6  ;;  %v1123_v6 = vpack.c.bf16 %v623_v5, %v622_v4 }
  0x2e   : > { %1116 = vmatprep.subr.bf16.mxu1 %v1187_v3 }
  0x8c   : > { %v287_v7 = vpop.permute.xlu0 %286 }
  0x8d   : > { %290 = vst.msk [vmem:[#allocation2] sm:$0xfe] %vm289_vm3, %v287_v7 }
  0x8e   : > { %292 = vst.msk [vmem:[#allocation2 + $0x8] sm:$0xfe] %vm291_vm4, %v287_v7 }
  0x8f   : > { %294 = vst.msk [vmem:[#allocation2 + $0x10] sm:$0x1] %vm293_vm5, %v287_v7 }
  0x90   : > { %296 = vst.msk [vmem:[#allocation2 + $0x18] sm:$0x1] %vm295_vm6, %v287_v7  ;;  %v624_v7 = vld [vmem:[%s1557_s4 + $0x30] sm:$0xff] }
  0x91   : > { %v1126_v10 = vpack.c.bf16 %v625_v9, %v624_v7 }
  0x94   : > { %v297_v15 = vld [vmem:[#allocation2] sm:$0xff] }
  0x95   : > { %v298_v14 = vld [vmem:[#allocation2 + $0x8] sm:$0xff]  ;;  %v319_v23 = vld [vmem:[#allocation2] sm:$0xfe] }
  0x96   : > { %v320_v16 = vld [vmem:[#allocation2 + $0x8] sm:$0xfe]  ;;  %898 = vmatprep.mubr.msk.f32.mxu0 %vm279_vm0, %v298_v14  ;;  %v321_v25 = vld [vmem:[#allocation2 + $0x10] sm:$0x1]  ;;  %v349_v26 = vrot.slane %v319_v23, 1 }
  0x97   : > { %v322_v17 = vld [vmem:[#allocation2 + $0x18] sm:$0x1]  ;;  %v352_v18 = vrot.slane %v320_v16, 1  ;;  %v502_v19 = vld [vmem:[#allocation2 + $0x8] sm:$0xfc]  ;;  %496 = vmatmul.mubr.f32.vlgmr.msra.gmra.mrb[0].mxu0 %v297_v15  ;;  %v350_v29 = vrot.slane %v321_v25, 1 }
  0x98   : > { %v353_v20 = vrot.slane %v322_v17, 1  ;;  %v504_v21 = vld [vmem:[#allocation2 + $0x18] sm:$0x3]  ;;  %v534_v22 = vrot.slane %v502_v19, 2  ;;  %1088 = vmatpush1.bf16.msra.mxu0 %v1087_v11  ;;  %v501_v55 = vld [vmem:[#allocation2] sm:$0xfc] }
  0x99   : > { %v535_v24 = vrot.slane %v504_v21, 2  ;;  %1089 = vmatprep.subr.bf16.mxu0 %v1187_v3  ;;  %v351_v33 = vsel %vm348_vm7, %v349_v26, %v350_v29  ;;  %v503_v56 = vld [vmem:[#allocation2 + $0x10] sm:$0x3]  ;;  %v531_v58 = vrot.slane %v501_v55, 2  ;;  %v626_v11 = vld [vmem:[%s1557_s4 + $0x40] sm:$0xff]  ;;  %v629_v15 = vld [vmem:[%s1557_s4 + $0x58] sm:$0xff] }
  0x9a   : > { %v354_v28 = vsel %vm348_vm7, %v352_v18, %v353_v20  ;;  %v532_v59 = vrot.slane %v503_v56, 2  ;;  %v1129_v13 = vpack.c.bf16 %v627_v12, %v626_v11  ;;  %v628_v14 = vld [vmem:[%s1557_s4 + $0x50] sm:$0xff]  ;;  %v630_v17 = vld [vmem:[%s1557_s4 + $0x60] sm:$0xff]  ;;  %v631_v18 = vld [vmem:[%s1557_s4 + $0x68] sm:$0xff] }
  0x9b   : > { %897 = vmatprep.mubr.msk.f32.mxu1 %vm279_vm0, %v354_v28  ;;  %v536_v32 = vsel %vm530_vm8, %v534_v22, %v535_v24  ;;  %v1132_v16 = vpack.c.bf16 %v629_v15, %v628_v14  ;;  %v632_v19 = vld [vmem:[%s1557_s4 + $0x70] sm:$0xff]  ;;  %v1135_v20 = vpack.c.bf16 %v631_v18, %v630_v17  ;;  %v633_v21 = vld [vmem:[%s1557_s4 + $0x78] sm:$0xff] }
  0x9c   : > { %919 = vmatprep.mubr.msk.f32.mxu0 %vm279_vm0, %v536_v32  ;;  %423 = vmatmul.mubr.f32.vlgmr.msra.gmra.mrb[0].mxu1 %v351_v33  ;;  %v533_v60 = vsel %vm530_vm8, %v531_v58, %v532_v59  ;;  %v1138_v22 = vpack.c.bf16 %v633_v21, %v632_v19 }
  0x9d   : > { %1091 = vmatpush1.bf16.msra.mxu0 %v1090_v27  ;;  %1118 = vmatpush3.bf16.msra.mxu1 %v1117_v0 }
  0x9e   : > { %1092 = vmatprep.subr.bf16.mxu0 %v1187_v3  ;;  %1119 = vmatprep.subr.bf16.mxu1 %v1187_v3 }
  0x9f   : > { %988 = vmatprep.mubr.msk.f32.mxu1 %vm1190_vm9, %v1188_v8 }
  0xa1   : > { %1094 = vmatpush1.bf16.msra.mxu0 %v1093_v34  ;;  %1121 = vmatpush3.bf16.msra.mxu1 %v1120_v2 }
  0xa2   : > { %1095 = vmatprep.subr.bf16.mxu0 %v1187_v3  ;;  %1122 = vmatprep.subr.bf16.mxu1 %v1187_v3 }
  0xa5   : > { %1097 = vmatpush1.bf16.msra.mxu0 %v1096_v37  ;;  %1124 = vmatpush3.bf16.msra.mxu1 %v1123_v6 }
  0xa6   : > { %1098 = vmatprep.subr.bf16.mxu0 %v1187_v3  ;;  %1125 = vmatprep.subr.bf16.mxu1 %v1187_v3 }
  0xa9   : > { %1100 = vmatpush1.bf16.msra.mxu0 %v1099_v40  ;;  %1127 = vmatpush3.bf16.msra.mxu1 %v1126_v10 }
  0xaa   : > { %1101 = vmatprep.subr.bf16.mxu0 %v1187_v3  ;;  %1128 = vmatprep.subr.bf16.mxu1 %v1187_v3 }
  0xad   : > { %1103 = vmatpush1.bf16.msra.mxu0 %v1102_v43  ;;  %1130 = vmatpush3.bf16.msra.mxu1 %v1129_v13 }
  0xae   : > { %1104 = vmatprep.subr.bf16.mxu0 %v1187_v3  ;;  %1131 = vmatprep.subr.bf16.mxu1 %v1187_v3 }
  0xb1   : > { %1106 = vmatpush1.bf16.msra.mxu0 %v1105_v46  ;;  %1133 = vmatpush3.bf16.msra.mxu1 %v1132_v16 }
  0xb2   : > { %1107 = vmatprep.subr.bf16.mxu0 %v1187_v3  ;;  %1134 = vmatprep.subr.bf16.mxu1 %v1187_v3 }
  0xb5   : > { %1109 = vmatpush1.bf16.msra.mxu0 %v1108_v49  ;;  %1136 = vmatpush3.bf16.msra.mxu1 %v1135_v20 }
  0xb6   : > { %1110 = vmatprep.subr.bf16.mxu0 %v1187_v3  ;;  %1137 = vmatprep.subr.bf16.mxu1 %v1187_v3 }
  0xb9   : > { %1112 = vmatpush1.bf16.msra.mxu0 %v1111_v52  ;;  %1139 = vmatpush3.bf16.msra.mxu1 %v1138_v22 }
  0xba   : > { %1113 = vmatprep.subr.bf16.mxu0 %v1187_v3  ;;  %1140 = vmatprep.subr.bf16.mxu1 %v1187_v3 }
  0xbd   : > { %1115 = vmatpush1.bf16.msra.mxu0 %v1114_v57 }
  0xc0   : > { %605 = vmatmul.mubr.f32.vlgmr.msra.gmra.mrb[0].mxu0 %v533_v60 }
 0x16f   : > { %v424_v23 = vpop.f32.mrb[0].mxu1 }
 0x170   : > { %v426_v24 = vpop.f32.mrb[1].mxu1 }
 0x193   : > { %v606_v25 = vpop.f32.mrb[0].mxu0 }
 0x194   : > { %v1164_v26 = vadd.f32 %v606_v25, %v424_v23  ;;  %v608_v27 = vpop.f32.mrb[1].mxu0 }
 0x196   : > { %611 = vst [vmem:[%s253_s14] sm:$0xff] %v1164_v26  ;;  %v612_v28 = vrot.slane %v1164_v26, 4  ;;  %v704_v34 = vmul.f32 %v1164_v26, %v1164_v26 }
 0x198   : > { %v613_v29 = vadd.f32 %v1164_v26, %v612_v28  ;;  %v705_v35 = vrot.slane %v704_v34, 4 }
 0x19a   : > { %v614_v30 = vrot.slane %v613_v29, 2  ;;  %v706_v36 = vadd.f32 %v705_v35, %v704_v34 }
 0x19c   : > { %v615_v31 = vadd.f32 %v614_v30, %v613_v29  ;;  %v707_v37 = vrot.slane %v706_v36, 2 }
 0x19e   : > { %v616_v32 = vrot.slane %v615_v31, 1 }
 0x1a0   : > { %v617_v33 = vadd.f32 %v616_v32, %v615_v31 }
 0x1a2   : > { %989 = vmatmul.mubr.f32.vlgmr.msra.gmra.mrb[2].mxu1 %v617_v33 }
 0x1a3   : > { %1142 = vmatpush3.bf16.msra.mxu1 %v1117_v0  ;;  %1023 = vmatprep.mubr.msk.f32.mxu1 %vm1190_vm9, %v1188_v8  ;;  %v708_v8 = vadd.f32 %v707_v37, %v706_v36 }
 0x1a4   : > { %1143 = vmatprep.subr.bf16.mxu1 %v1187_v3 }
 0x1a5   : > { %v709_v38 = vrot.slane %v708_v8, 1 }
 0x1a7   : > { %1145 = vmatpush3.bf16.msra.mxu1 %v1120_v2  ;;  %v710_v39 = vadd.f32 %v709_v38, %v708_v8 }
 0x1a8   : > { %1146 = vmatprep.subr.bf16.mxu1 %v1187_v3 }
 0x1ab   : > { %1148 = vmatpush3.bf16.msra.mxu1 %v1123_v6 }
 0x1ac   : > { %1149 = vmatprep.subr.bf16.mxu1 %v1187_v3 }
 0x1af   : > { %1151 = vmatpush3.bf16.msra.mxu1 %v1126_v10 }
 0x1b0   : > { %1152 = vmatprep.subr.bf16.mxu1 %v1187_v3 }
 0x1b3   : > { %1154 = vmatpush3.bf16.msra.mxu1 %v1129_v13 }
 0x1b4   : > { %1155 = vmatprep.subr.bf16.mxu1 %v1187_v3 }
 0x1b7   : > { %1157 = vmatpush3.bf16.msra.mxu1 %v1132_v16 }
 0x1b8   : > { %1158 = vmatprep.subr.bf16.mxu1 %v1187_v3 }
 0x1bb   : > { %1160 = vmatpush3.bf16.msra.mxu1 %v1135_v20 }
 0x1bc   : > { %1161 = vmatprep.subr.bf16.mxu1 %v1187_v3 }
 0x1bf   : > { %1163 = vmatpush3.bf16.msra.mxu1 %v1138_v22 }
 0x1c2   : > { %1024 = vmatmul.mubr.f32.vlgmr.msra.gmra.mrb[4].mxu1 %v710_v39 }
 0x275   : > { %v700_v40 = vpop.f32.mrb[2].mxu1 }
 0x276   : > { %781 = vst.msk [vmem:[%s257_s18] sm:$0x1] %vm295_vm6, %v700_v40  ;;  %v990_v41 = vpop.f32.mrb[3].mxu1 }
 0x295   : > { %v777_v42 = vpop.f32.mrb[4].mxu1 }
 0x296   : > { %782 = vst.msk [vmem:[%s257_s18 + $0x1] sm:$0x1] %vm295_vm6, %v777_v42  ;;  %v1025_v43 = vpop.f32.mrb[5].mxu1 }
 0x297 PF: > { %s17_s21 = sadd.s32 1, %s1185_s21  }
 0x298   : > { %p14_p4 = scmp.ge.s32.totalorder %s17_s21, 4  }
 0x29a   :  { %16 = sbr.rel (!%p14_p4) target bundleno = 1 (0x1), region = 84 }

// kernel: resizer_forward.8
= control target key start
LH: loop header
LB: loop body
LE: loop exit
PB: predicated region body
PF: predicated region fallthrough
CT: control target
= control target key end

     0   :  { %s1287_s24 = smov 0   ;;  %s1618_s0 = inlined_call_operand.vmem [shape: f32[2,8,128], index: 0, kind: input, shape index: {}]   ;;  %s1619_s1 = inlined_call_operand.vmem [shape: f32[1,128], index: 1, kind: input, shape index: {}]   ;;  %s1620_s2 = inlined_call_operand.vmem [shape: f32[1,128], index: 2, kind: input, shape index: {}]   ;;  %s1621_s3 = inlined_call_operand.vmem [shape: f32[3,160,128], index: 3, kind: input, shape index: {}]   ;;  %s1622_s4 = inlined_call_operand.vmem [shape: f32[128,16], index: 4, kind: input, shape index: {}]   ;;  %s1623_s5 = inlined_call_operand.vmem [shape: f32[2,8,128], index: 5, kind: input, shape index: {}]   ;;  %s1624_s6 = inlined_call_operand.vmem [shape: f32[2,8,128], index: 6, kind: output, shape index: {0}]   ;;  %s1625_s7 = inlined_call_operand.vmem [shape: f32[2,2,16], index: 7, kind: output, shape index: {1}]  }
   0x1 LB: > { %s922_s25 = sadd.s32 4294967295, %s1241_s24   ;;  %p926_p0 = scmp.ge.s32.totalorder %s1241_s24, 1  ;;  %s1241_s24 = sphi %s1287_s24, %s18_s24  }
   0x2   : > { %p248_p1 = scmp.lt.s32.totalorder %s1241_s24, 3 }
   0x4   : > { %p249_p2 = pnand %p926_p0, %p248_p1 }
   0x5   : > { %p286_p3 = scmp.lt.s32.totalorder (!%p249_p2), %s922_s25, 1  ;;  %v342_v0 = vld [vmem:[%s1621_s3] sm:$0xff] (!%p249_p2)  ;;  %v343_v1 = vld [vmem:[%s1621_s3 + $0x8] sm:$0xff] (!%p249_p2)  ;;  %vm322_vm0 = vcmask (!%p249_p2), 261120   ;;  %v1243_v3 = vmov (!%p249_p2), 0.0|0.0   ;;  %v344_v6 = vld [vmem:[%s1621_s3 + $0x10] sm:$0xff] (!%p249_p2) }
   0x6   : > { %252 = sbr.rel (%p249_p2) target bundleno = 662 (0x296), region = 44  ;;  %v933_v2 = vld [vmem:[%s1621_s3 + $0xa0] sm:$0xff] (!%p249_p2)  ;;  %1112 = vmatprep.subr.bf16.mxu0 (!%p249_p2), %v1243_v3  ;;  %v1113_v4 = vpack.c.bf16 (!%p249_p2), %v343_v1, %v342_v0  ;;  %1082 = vmatprep.subr.bf16.mxu1 (!%p249_p2), %v1243_v3  ;;  %v934_v5 = vld [vmem:[%s1621_s3 + $0xa8] sm:$0xff] (!%p249_p2)  ;;  %v345_v7 = vld [vmem:[%s1621_s3 + $0x18] sm:$0xff] (!%p249_p2)  ;;  %v1244_v8 = vmov (!%p249_p2), 0.0   ;;  %vm325_vm1 = vcmask (!%p249_p2), 254976  }
   0x7   : > { %321 = vst [vmem:[#allocation2] sm:$0xff] (!%p249_p2), %v1244_v8  ;;  %323 = vst.msk [vmem:[#allocation2 + $0x8] sm:$0xff] (!%p249_p2), %vm322_vm0, %v1244_v8  ;;  %v1083_v9 = vpack.c.bf16 (!%p249_p2), %v934_v5, %v933_v2  ;;  %v935_v10 = vld [vmem:[%s1621_s3 + $0xb0] sm:$0xff] (!%p249_p2)  ;;  %v936_v11 = vld [vmem:[%s1621_s3 + $0xb8] sm:$0xff] (!%p249_p2)  ;;  %v1116_v13 = vpack.c.bf16 (!%p249_p2), %v345_v7, %v344_v6  ;;  %s1245_s13 = smov (!%p249_p2), 16   ;;  %vm332_vm2 = vcmask (!%p249_p2), 1047681  }
   0x8   : > { %324 = vst [vmem:[#allocation2 + $0x10] sm:$0x3] (!%p249_p2), %v1244_v8  ;;  %326 = vst.msk [vmem:[#allocation2 + $0x18] sm:$0x3] (!%p249_p2), %vm325_vm1, %v1244_v8  ;;  %v931_v12 = vld [vmem:[%s1619_s1] ss:$0 sm:$0xff] (!%p249_p2)  ;;  %1114 = vmatpush1.bf16.msra.mxu0 (!%p249_p2), %v1113_v4  ;;  %v1086_v15 = vpack.c.bf16 (!%p249_p2), %v936_v11, %v935_v10 }
   0x9   : > { %v932_v14 = vld [vmem:[%s1620_s2] ss:$0 sm:$0xff] (!%p249_p2)  ;;  %1115 = vmatprep.subr.bf16.mxu0 (!%p249_p2), %v1243_v3  ;;  %1084 = vmatpush1.bf16.msra.mxu1 (!%p249_p2), %v1083_v9  ;;  %v347_v17 = vld [vmem:[%s1621_s3 + $0x28] sm:$0xff] (!%p249_p2)  ;;  %v348_v26 = vld [vmem:[%s1621_s3 + $0x30] sm:$0xff] (!%p249_p2)  ;;  %vm334_vm3 = vcmask (!%p249_p2), 130049   ;;  %vm336_vm4 = vcmask (!%p249_p2), 1040512  }
   0xa   : > { %v346_v16 = vld [vmem:[%s1621_s3 + $0x20] sm:$0xff] (!%p249_p2)  ;;  %1085 = vmatprep.subr.bf16.mxu1 (!%p249_p2), %v1243_v3  ;;  %v938_v20 = vld [vmem:[%s1621_s3 + $0xc8] sm:$0xff] (!%p249_p2)  ;;  %v349_v27 = vld [vmem:[%s1621_s3 + $0x38] sm:$0xff] (!%p249_p2)  ;;  %vm338_vm5 = vcmask (!%p249_p2), 122880   ;;  %vm391_vm6 = vcmask (!%p249_p2), 1046528   ;;  %vm573_vm7 = vcmask (!%p249_p2), 1045504  }
   0xb   : > { %v937_v19 = vld [vmem:[%s1621_s3 + $0xc0] sm:$0xff] (!%p249_p2)  ;;  %v1119_v23 = vpack.c.bf16 (!%p249_p2), %v347_v17, %v346_v16  ;;  %v939_v28 = vld [vmem:[%s1621_s3 + $0xd0] sm:$0xff] (!%p249_p2)  ;;  %v940_v29 = vld [vmem:[%s1621_s3 + $0xd8] sm:$0xff] (!%p249_p2)  ;;  %v1122_v31 = vpack.c.bf16 (!%p249_p2), %v349_v27, %v348_v26  ;;  %vm1246_vm8 = vmmov (!%p249_p2), 0  }
   0xc   : > { %1117 = vmatpush1.bf16.msra.mxu0 (!%p249_p2), %v1116_v13  ;;  %v1089_v25 = vpack.c.bf16 (!%p249_p2), %v938_v20, %v937_v19  ;;  %v1092_v33 = vpack.c.bf16 (!%p249_p2), %v940_v29, %v939_v28  ;;  %v350_v34 = vld [vmem:[%s1621_s3 + $0x40] sm:$0xff] (!%p249_p2)  ;;  %v351_v35 = vld [vmem:[%s1621_s3 + $0x48] sm:$0xff] (!%p249_p2)  ;;  %v352_v40 = vld [vmem:[%s1621_s3 + $0x50] sm:$0xff] (!%p249_p2) }
   0xd   : > { %s1627_s25 = smov (!%p286_p3, %s922_s25), 1  ;;  %1118 = vmatprep.subr.bf16.mxu0 %v1243_v3  ;;  %1087 = vmatpush1.bf16.msra.mxu1 %v1086_v15  ;;  %v941_v36 = vld [vmem:[%s1621_s3 + $0xe0] sm:$0xff]  ;;  %v942_v37 = vld [vmem:[%s1621_s3 + $0xe8] sm:$0xff]  ;;  %v1125_v38 = vpack.c.bf16 %v351_v35, %v350_v34  ;;  %v353_v41 = vld [vmem:[%s1621_s3 + $0x58] sm:$0xff] }
   0xe   : > { %s1329_s19 = sshll.u32 %s1627_s25, 3  ;;  %1088 = vmatprep.subr.bf16.mxu1 %v1243_v3  ;;  %v1095_v39 = vpack.c.bf16 %v942_v37, %v941_v36  ;;  %v943_v42 = vld [vmem:[%s1621_s3 + $0xf0] sm:$0xff]  ;;  %v944_v43 = vld [vmem:[%s1621_s3 + $0xf8] sm:$0xff]  ;;  %v1128_v44 = vpack.c.bf16 %v353_v41, %v352_v40  ;;  %v354_v46 = vld [vmem:[%s1621_s3 + $0x60] sm:$0xff] }
   0xf   : > { %s289_s26 = scalar_lea.vmem %s1618_s0, %s1329_s19  ;;  %s293_s29 = scalar_lea.vmem %s1623_s5, %s1329_s19  ;;  %v1098_v45 = vpack.c.bf16 %v944_v43, %v943_v42  ;;  %v355_v47 = vld [vmem:[%s1621_s3 + $0x68] sm:$0xff]  ;;  %v945_v48 = vld [vmem:[%s1621_s3 + $0x100] sm:$0xff]  ;;  %v356_v52 = vld [vmem:[%s1621_s3 + $0x70] sm:$0xff] }
  0x10   : > { %v302_v18 = vld [vmem:[%s289_s26] sm:$0xff]  ;;  %1120 = vmatpush1.bf16.msra.mxu0 %v1119_v23  ;;  %v946_v49 = vld [vmem:[%s1621_s3 + $0x108] sm:$0xff]  ;;  %v1131_v50 = vpack.c.bf16 %v355_v47, %v354_v46  ;;  %v357_v53 = vld [vmem:[%s1621_s3 + $0x78] sm:$0xff]  ;;  %s297_s8 = scalar_lea.vmem %s1624_s6, %s1329_s19  ;;  %s930_s19 = sshll.u32 %s1627_s25, 1 }
  0x11   : > { %v310_v21 = vmul.f32 %v931_v12, %v302_v18  ;;  %v319_v22 = vld [vmem:[%s293_s29] sm:$0xff]  ;;  %1121 = vmatprep.subr.bf16.mxu0 %v1243_v3  ;;  %1090 = vmatpush1.bf16.msra.mxu1 %v1089_v25  ;;  %v1101_v51 = vpack.c.bf16 %v946_v49, %v945_v48  ;;  %v947_v54 = vld [vmem:[%s1621_s3 + $0x110] sm:$0xff]  ;;  %v948_v55 = vld [vmem:[%s1621_s3 + $0x118] sm:$0xff]  ;;  %v1134_v56 = vpack.c.bf16 %v357_v53, %v356_v52  ;;  %s301_s11 = scalar_lea.vmem %s1625_s7, %s930_s19 }
  0x12   : > { %1091 = vmatprep.subr.bf16.mxu1 %v1243_v3  ;;  %v1104_v57 = vpack.c.bf16 %v948_v55, %v947_v54  ;;  %v358_v58 = vld [vmem:[%s1621_s3 + $0x80] sm:$0xff]  ;;  %v359_v59 = vld [vmem:[%s1621_s3 + $0x88] sm:$0xff]  ;;  %v360_v0 = vld [vmem:[%s1621_s3 + $0x90] sm:$0xff] }
  0x13   : > { %v318_v24 = vadd.f32 %v932_v14, %v310_v21  ;;  %v949_v60 = vld [vmem:[%s1621_s3 + $0x120] sm:$0xff]  ;;  %v950_v61 = vld [vmem:[%s1621_s3 + $0x128] sm:$0xff]  ;;  %v1137_v62 = vpack.c.bf16 %v359_v59, %v358_v58  ;;  %v361_v1 = vld [vmem:[%s1621_s3 + $0x98] sm:$0xff] }
  0x14   : > { %1123 = vmatpush1.bf16.msra.mxu0 %v1122_v31  ;;  %v1107_v63 = vpack.c.bf16 %v950_v61, %v949_v60  ;;  %v951_v2 = vld [vmem:[%s1621_s3 + $0x130] sm:$0xff]  ;;  %v952_v4 = vld [vmem:[%s1621_s3 + $0x138] sm:$0xff]  ;;  %v1140_v5 = vpack.c.bf16 %v361_v1, %v360_v0  ;;  %v955_v9 = vld [vmem:[%s1621_s3 + $0x140] sm:$0xff] }
  0x15   : > { %v320_v30 = vadd.f32 %v319_v22, %v318_v24  ;;  %1124 = vmatprep.subr.bf16.mxu0 %v1243_v3  ;;  %1093 = vmatpush1.bf16.msra.mxu1 %v1092_v33  ;;  %v1110_v6 = vpack.c.bf16 %v952_v4, %v951_v2  ;;  %v956_v10 = vld [vmem:[%s1621_s3 + $0x148] sm:$0xff]  ;;  %v957_v12 = vld [vmem:[%s1621_s3 + $0x150] sm:$0xff]  ;;  %v958_v13 = vld [vmem:[%s1621_s3 + $0x158] sm:$0xff] }
  0x16   : > { %1094 = vmatprep.subr.bf16.mxu1 %v1243_v3  ;;  %v1143_v11 = vpack.c.bf16 %v956_v10, %v955_v9  ;;  %v1146_v27 = vpack.c.bf16 %v958_v13, %v957_v12  ;;  %v960_v31 = vld [vmem:[%s1621_s3 + $0x168] sm:$0xff]  ;;  %v961_v35 = vld [vmem:[%s1621_s3 + $0x170] sm:$0xff]  ;;  %v962_v36 = vld [vmem:[%s1621_s3 + $0x178] sm:$0xff] }
  0x17   : > { %v328_v32 = vrot.slane %v320_v30, 7  ;;  %v959_v30 = vld [vmem:[%s1621_s3 + $0x160] sm:$0xff]  ;;  %v1152_v37 = vpack.c.bf16 %v962_v36, %v961_v35  ;;  %v965_v41 = vld [vmem:[%s1621_s3 + $0x190] sm:$0xff]  ;;  %v966_v42 = vld [vmem:[%s1621_s3 + $0x198] sm:$0xff] }
  0x18   : > { %1126 = vmatpush1.bf16.msra.mxu0 %v1125_v38  ;;  %v1149_v34 = vpack.c.bf16 %v960_v31, %v959_v30  ;;  %v963_v38 = vld [vmem:[%s1621_s3 + $0x180] sm:$0xff]  ;;  %v1158_v43 = vpack.c.bf16 %v966_v42, %v965_v41  ;;  %v969_v47 = vld [vmem:[%s1621_s3 + $0x1b0] sm:$0xff]  ;;  %v970_v48 = vld [vmem:[%s1621_s3 + $0x1b8] sm:$0xff] }
  0x19   : > { %329 = vrot.lane.b32.xlu0 %v328_v32, %s1245_s13  ;;  %1127 = vmatprep.subr.bf16.mxu0 %v1243_v3  ;;  %v1164_v49 = vpack.c.bf16 %v970_v48, %v969_v47  ;;  %v973_v53 = vld [vmem:[%s1621_s3 + $0x1d0] sm:$0xff]  ;;  %v974_v54 = vld [vmem:[%s1621_s3 + $0x1d8] sm:$0xff]  ;;  %v661_v61 = vld [vmem:[%s1622_s4] sm:$0xff] }
  0x1a   : > { %1096 = vmatpush1.bf16.msra.mxu1 %v1095_v39  ;;  %v964_v39 = vld [vmem:[%s1621_s3 + $0x188] sm:$0xff]  ;;  %v664_v1 = vld [vmem:[%s1622_s4 + $0x18] sm:$0xff]  ;;  %v665_v4 = vld [vmem:[%s1622_s4 + $0x20] sm:$0xff] }
  0x1b   : > { %1097 = vmatprep.subr.bf16.mxu1 %v1243_v3  ;;  %v1155_v40 = vpack.c.bf16 %v964_v39, %v963_v38  ;;  %v668_v9 = vld [vmem:[%s1622_s4 + $0x38] sm:$0xff]  ;;  %v670_v12 = vld [vmem:[%s1622_s4 + $0x48] sm:$0xff] }
  0x1c   : > { %1129 = vmatpush1.bf16.msra.mxu0 %v1128_v44  ;;  %v967_v44 = vld [vmem:[%s1621_s3 + $0x1a0] sm:$0xff] }
  0x1d   : > { %1130 = vmatprep.subr.bf16.mxu0 %v1243_v3 }
  0x1e   : > { %1099 = vmatpush1.bf16.msra.mxu1 %v1098_v45  ;;  %v968_v45 = vld [vmem:[%s1621_s3 + $0x1a8] sm:$0xff] }
  0x1f   : > { %1100 = vmatprep.subr.bf16.mxu1 %v1243_v3  ;;  %v1161_v46 = vpack.c.bf16 %v968_v45, %v967_v44 }
  0x20   : > { %1132 = vmatpush1.bf16.msra.mxu0 %v1131_v50  ;;  %v971_v50 = vld [vmem:[%s1621_s3 + $0x1c0] sm:$0xff] }
  0x21   : > { %1133 = vmatprep.subr.bf16.mxu0 %v1243_v3 }
  0x22   : > { %1102 = vmatpush1.bf16.msra.mxu1 %v1101_v51  ;;  %v972_v51 = vld [vmem:[%s1621_s3 + $0x1c8] sm:$0xff] }
  0x23   : > { %1103 = vmatprep.subr.bf16.mxu1 %v1243_v3  ;;  %v1167_v52 = vpack.c.bf16 %v972_v51, %v971_v50 }
  0x24   : > { %1135 = vmatpush1.bf16.msra.mxu0 %v1134_v56 }
  0x25   : > { %1136 = vmatprep.subr.bf16.mxu0 %v1243_v3 }
  0x26   : > { %1105 = vmatpush1.bf16.msra.mxu1 %v1104_v57  ;;  %v1170_v57 = vpack.c.bf16 %v974_v54, %v973_v53 }
  0x27   : > { %1106 = vmatprep.subr.bf16.mxu1 %v1243_v3 }
  0x28   : > { %1138 = vmatpush1.bf16.msra.mxu0 %v1137_v62  ;;  %v662_v62 = vld [vmem:[%s1622_s4 + $0x8] sm:$0xff] }
  0x29   : > { %1139 = vmatprep.subr.bf16.mxu0 %v1243_v3  ;;  %v1173_v0 = vpack.c.bf16 %v662_v62, %v661_v61 }
  0x2a   : > { %1108 = vmatpush1.bf16.msra.mxu1 %v1107_v63  ;;  %v663_v63 = vld [vmem:[%s1622_s4 + $0x10] sm:$0xff] }
  0x2b   : > { %1109 = vmatprep.subr.bf16.mxu1 %v1243_v3  ;;  %v1176_v2 = vpack.c.bf16 %v664_v1, %v663_v63 }
  0x2c   : > { %1141 = vmatpush1.bf16.msra.mxu0 %v1140_v5  ;;  %v666_v5 = vld [vmem:[%s1622_s4 + $0x28] sm:$0xff] }
  0x2d   : > { %1142 = vmatprep.subr.bf16.mxu0 %v1243_v3 }
  0x2e   : > { %1111 = vmatpush1.bf16.msra.mxu1 %v1110_v6  ;;  %v1179_v6 = vpack.c.bf16 %v666_v5, %v665_v4 }
  0x2f   : > { %1172 = vmatprep.subr.bf16.mxu1 %v1243_v3 }
  0x8b   : > { %v330_v7 = vpop.permute.xlu0 %329 }
  0x8c   : > { %333 = vst.msk [vmem:[#allocation2] sm:$0xfe] %vm332_vm2, %v330_v7 }
  0x8d   : > { %335 = vst.msk [vmem:[#allocation2 + $0x8] sm:$0xfe] %vm334_vm3, %v330_v7 }
  0x8e   : > { %337 = vst.msk [vmem:[#allocation2 + $0x10] sm:$0x1] %vm336_vm4, %v330_v7 }
  0x8f   : > { %339 = vst.msk [vmem:[#allocation2 + $0x18] sm:$0x1] %vm338_vm5, %v330_v7  ;;  %v667_v7 = vld [vmem:[%s1622_s4 + $0x30] sm:$0xff] }
  0x90   : > { %v1182_v10 = vpack.c.bf16 %v668_v9, %v667_v7 }
  0x93   : > { %v340_v15 = vld [vmem:[#allocation2] sm:$0xff] }
  0x94   : > { %v341_v14 = vld [vmem:[#allocation2 + $0x8] sm:$0xff]  ;;  %v362_v23 = vld [vmem:[#allocation2] sm:$0xfe] }
  0x95   : > { %v363_v16 = vld [vmem:[#allocation2 + $0x8] sm:$0xfe]  ;;  %954 = vmatprep.mubr.msk.f32.mxu0 %vm322_vm0, %v341_v14  ;;  %v364_v25 = vld [vmem:[#allocation2 + $0x10] sm:$0x1]  ;;  %v392_v26 = vrot.slane %v362_v23, 1 }
  0x96   : > { %v365_v17 = vld [vmem:[#allocation2 + $0x18] sm:$0x1]  ;;  %v395_v18 = vrot.slane %v363_v16, 1  ;;  %v545_v19 = vld [vmem:[#allocation2 + $0x8] sm:$0xfc]  ;;  %539 = vmatmul.mubr.f32.vlgmr.msra.gmra.mrb[0].mxu0 %v340_v15  ;;  %v393_v29 = vrot.slane %v364_v25, 1 }
  0x97   : > { %v396_v20 = vrot.slane %v365_v17, 1  ;;  %v547_v21 = vld [vmem:[#allocation2 + $0x18] sm:$0x3]  ;;  %v577_v22 = vrot.slane %v545_v19, 2  ;;  %1144 = vmatpush1.bf16.msra.mxu0 %v1143_v11  ;;  %v544_v55 = vld [vmem:[#allocation2] sm:$0xfc] }
  0x98   : > { %v578_v24 = vrot.slane %v547_v21, 2  ;;  %1145 = vmatprep.subr.bf16.mxu0 %v1243_v3  ;;  %v394_v33 = vsel %vm391_vm6, %v392_v26, %v393_v29  ;;  %v546_v56 = vld [vmem:[#allocation2 + $0x10] sm:$0x3]  ;;  %v574_v58 = vrot.slane %v544_v55, 2  ;;  %v669_v11 = vld [vmem:[%s1622_s4 + $0x40] sm:$0xff]  ;;  %v672_v15 = vld [vmem:[%s1622_s4 + $0x58] sm:$0xff] }
  0x99   : > { %v397_v28 = vsel %vm391_vm6, %v395_v18, %v396_v20  ;;  %v575_v59 = vrot.slane %v546_v56, 2  ;;  %v1185_v13 = vpack.c.bf16 %v670_v12, %v669_v11  ;;  %v671_v14 = vld [vmem:[%s1622_s4 + $0x50] sm:$0xff]  ;;  %v673_v17 = vld [vmem:[%s1622_s4 + $0x60] sm:$0xff]  ;;  %v674_v18 = vld [vmem:[%s1622_s4 + $0x68] sm:$0xff] }
  0x9a   : > { %953 = vmatprep.mubr.msk.f32.mxu1 %vm322_vm0, %v397_v28  ;;  %v579_v32 = vsel %vm573_vm7, %v577_v22, %v578_v24  ;;  %v1188_v16 = vpack.c.bf16 %v672_v15, %v671_v14  ;;  %v675_v19 = vld [vmem:[%s1622_s4 + $0x70] sm:$0xff]  ;;  %v1191_v20 = vpack.c.bf16 %v674_v18, %v673_v17  ;;  %v676_v21 = vld [vmem:[%s1622_s4 + $0x78] sm:$0xff] }
  0x9b   : > { %975 = vmatprep.mubr.msk.f32.mxu0 %vm322_vm0, %v579_v32  ;;  %466 = vmatmul.mubr.f32.vlgmr.msra.gmra.mrb[0].mxu1 %v394_v33  ;;  %v576_v60 = vsel %vm573_vm7, %v574_v58, %v575_v59  ;;  %v1194_v22 = vpack.c.bf16 %v676_v21, %v675_v19 }
  0x9c   : > { %1147 = vmatpush1.bf16.msra.mxu0 %v1146_v27  ;;  %1174 = vmatpush3.bf16.msra.mxu1 %v1173_v0 }
  0x9d   : > { %1148 = vmatprep.subr.bf16.mxu0 %v1243_v3  ;;  %1175 = vmatprep.subr.bf16.mxu1 %v1243_v3 }
  0x9e   : > { %1044 = vmatprep.mubr.msk.f32.mxu1 %vm1246_vm8, %v1244_v8 }
  0xa0   : > { %1150 = vmatpush1.bf16.msra.mxu0 %v1149_v34  ;;  %1177 = vmatpush3.bf16.msra.mxu1 %v1176_v2 }
  0xa1   : > { %1151 = vmatprep.subr.bf16.mxu0 %v1243_v3  ;;  %1178 = vmatprep.subr.bf16.mxu1 %v1243_v3 }
  0xa4   : > { %1153 = vmatpush1.bf16.msra.mxu0 %v1152_v37  ;;  %1180 = vmatpush3.bf16.msra.mxu1 %v1179_v6 }
  0xa5   : > { %1154 = vmatprep.subr.bf16.mxu0 %v1243_v3  ;;  %1181 = vmatprep.subr.bf16.mxu1 %v1243_v3 }
  0xa8   : > { %1156 = vmatpush1.bf16.msra.mxu0 %v1155_v40  ;;  %1183 = vmatpush3.bf16.msra.mxu1 %v1182_v10 }
  0xa9   : > { %1157 = vmatprep.subr.bf16.mxu0 %v1243_v3  ;;  %1184 = vmatprep.subr.bf16.mxu1 %v1243_v3 }
  0xac   : > { %1159 = vmatpush1.bf16.msra.mxu0 %v1158_v43  ;;  %1186 = vmatpush3.bf16.msra.mxu1 %v1185_v13 }
  0xad   : > { %1160 = vmatprep.subr.bf16.mxu0 %v1243_v3  ;;  %1187 = vmatprep.subr.bf16.mxu1 %v1243_v3 }
  0xb0   : > { %1162 = vmatpush1.bf16.msra.mxu0 %v1161_v46  ;;  %1189 = vmatpush3.bf16.msra.mxu1 %v1188_v16 }
  0xb1   : > { %1163 = vmatprep.subr.bf16.mxu0 %v1243_v3  ;;  %1190 = vmatprep.subr.bf16.mxu1 %v1243_v3 }
  0xb4   : > { %1165 = vmatpush1.bf16.msra.mxu0 %v1164_v49  ;;  %1192 = vmatpush3.bf16.msra.mxu1 %v1191_v20 }
  0xb5   : > { %1166 = vmatprep.subr.bf16.mxu0 %v1243_v3  ;;  %1193 = vmatprep.subr.bf16.mxu1 %v1243_v3 }
  0xb8   : > { %1168 = vmatpush1.bf16.msra.mxu0 %v1167_v52  ;;  %1195 = vmatpush3.bf16.msra.mxu1 %v1194_v22 }
  0xb9   : > { %1169 = vmatprep.subr.bf16.mxu0 %v1243_v3  ;;  %1196 = vmatprep.subr.bf16.mxu1 %v1243_v3 }
  0xbc   : > { %1171 = vmatpush1.bf16.msra.mxu0 %v1170_v57 }
  0xbf   : > { %648 = vmatmul.mubr.f32.vlgmr.msra.gmra.mrb[0].mxu0 %v576_v60 }
 0x16e   : > { %v467_v23 = vpop.f32.mrb[0].mxu1 }
 0x16f   : > { %v469_v24 = vpop.f32.mrb[1].mxu1 }
 0x192   : > { %v649_v25 = vpop.f32.mrb[0].mxu0 }
 0x193   : > { %v1220_v26 = vadd.f32 %v649_v25, %v467_v23  ;;  %v651_v27 = vpop.f32.mrb[1].mxu0 }
 0x195   : > { %654 = vst [vmem:[%s297_s8] sm:$0xff] %v1220_v26  ;;  %v655_v28 = vrot.slane %v1220_v26, 4  ;;  %v747_v34 = vmul.f32 %v1220_v26, %v1220_v26 }
 0x197   : > { %v656_v29 = vadd.f32 %v1220_v26, %v655_v28  ;;  %v748_v35 = vrot.slane %v747_v34, 4 }
 0x199   : > { %v657_v30 = vrot.slane %v656_v29, 2  ;;  %v749_v36 = vadd.f32 %v748_v35, %v747_v34 }
 0x19b   : > { %v658_v31 = vadd.f32 %v657_v30, %v656_v29  ;;  %v750_v37 = vrot.slane %v749_v36, 2 }
 0x19d   : > { %v659_v32 = vrot.slane %v658_v31, 1 }
 0x19f   : > { %v660_v33 = vadd.f32 %v659_v32, %v658_v31 }
 0x1a1   : > { %1045 = vmatmul.mubr.f32.vlgmr.msra.gmra.mrb[2].mxu1 %v660_v33 }
 0x1a2   : > { %1198 = vmatpush3.bf16.msra.mxu1 %v1173_v0  ;;  %1079 = vmatprep.mubr.msk.f32.mxu1 %vm1246_vm8, %v1244_v8  ;;  %v751_v8 = vadd.f32 %v750_v37, %v749_v36 }
 0x1a3   : > { %1199 = vmatprep.subr.bf16.mxu1 %v1243_v3 }
 0x1a4   : > { %v752_v38 = vrot.slane %v751_v8, 1 }
 0x1a6   : > { %1201 = vmatpush3.bf16.msra.mxu1 %v1176_v2  ;;  %v753_v39 = vadd.f32 %v752_v38, %v751_v8 }
 0x1a7   : > { %1202 = vmatprep.subr.bf16.mxu1 %v1243_v3 }
 0x1aa   : > { %1204 = vmatpush3.bf16.msra.mxu1 %v1179_v6 }
 0x1ab   : > { %1205 = vmatprep.subr.bf16.mxu1 %v1243_v3 }
 0x1ae   : > { %1207 = vmatpush3.bf16.msra.mxu1 %v1182_v10 }
 0x1af   : > { %1208 = vmatprep.subr.bf16.mxu1 %v1243_v3 }
 0x1b2   : > { %1210 = vmatpush3.bf16.msra.mxu1 %v1185_v13 }
 0x1b3   : > { %1211 = vmatprep.subr.bf16.mxu1 %v1243_v3 }
 0x1b6   : > { %1213 = vmatpush3.bf16.msra.mxu1 %v1188_v16 }
 0x1b7   : > { %1214 = vmatprep.subr.bf16.mxu1 %v1243_v3 }
 0x1ba   : > { %1216 = vmatpush3.bf16.msra.mxu1 %v1191_v20 }
 0x1bb   : > { %1217 = vmatprep.subr.bf16.mxu1 %v1243_v3 }
 0x1be   : > { %1219 = vmatpush3.bf16.msra.mxu1 %v1194_v22 }
 0x1c1   : > { %1080 = vmatmul.mubr.f32.vlgmr.msra.gmra.mrb[4].mxu1 %v753_v39 }
 0x274   : > { %v743_v40 = vpop.f32.mrb[2].mxu1 }
 0x275   : > { %824 = vst.msk [vmem:[%s301_s11] sm:$0x1] %vm338_vm5, %v743_v40  ;;  %v1046_v41 = vpop.f32.mrb[3].mxu1 }
 0x294   : > { %v820_v42 = vpop.f32.mrb[4].mxu1 }
 0x295   : > { %825 = vst.msk [vmem:[%s301_s11 + $0x1] sm:$0x1] %vm338_vm5, %v820_v42  ;;  %v1081_v43 = vpop.f32.mrb[5].mxu1 }
 0x296 PF: > { %s18_s24 = sadd.s32 1, %s1241_s24  }
 0x297   : > { %p15_p4 = scmp.ge.s32.totalorder %s18_s24, 4  }
 0x299   :  { %17 = sbr.rel (!%p15_p4) target bundleno = 1 (0x1), region = 91 }

// kernel: tile.108
= control target key start
LH: loop header
LB: loop body
LE: loop exit
PB: predicated region body
PF: predicated region fallthrough
CT: control target
= control target key end

     0   :  { %s22_s0 = inlined_call_operand.vmem [shape: f32[3], index: 0, kind: input, shape index: {}]   ;;  %s23_s1 = inlined_call_operand.vmem [shape: f32[8,3], index: 1, kind: output, shape index: {}]  }
   0x1   :  { %v4_v0 = vld [vmem:[%s22_s0] ss:$0 sm:$0xff] }
   0x2   :  { %5 = vst [vmem:[%s23_s1] sm:$0xff] %v4_v0 }

// kernel: tile.109
= control target key start
LH: loop header
LB: loop body
LE: loop exit
PB: predicated region body
PF: predicated region fallthrough
CT: control target
= control target key end

     0   :  { %s67_s10 = smov 21   ;;  %s68_s11 = smov 15   ;;  %vm3_vm0 = vcmask 23552   ;;  %vm9_vm1 = vcmask 195752   ;;  %vm15_vm2 = vcmask 171152   ;;  %vm21_vm3 = vcmask 146552   ;;  %s111_s0 = inlined_call_operand.vmem [shape: f32[8,3], index: 0, kind: input, shape index: {}]   ;;  %s112_s1 = inlined_call_operand.vmem [shape: f32[1,24], index: 1, kind: output, shape index: {}]  }
   0x1   :  { %v53_v0 = vld [vmem:[%s111_s0 + $0x7] sm:$0x1]   ;;  %v55_v1 = vld [vmem:[%s111_s0 + $0x5] sm:$0x1]   ;;  %v54_v2 = vld [vmem:[%s111_s0 + $0x6] sm:$0x1]  }
   0x2   :  { %7 = vrot.lane.b32.xlu0 %v53_v0, %s67_s10  ;;  %19 = vrot.lane.b32.xlu1 %v55_v1, %s68_s11  ;;  %v56_v3 = vld [vmem:[%s111_s0 + $0x4] sm:$0x1]   ;;  %v2_v4 = vld [vmem:[%s111_s0] sm:$0x1]   ;;  %s69_s18 = smov 18   ;;  %s70_s19 = smov 12  }
   0x3   :  { %4 = vst.msk [vmem:[#allocation0] sm:$0x1] %vm3_vm0, %v2_v4   ;;  %v57_v5 = vld [vmem:[%s111_s0 + $0x3] sm:$0x1]   ;;  %v58_v6 = vld [vmem:[%s111_s0 + $0x2] sm:$0x1]  }
   0x4   :  { %s71_s24 = smov 9   ;;  %s72_s25 = smov 6   ;;  %v59_v7 = vld [vmem:[%s111_s0 + $0x1] sm:$0x1]   ;;  %vm27_vm4 = vcmask 121952   ;;  %vm33_vm5 = vcmask 97352  }
   0x5   :  { %s73_s0 = smov 3   ;;  %vm39_vm6 = vcmask 72752   ;;  %vm45_vm7 = vcmask 48152  }
   0x6   :  { %13 = vrot.lane.b32.xlu0 %v54_v2, %s69_s18  ;;  %25 = vrot.lane.b32.xlu1 %v56_v3, %s70_s19 }
   0xa   :  { %31 = vrot.lane.b32.xlu0 %v57_v5, %s71_s24  ;;  %37 = vrot.lane.b32.xlu1 %v58_v6, %s72_s25 }
   0xe   :  { %43 = vrot.lane.b32.xlu0 %v59_v7, %s73_s0 }
  0x74   :  { %v8_v8 = vpop.permute.xlu0 %7   ;;  %v20_v9 = vpop.permute.xlu1 %19  }
  0x75   :  { %10 = vst.msk [vmem:[#allocation0] sm:$0x1] %vm9_vm1, %v8_v8  }
  0x78   :  { %v14_v10 = vpop.permute.xlu0 %13   ;;  %v26_v11 = vpop.permute.xlu1 %25  }
  0x79   :  { %16 = vst.msk [vmem:[#allocation0] sm:$0x1] %vm15_vm2, %v14_v10  }
  0x7a   :  { %22 = vst.msk [vmem:[#allocation0] sm:$0x1] %vm21_vm3, %v20_v9  }
  0x7b   :  { %28 = vst.msk [vmem:[#allocation0] sm:$0x1] %vm27_vm4, %v26_v11  }
  0x7c   :  { %v32_v12 = vpop.permute.xlu0 %31   ;;  %v38_v13 = vpop.permute.xlu1 %37  }
  0x7d   :  { %34 = vst.msk [vmem:[#allocation0] sm:$0x1] %vm33_vm5, %v32_v12  }
  0x7e   :  { %40 = vst.msk [vmem:[#allocation0] sm:$0x1] %vm39_vm6, %v38_v13  }
  0x80   :  { %v44_v14 = vpop.permute.xlu0 %43  }
  0x81   :  { %46 = vst.msk [vmem:[#allocation0] sm:$0x1] %vm45_vm7, %v44_v14  }
  0x88   :  { %v50_v15 = vld [vmem:[#allocation0] sm:$0x1] }
  0x89   :  { %52 = vst [vmem:[%s112_s1] sm:$0x1] %v50_v15 }

// kernel: resizer_forward.9
= control target key start
LH: loop header
LB: loop body
LE: loop exit
PB: predicated region body
PF: predicated region fallthrough
CT: control target
= control target key end

     0   :  { %s1790_s24 = smov 0   ;;  %s2534_s0 = inlined_call_operand.vmem [shape: f32[2,8,128], index: 0, kind: input, shape index: {}]   ;;  %s2535_s1 = inlined_call_operand.vmem [shape: f32[1,128], index: 1, kind: input, shape index: {}]   ;;  %s2536_s2 = inlined_call_operand.vmem [shape: f32[1,128], index: 2, kind: input, shape index: {}]   ;;  %s2537_s3 = inlined_call_operand.vmem [shape: f32[2,8,128], index: 3, kind: input, shape index: {}]   ;;  %s2538_s4 = inlined_call_operand.vmem [shape: f32[2,8,24], index: 4, kind: input, shape index: {}]   ;;  %s2539_s5 = inlined_call_operand.vmem [shape: f32[7,224,24], index: 5, kind: input, shape index: {}]   ;;  %s2540_s6 = inlined_call_operand.vmem [shape: f32[1,24], index: 6, kind: input, shape index: {}]   ;;  %s2541_s7 = inlined_call_operand.vmem [shape: f32[2,8,24], index: 7, kind: output, shape index: {}]  }
   0x1 LB: > { %s1245_s25 = sadd.s32 4294967295, %s1745_s24   ;;  %p1249_p0 = scmp.ge.s32.totalorder %s1745_s24, 1  ;;  %s1745_s24 = sphi %s1790_s24, %s17_s24  }
   0x2   : > { %p254_p1 = scmp.lt.s32.totalorder %s1745_s24, 3 }
   0x4   : > { %p255_p2 = pnand %p1249_p0, %p254_p1 }
   0x5   : > { %p292_p3 = scmp.lt.s32.totalorder (!%p255_p2), %s1245_s25, 1  ;;  %v348_v0 = vld [vmem:[%s2539_s5] sm:$0xff] (!%p255_p2)  ;;  %v349_v1 = vld [vmem:[%s2539_s5 + $0x8] sm:$0xff] (!%p255_p2)  ;;  %vm328_vm0 = vcmask (!%p255_p2), 785408   ;;  %v1747_v3 = vmov (!%p255_p2), 0.0|0.0   ;;  %v350_v6 = vld [vmem:[%s2539_s5 + $0x10] sm:$0xff] (!%p255_p2) }
   0x6   : > { %258 = sbr.rel (%p255_p2) target bundleno = 543 (0x21f), region = 48  ;;  %v1256_v2 = vld [vmem:[%s2539_s5 + $0xe0] sm:$0xff] (!%p255_p2)  ;;  %1476 = vmatprep.subr.bf16.mxu1 (!%p255_p2), %v1747_v3  ;;  %v1477_v4 = vpack.c.bf16 (!%p255_p2), %v349_v1, %v348_v0  ;;  %1434 = vmatprep.subr.bf16.mxu0 (!%p255_p2), %v1747_v3  ;;  %v1257_v5 = vld [vmem:[%s2539_s5 + $0xe8] sm:$0xff] (!%p255_p2)  ;;  %v351_v7 = vld [vmem:[%s2539_s5 + $0x18] sm:$0xff] (!%p255_p2)  ;;  %v1748_v8 = vmov (!%p255_p2), 0.0   ;;  %vm331_vm1 = vcmask (!%p255_p2), 783360  }
   0x7   : > { %327 = vst [vmem:[#allocation2] sm:$0xff] (!%p255_p2), %v1748_v8  ;;  %329 = vst.msk [vmem:[#allocation2 + $0x8] sm:$0xff] (!%p255_p2), %vm328_vm0, %v1748_v8  ;;  %v1435_v9 = vpack.c.bf16 (!%p255_p2), %v1257_v5, %v1256_v2  ;;  %v1258_v10 = vld [vmem:[%s2539_s5 + $0xf0] sm:$0xff] (!%p255_p2)  ;;  %v1259_v11 = vld [vmem:[%s2539_s5 + $0xf8] sm:$0xff] (!%p255_p2)  ;;  %v1480_v13 = vpack.c.bf16 (!%p255_p2), %v351_v7, %v350_v6  ;;  %s1749_s11 = smov (!%p255_p2), 48   ;;  %vm338_vm2 = vcmask (!%p255_p2), 1047939  }
   0x8   : > { %330 = vst [vmem:[#allocation2 + $0x10] sm:$0x3f] (!%p255_p2), %v1748_v8  ;;  %332 = vst.msk [vmem:[#allocation2 + $0x18] sm:$0x3f] (!%p255_p2), %vm331_vm1, %v1748_v8  ;;  %v1254_v12 = vld [vmem:[%s2535_s1] ss:$0 sm:$0xff] (!%p255_p2)  ;;  %1478 = vmatpush1.bf16.msra.mxu1 (!%p255_p2), %v1477_v4  ;;  %v1438_v15 = vpack.c.bf16 (!%p255_p2), %v1259_v11, %v1258_v10 }
   0x9   : > { %v1255_v14 = vld [vmem:[%s2536_s2] ss:$0 sm:$0xff] (!%p255_p2)  ;;  %1436 = vmatpush1.bf16.msra.mxu0 (!%p255_p2), %v1435_v9  ;;  %1479 = vmatprep.subr.bf16.mxu1 (!%p255_p2), %v1747_v3  ;;  %v353_v17 = vld [vmem:[%s2539_s5 + $0x28] sm:$0xff] (!%p255_p2)  ;;  %v354_v26 = vld [vmem:[%s2539_s5 + $0x30] sm:$0xff] (!%p255_p2)  ;;  %vm340_vm3 = vcmask (!%p255_p2), 392195   ;;  %vm342_vm4 = vcmask (!%p255_p2), 1042816  }
   0xa   : > { %v352_v16 = vld [vmem:[%s2539_s5 + $0x20] sm:$0xff] (!%p255_p2)  ;;  %1437 = vmatprep.subr.bf16.mxu0 (!%p255_p2), %v1747_v3  ;;  %v1261_v20 = vld [vmem:[%s2539_s5 + $0x108] sm:$0xff] (!%p255_p2)  ;;  %v355_v27 = vld [vmem:[%s2539_s5 + $0x38] sm:$0xff] (!%p255_p2)  ;;  %vm344_vm5 = vcmask (!%p255_p2), 387072   ;;  %vm413_vm6 = vcmask (!%p255_p2), 1046528   ;;  %vm721_vm7 = vcmask (!%p255_p2), 1044480  }
   0xb   : > { %v1260_v19 = vld [vmem:[%s2539_s5 + $0x100] sm:$0xff] (!%p255_p2)  ;;  %v1483_v23 = vpack.c.bf16 (!%p255_p2), %v353_v17, %v352_v16  ;;  %v1262_v28 = vld [vmem:[%s2539_s5 + $0x110] sm:$0xff] (!%p255_p2)  ;;  %v1263_v29 = vld [vmem:[%s2539_s5 + $0x118] sm:$0xff] (!%p255_p2)  ;;  %v1486_v31 = vpack.c.bf16 (!%p255_p2), %v355_v27, %v354_v26  ;;  %vm603_vm8 = vcmask (!%p255_p2), 1045504   ;;  %vm957_vm9 = vcmask (!%p255_p2), 1042432  }
   0xc   : > { %1481 = vmatpush1.bf16.msra.mxu1 (!%p255_p2), %v1480_v13  ;;  %v1441_v25 = vpack.c.bf16 (!%p255_p2), %v1261_v20, %v1260_v19  ;;  %v1444_v33 = vpack.c.bf16 (!%p255_p2), %v1263_v29, %v1262_v28  ;;  %v356_v34 = vld [vmem:[%s2539_s5 + $0x40] sm:$0xff] (!%p255_p2)  ;;  %v357_v35 = vld [vmem:[%s2539_s5 + $0x48] sm:$0xff] (!%p255_p2)  ;;  %v358_v40 = vld [vmem:[%s2539_s5 + $0x50] sm:$0xff] (!%p255_p2)  ;;  %vm839_vm10 = vcmask (!%p255_p2), 1043456   ;;  %vm1075_vm11 = vcmask (!%p255_p2), 1041408  }
   0xd   : > { %s2543_s25 = smov (!%p292_p3, %s1245_s25), 1  ;;  %1439 = vmatpush1.bf16.msra.mxu0 %v1438_v15  ;;  %1482 = vmatprep.subr.bf16.mxu1 %v1747_v3  ;;  %v1264_v36 = vld [vmem:[%s2539_s5 + $0x120] sm:$0xff]  ;;  %v1265_v37 = vld [vmem:[%s2539_s5 + $0x128] sm:$0xff]  ;;  %v1489_v38 = vpack.c.bf16 %v357_v35, %v356_v34  ;;  %v359_v41 = vld [vmem:[%s2539_s5 + $0x58] sm:$0xff]  ;;  %vm1166_vm12 = vcmask 195584  }
   0xe   : > { %s1825_s19 = sshll.u32 %s2543_s25, 3  ;;  %1440 = vmatprep.subr.bf16.mxu0 %v1747_v3  ;;  %v1447_v39 = vpack.c.bf16 %v1265_v37, %v1264_v36  ;;  %v1266_v42 = vld [vmem:[%s2539_s5 + $0x130] sm:$0xff]  ;;  %v1267_v43 = vld [vmem:[%s2539_s5 + $0x138] sm:$0xff]  ;;  %v1492_v44 = vpack.c.bf16 %v359_v41, %v358_v40  ;;  %v360_v46 = vld [vmem:[%s2539_s5 + $0x60] sm:$0xff] }
   0xf   : > { %s295_s26 = scalar_lea.vmem %s2534_s0, %s1825_s19  ;;  %s299_s29 = scalar_lea.vmem %s2537_s3, %s1825_s19  ;;  %v1450_v45 = vpack.c.bf16 %v1267_v43, %v1266_v42  ;;  %v361_v47 = vld [vmem:[%s2539_s5 + $0x68] sm:$0xff]  ;;  %v1268_v48 = vld [vmem:[%s2539_s5 + $0x140] sm:$0xff]  ;;  %v362_v52 = vld [vmem:[%s2539_s5 + $0x70] sm:$0xff] }
  0x10   : > { %v308_v18 = vld [vmem:[%s295_s26] sm:$0xff]  ;;  %1484 = vmatpush1.bf16.msra.mxu1 %v1483_v23  ;;  %v1269_v49 = vld [vmem:[%s2539_s5 + $0x148] sm:$0xff]  ;;  %v1495_v50 = vpack.c.bf16 %v361_v47, %v360_v46  ;;  %v363_v53 = vld [vmem:[%s2539_s5 + $0x78] sm:$0xff]  ;;  %s303_s9 = scalar_lea.vmem %s2538_s4, %s1825_s19  ;;  %s307_s14 = scalar_lea.vmem %s2541_s7, %s1825_s19 }
  0x11   : > { %v316_v21 = vmul.f32 %v1254_v12, %v308_v18  ;;  %v325_v22 = vld [vmem:[%s299_s29] sm:$0xff]  ;;  %1442 = vmatpush1.bf16.msra.mxu0 %v1441_v25  ;;  %1485 = vmatprep.subr.bf16.mxu1 %v1747_v3  ;;  %v1453_v51 = vpack.c.bf16 %v1269_v49, %v1268_v48  ;;  %v1270_v54 = vld [vmem:[%s2539_s5 + $0x150] sm:$0xff]  ;;  %v1271_v55 = vld [vmem:[%s2539_s5 + $0x158] sm:$0xff]  ;;  %v1498_v56 = vpack.c.bf16 %v363_v53, %v362_v52 }
  0x12   : > { %1443 = vmatprep.subr.bf16.mxu0 %v1747_v3  ;;  %v1456_v57 = vpack.c.bf16 %v1271_v55, %v1270_v54  ;;  %v364_v58 = vld [vmem:[%s2539_s5 + $0x80] sm:$0xff]  ;;  %v365_v59 = vld [vmem:[%s2539_s5 + $0x88] sm:$0xff]  ;;  %v366_v0 = vld [vmem:[%s2539_s5 + $0x90] sm:$0xff] }
  0x13   : > { %v324_v24 = vadd.f32 %v1255_v14, %v316_v21  ;;  %v1272_v60 = vld [vmem:[%s2539_s5 + $0x160] sm:$0xff]  ;;  %v1273_v61 = vld [vmem:[%s2539_s5 + $0x168] sm:$0xff]  ;;  %v1501_v62 = vpack.c.bf16 %v365_v59, %v364_v58  ;;  %v367_v1 = vld [vmem:[%s2539_s5 + $0x98] sm:$0xff] }
  0x14   : > { %1487 = vmatpush1.bf16.msra.mxu1 %v1486_v31  ;;  %v1459_v63 = vpack.c.bf16 %v1273_v61, %v1272_v60  ;;  %v1274_v2 = vld [vmem:[%s2539_s5 + $0x170] sm:$0xff]  ;;  %v1275_v4 = vld [vmem:[%s2539_s5 + $0x178] sm:$0xff]  ;;  %v1504_v5 = vpack.c.bf16 %v367_v1, %v366_v0  ;;  %v368_v7 = vld [vmem:[%s2539_s5 + $0xa0] sm:$0xff] }
  0x15   : > { %v326_v30 = vadd.f32 %v325_v22, %v324_v24  ;;  %1445 = vmatpush1.bf16.msra.mxu0 %v1444_v33  ;;  %1488 = vmatprep.subr.bf16.mxu1 %v1747_v3  ;;  %v1462_v6 = vpack.c.bf16 %v1275_v4, %v1274_v2  ;;  %v369_v8 = vld [vmem:[%s2539_s5 + $0xa8] sm:$0xff]  ;;  %v1276_v9 = vld [vmem:[%s2539_s5 + $0x180] sm:$0xff]  ;;  %v370_v13 = vld [vmem:[%s2539_s5 + $0xb0] sm:$0xff] }
  0x16   : > { %1446 = vmatprep.subr.bf16.mxu0 %v1747_v3  ;;  %v1277_v10 = vld [vmem:[%s2539_s5 + $0x188] sm:$0xff]  ;;  %v1507_v11 = vpack.c.bf16 %v369_v8, %v368_v7  ;;  %v371_v14 = vld [vmem:[%s2539_s5 + $0xb8] sm:$0xff]  ;;  %v1278_v15 = vld [vmem:[%s2539_s5 + $0x190] sm:$0xff] }
  0x17   : > { %v334_v32 = vrot.slane %v326_v30, 5  ;;  %v1465_v12 = vpack.c.bf16 %v1277_v10, %v1276_v9  ;;  %v1279_v16 = vld [vmem:[%s2539_s5 + $0x198] sm:$0xff]  ;;  %v1510_v17 = vpack.c.bf16 %v371_v14, %v370_v13  ;;  %v372_v19 = vld [vmem:[%s2539_s5 + $0xc0] sm:$0xff]  ;;  %v373_v20 = vld [vmem:[%s2539_s5 + $0xc8] sm:$0xff] }
  0x18   : > { %1490 = vmatpush1.bf16.msra.mxu1 %v1489_v38  ;;  %v1468_v18 = vpack.c.bf16 %v1279_v16, %v1278_v15  ;;  %v1280_v21 = vld [vmem:[%s2539_s5 + $0x1a0] sm:$0xff]  ;;  %v1281_v22 = vld [vmem:[%s2539_s5 + $0x1a8] sm:$0xff]  ;;  %v1513_v23 = vpack.c.bf16 %v373_v20, %v372_v19  ;;  %v374_v25 = vld [vmem:[%s2539_s5 + $0xd0] sm:$0xff] }
  0x19   : > { %335 = vrot.lane.b32.xlu0 %v334_v32, %s1749_s11  ;;  %1448 = vmatpush1.bf16.msra.mxu0 %v1447_v39  ;;  %v1471_v24 = vpack.c.bf16 %v1281_v22, %v1280_v21  ;;  %v375_v26 = vld [vmem:[%s2539_s5 + $0xd8] sm:$0xff]  ;;  %v1282_v27 = vld [vmem:[%s2539_s5 + $0x1b0] sm:$0xff]  ;;  %v1315_v32 = vld [vmem:[%s2539_s5 + $0x2a0] sm:$0xff] }
  0x1a   : > { %1491 = vmatprep.subr.bf16.mxu1 %v1747_v3  ;;  %1449 = vmatprep.subr.bf16.mxu0 %v1747_v3  ;;  %v1283_v28 = vld [vmem:[%s2539_s5 + $0x1b8] sm:$0xff]  ;;  %v1516_v29 = vpack.c.bf16 %v375_v26, %v374_v25  ;;  %v1316_v33 = vld [vmem:[%s2539_s5 + $0x2a8] sm:$0xff]  ;;  %v1286_v35 = vld [vmem:[%s2539_s5 + $0x1c0] sm:$0xff] }
  0x1b   : > { %v1474_v30 = vpack.c.bf16 %v1283_v28, %v1282_v27  ;;  %v1561_v34 = vpack.c.bf16 %v1316_v33, %v1315_v32  ;;  %v1317_v36 = vld [vmem:[%s2539_s5 + $0x2b0] sm:$0xff]  ;;  %v1318_v37 = vld [vmem:[%s2539_s5 + $0x2b8] sm:$0xff]  ;;  %v1319_v59 = vld [vmem:[%s2539_s5 + $0x2c0] sm:$0xff] }
  0x1c   : > { %1493 = vmatpush1.bf16.msra.mxu1 %v1492_v44  ;;  %v1287_v44 = vld [vmem:[%s2539_s5 + $0x1c8] sm:$0xff]  ;;  %v1564_v53 = vpack.c.bf16 %v1318_v37, %v1317_v36  ;;  %v1289_v0 = vld [vmem:[%s2539_s5 + $0x1d8] sm:$0xff]  ;;  %v1290_v8 = vld [vmem:[%s2539_s5 + $0x1e0] sm:$0xff] }
  0x1d   : > { %1451 = vmatpush1.bf16.msra.mxu0 %v1450_v45  ;;  %1494 = vmatprep.subr.bf16.mxu1 %v1747_v3  ;;  %v1320_v60 = vld [vmem:[%s2539_s5 + $0x2c8] sm:$0xff]  ;;  %v1322_v7 = vld [vmem:[%s2539_s5 + $0x2d8] sm:$0xff]  ;;  %v1292_v14 = vld [vmem:[%s2539_s5 + $0x1f0] sm:$0xff] }
  0x1e   : > { %1452 = vmatprep.subr.bf16.mxu0 %v1747_v3  ;;  %v1567_v4 = vpack.c.bf16 %v1320_v60, %v1319_v59  ;;  %v1291_v9 = vld [vmem:[%s2539_s5 + $0x1e8] sm:$0xff]  ;;  %v1293_v15 = vld [vmem:[%s2539_s5 + $0x1f8] sm:$0xff]  ;;  %v1294_v20 = vld [vmem:[%s2539_s5 + $0x200] sm:$0xff] }
  0x1f   : > { %v1324_v13 = vld [vmem:[%s2539_s5 + $0x2e8] sm:$0xff]  ;;  %v1326_v19 = vld [vmem:[%s2539_s5 + $0x2f8] sm:$0xff]  ;;  %v1296_v26 = vld [vmem:[%s2539_s5 + $0x210] sm:$0xff] }
  0x20   : > { %1496 = vmatpush1.bf16.msra.mxu1 %v1495_v50  ;;  %v1295_v21 = vld [vmem:[%s2539_s5 + $0x208] sm:$0xff]  ;;  %v1297_v27 = vld [vmem:[%s2539_s5 + $0x218] sm:$0xff]  ;;  %v1298_v32 = vld [vmem:[%s2539_s5 + $0x220] sm:$0xff] }
  0x21   : > { %1454 = vmatpush1.bf16.msra.mxu0 %v1453_v51  ;;  %1497 = vmatprep.subr.bf16.mxu1 %v1747_v3  ;;  %v1328_v25 = vld [vmem:[%s2539_s5 + $0x308] sm:$0xff]  ;;  %v1331_v36 = vld [vmem:[%s2539_s5 + $0x320] sm:$0xff] }
  0x22   : > { %1455 = vmatprep.subr.bf16.mxu0 %v1747_v3  ;;  %v1299_v33 = vld [vmem:[%s2539_s5 + $0x228] sm:$0xff]  ;;  %v1339_v60 = vld [vmem:[%s2539_s5 + $0x360] sm:$0xff] }
  0x23   : > { %v1332_v37 = vld [vmem:[%s2539_s5 + $0x328] sm:$0xff] }
  0x24   : > { %1499 = vmatpush1.bf16.msra.mxu1 %v1498_v56  ;;  %v1519_v56 = vpack.c.bf16 %v1287_v44, %v1286_v35  ;;  %v1537_v35 = vpack.c.bf16 %v1299_v33, %v1298_v32  ;;  %v1302_v44 = vld [vmem:[%s2539_s5 + $0x240] sm:$0xff] }
  0x25   : > { %1457 = vmatpush1.bf16.msra.mxu0 %v1456_v57  ;;  %1500 = vmatprep.subr.bf16.mxu1 %v1747_v3 }
  0x26   : > { %1458 = vmatprep.subr.bf16.mxu0 %v1747_v3 }
  0x28   : > { %1502 = vmatpush1.bf16.msra.mxu1 %v1501_v62 }
  0x29   : > { %1460 = vmatpush1.bf16.msra.mxu0 %v1459_v63  ;;  %1503 = vmatprep.subr.bf16.mxu1 %v1747_v3  ;;  %v1288_v63 = vld [vmem:[%s2539_s5 + $0x1d0] sm:$0xff] }
  0x2a   : > { %1461 = vmatprep.subr.bf16.mxu0 %v1747_v3 }
  0x2c   : > { %1505 = vmatpush1.bf16.msra.mxu1 %v1504_v5  ;;  %v1522_v5 = vpack.c.bf16 %v1289_v0, %v1288_v63  ;;  %v1309_v63 = vld [vmem:[%s2539_s5 + $0x278] sm:$0xff] }
  0x2d   : > { %1463 = vmatpush1.bf16.msra.mxu0 %v1462_v6  ;;  %1506 = vmatprep.subr.bf16.mxu1 %v1747_v3  ;;  %v1321_v6 = vld [vmem:[%s2539_s5 + $0x2d0] sm:$0xff] }
  0x2e   : > { %1464 = vmatprep.subr.bf16.mxu0 %v1747_v3  ;;  %v1570_v10 = vpack.c.bf16 %v1322_v7, %v1321_v6  ;;  %v1311_v6 = vld [vmem:[%s2539_s5 + $0x288] sm:$0xff] }
  0x30   : > { %1508 = vmatpush1.bf16.msra.mxu1 %v1507_v11  ;;  %v1525_v11 = vpack.c.bf16 %v1291_v9, %v1290_v8 }
  0x31   : > { %1466 = vmatpush1.bf16.msra.mxu0 %v1465_v12  ;;  %1509 = vmatprep.subr.bf16.mxu1 %v1747_v3  ;;  %v1323_v12 = vld [vmem:[%s2539_s5 + $0x2e0] sm:$0xff] }
  0x32   : > { %1467 = vmatprep.subr.bf16.mxu0 %v1747_v3  ;;  %v1573_v16 = vpack.c.bf16 %v1324_v13, %v1323_v12  ;;  %v1373_v13 = vld [vmem:[%s2539_s5 + $0x460] sm:$0xff] }
  0x34   : > { %1511 = vmatpush1.bf16.msra.mxu1 %v1510_v17  ;;  %v1528_v17 = vpack.c.bf16 %v1293_v15, %v1292_v14  ;;  %v1374_v14 = vld [vmem:[%s2539_s5 + $0x468] sm:$0xff]  ;;  %v1312_v15 = vld [vmem:[%s2539_s5 + $0x290] sm:$0xff] }
  0x35   : > { %1469 = vmatpush1.bf16.msra.mxu0 %v1468_v18  ;;  %1512 = vmatprep.subr.bf16.mxu1 %v1747_v3  ;;  %v1325_v18 = vld [vmem:[%s2539_s5 + $0x2f0] sm:$0xff] }
  0x36   : > { %1470 = vmatprep.subr.bf16.mxu0 %v1747_v3  ;;  %v1576_v22 = vpack.c.bf16 %v1326_v19, %v1325_v18 }
  0x38   : > { %1514 = vmatpush1.bf16.msra.mxu1 %v1513_v23  ;;  %v1531_v23 = vpack.c.bf16 %v1295_v21, %v1294_v20  ;;  %v1645_v21 = vpack.c.bf16 %v1374_v14, %v1373_v13  ;;  %v1389_v14 = vld [vmem:[%s2539_s5 + $0x4e0] sm:$0xff] }
  0x39   : > { %1472 = vmatpush1.bf16.msra.mxu0 %v1471_v24  ;;  %1515 = vmatprep.subr.bf16.mxu1 %v1747_v3  ;;  %v1327_v24 = vld [vmem:[%s2539_s5 + $0x300] sm:$0xff] }
  0x3a   : > { %1473 = vmatprep.subr.bf16.mxu0 %v1747_v3  ;;  %v1579_v28 = vpack.c.bf16 %v1328_v25, %v1327_v24  ;;  %v1375_v24 = vld [vmem:[%s2539_s5 + $0x470] sm:$0xff] }
  0x3c   : > { %1517 = vmatpush1.bf16.msra.mxu1 %v1516_v29  ;;  %v1534_v29 = vpack.c.bf16 %v1297_v27, %v1296_v26 }
  0x3d   : > { %1475 = vmatpush1.bf16.msra.mxu0 %v1474_v30  ;;  %1560 = vmatprep.subr.bf16.mxu1 %v1747_v3  ;;  %v1329_v30 = vld [vmem:[%s2539_s5 + $0x310] sm:$0xff] }
  0x3e   : > { %1518 = vmatprep.subr.bf16.mxu0 %v1747_v3 }
  0x8b   : > { %v336_v31 = vpop.permute.xlu0 %335 }
  0x8c   : > { %339 = vst.msk [vmem:[#allocation2] sm:$0xf8] %vm338_vm2, %v336_v31 }
  0x8d   : > { %341 = vst.msk [vmem:[#allocation2 + $0x8] sm:$0xf8] %vm340_vm3, %v336_v31 }
  0x8e   : > { %343 = vst.msk [vmem:[#allocation2 + $0x10] sm:$0x7] %vm342_vm4, %v336_v31 }
  0x8f   : > { %345 = vst.msk [vmem:[#allocation2 + $0x18] sm:$0x7] %vm344_vm5, %v336_v31  ;;  %v1330_v31 = vld [vmem:[%s2539_s5 + $0x318] sm:$0xff] }
  0x93   : > { %v346_v39 = vld [vmem:[#allocation2] sm:$0xff] }
  0x94   : > { %v347_v38 = vld [vmem:[#allocation2 + $0x8] sm:$0xff]  ;;  %v376_v48 = vld [vmem:[#allocation2] sm:$0xfe] }
  0x95   : > { %v377_v40 = vld [vmem:[#allocation2 + $0x8] sm:$0xfe]  ;;  %1285 = vmatprep.mubr.msk.f32.mxu1 %vm328_vm0, %v347_v38  ;;  %v378_v50 = vld [vmem:[#allocation2 + $0x10] sm:$0x1]  ;;  %v414_v51 = vrot.slane %v376_v48, 1  ;;  %v1335_v48 = vld [vmem:[%s2539_s5 + $0x340] sm:$0xff] }
  0x96   : > { %v379_v41 = vld [vmem:[#allocation2 + $0x18] sm:$0x1]  ;;  %v417_v42 = vrot.slane %v377_v40, 1  ;;  %v685_v43 = vld [vmem:[#allocation2 + $0x8] sm:$0xf8]  ;;  %561 = vmatmul.mubr.f32.vlgmr.msra.gmra.mrb[0].mxu1 %v346_v39  ;;  %v415_v55 = vrot.slane %v378_v50, 1  ;;  %v1585_v40 = vpack.c.bf16 %v1332_v37, %v1331_v36 }
  0x97   : > { %v418_v45 = vrot.slane %v379_v41, 1  ;;  %v687_v46 = vld [vmem:[#allocation2 + $0x18] sm:$0x7]  ;;  %v725_v47 = vrot.slane %v685_v43, 3  ;;  %1562 = vmatpush1.bf16.msra.mxu1 %v1561_v34  ;;  %v567_v52 = vld [vmem:[#allocation2 + $0x8] sm:$0xfc]  ;;  %v1582_v34 = vpack.c.bf16 %v1330_v31, %v1329_v30 }
  0x98   : > { %v726_v49 = vrot.slane %v687_v46, 3  ;;  %1563 = vmatprep.subr.bf16.mxu1 %v1747_v3  ;;  %v569_v57 = vld [vmem:[#allocation2 + $0x18] sm:$0x3]  ;;  %v607_v58 = vrot.slane %v567_v52, 2  ;;  %v416_v1 = vsel %vm413_vm6, %v414_v51, %v415_v55  ;;  %v1300_v38 = vld [vmem:[%s2539_s5 + $0x230] sm:$0xff]  ;;  %v1344_v30 = vld [vmem:[%s2539_s5 + $0x380] sm:$0xff] }
  0x99   : > { %v419_v54 = vsel %vm413_vm6, %v417_v42, %v418_v45  ;;  %v608_v62 = vrot.slane %v569_v57, 2  ;;  %v1301_v39 = vld [vmem:[%s2539_s5 + $0x238] sm:$0xff]  ;;  %v1333_v42 = vld [vmem:[%s2539_s5 + $0x330] sm:$0xff]  ;;  %v1303_v45 = vld [vmem:[%s2539_s5 + $0x248] sm:$0xff] }
  0x9a   : > { %1284 = vmatprep.mubr.msk.f32.mxu0 %vm328_vm0, %v419_v54  ;;  %v727_v61 = vsel %vm721_vm7, %v725_v47, %v726_v49  ;;  %v1540_v41 = vpack.c.bf16 %v1301_v39, %v1300_v38  ;;  %v1334_v43 = vld [vmem:[%s2539_s5 + $0x338] sm:$0xff]  ;;  %v1543_v47 = vpack.c.bf16 %v1303_v45, %v1302_v44  ;;  %v1336_v49 = vld [vmem:[%s2539_s5 + $0x348] sm:$0xff]  ;;  %v1304_v50 = vld [vmem:[%s2539_s5 + $0x250] sm:$0xff] }
  0x9b   : > { %1343 = vmatprep.mubr.msk.f32.mxu1 %vm328_vm0, %v727_v61  ;;  %488 = vmatmul.mubr.f32.vlgmr.msra.gmra.mrb[0].mxu0 %v416_v1  ;;  %v609_v2 = vsel %vm603_vm8, %v607_v58, %v608_v62  ;;  %v1588_v46 = vpack.c.bf16 %v1334_v43, %v1333_v42  ;;  %v1305_v51 = vld [vmem:[%s2539_s5 + $0x258] sm:$0xff]  ;;  %v1591_v52 = vpack.c.bf16 %v1336_v49, %v1335_v48  ;;  %v1337_v54 = vld [vmem:[%s2539_s5 + $0x350] sm:$0xff]  ;;  %v1307_v57 = vld [vmem:[%s2539_s5 + $0x268] sm:$0xff] }
  0x9c   : > { %1565 = vmatpush1.bf16.msra.mxu1 %v1564_v53  ;;  %1520 = vmatpush1.bf16.msra.mxu0 %v1519_v56  ;;  %v1546_v53 = vpack.c.bf16 %v1305_v51, %v1304_v50  ;;  %v1338_v55 = vld [vmem:[%s2539_s5 + $0x358] sm:$0xff]  ;;  %v1306_v56 = vld [vmem:[%s2539_s5 + $0x260] sm:$0xff]  ;;  %v1340_v61 = vld [vmem:[%s2539_s5 + $0x368] sm:$0xff] }
  0x9d   : > { %1314 = vmatprep.mubr.msk.f32.mxu0 %vm328_vm0, %v609_v2  ;;  %1521 = vmatprep.subr.bf16.mxu0 %v1747_v3  ;;  %v1594_v58 = vpack.c.bf16 %v1338_v55, %v1337_v54  ;;  %v1549_v59 = vpack.c.bf16 %v1307_v57, %v1306_v56  ;;  %v1308_v62 = vld [vmem:[%s2539_s5 + $0x270] sm:$0xff]  ;;  %v1597_v0 = vpack.c.bf16 %v1340_v61, %v1339_v60  ;;  %v684_v7 = vld [vmem:[#allocation2] sm:$0xf8]  ;;  %v803_v26 = vld [vmem:[#allocation2 + $0x8] sm:$0xf0] }
  0x9e   : > { %1566 = vmatprep.subr.bf16.mxu1 %v1747_v3  ;;  %v1552_v1 = vpack.c.bf16 %v1309_v63, %v1308_v62  ;;  %v1341_v2 = vld [vmem:[%s2539_s5 + $0x370] sm:$0xff]  ;;  %v805_v27 = vld [vmem:[#allocation2 + $0x18] sm:$0xf]  ;;  %v1345_v31 = vld [vmem:[%s2539_s5 + $0x388] sm:$0xff] }
  0x9f   : > { %v686_v8 = vld [vmem:[#allocation2 + $0x10] sm:$0x7]  ;;  %v844_v36 = vrot.slane %v805_v27, 4  ;;  %v1603_v38 = vpack.c.bf16 %v1345_v31, %v1344_v30  ;;  %v1377_v39 = vld [vmem:[%s2539_s5 + $0x480] sm:$0xff]  ;;  %v1347_v42 = vld [vmem:[%s2539_s5 + $0x398] sm:$0xff] }
  0xa0   : > { %1568 = vmatpush1.bf16.msra.mxu1 %v1567_v4  ;;  %1523 = vmatpush1.bf16.msra.mxu0 %v1522_v5  ;;  %v1342_v4 = vld [vmem:[%s2539_s5 + $0x378] sm:$0xff]  ;;  %v1310_v5 = vld [vmem:[%s2539_s5 + $0x280] sm:$0xff]  ;;  %v723_v18 = vrot.slane %v686_v8, 3  ;;  %v1349_v50 = vld [vmem:[%s2539_s5 + $0x3a8] sm:$0xff] }
  0xa1   : > { %1569 = vmatprep.subr.bf16.mxu1 %v1747_v3  ;;  %1524 = vmatprep.subr.bf16.mxu0 %v1747_v3  ;;  %v1600_v9 = vpack.c.bf16 %v1342_v4, %v1341_v2  ;;  %v1555_v12 = vpack.c.bf16 %v1311_v6, %v1310_v5  ;;  %v1380_v48 = vld [vmem:[%s2539_s5 + $0x498] sm:$0xff]  ;;  %v1348_v49 = vld [vmem:[%s2539_s5 + $0x3a0] sm:$0xff]  ;;  %v1382_v54 = vld [vmem:[%s2539_s5 + $0x4a8] sm:$0xff] }
  0xa2   : > { %v1350_v55 = vld [vmem:[%s2539_s5 + $0x3b0] sm:$0xff]  ;;  %v1351_v56 = vld [vmem:[%s2539_s5 + $0x3b8] sm:$0xff]  ;;  %v1352_v61 = vld [vmem:[%s2539_s5 + $0x3c0] sm:$0xff] }
  0xa3   : > { %v1384_v60 = vld [vmem:[%s2539_s5 + $0x4b8] sm:$0xff]  ;;  %v1353_v62 = vld [vmem:[%s2539_s5 + $0x3c8] sm:$0xff]  ;;  %v1354_v4 = vld [vmem:[%s2539_s5 + $0x3d0] sm:$0xff] }
  0xa4   : > { %1571 = vmatpush1.bf16.msra.mxu1 %v1570_v10  ;;  %1526 = vmatpush1.bf16.msra.mxu0 %v1525_v11  ;;  %v921_v10 = vld [vmem:[#allocation2 + $0x8] sm:$0xe0]  ;;  %v923_v11 = vld [vmem:[#allocation2 + $0x18] sm:$0x1f]  ;;  %v1387_v8 = vld [vmem:[%s2539_s5 + $0x4d0] sm:$0xff] }
  0xa5   : > { %1572 = vmatprep.subr.bf16.mxu1 %v1747_v3  ;;  %1527 = vmatprep.subr.bf16.mxu0 %v1747_v3  ;;  %v961_v19 = vrot.slane %v921_v10, 5  ;;  %v962_v20 = vrot.slane %v923_v11, 5  ;;  %v1386_v2 = vld [vmem:[%s2539_s5 + $0x4c8] sm:$0xff]  ;;  %v1355_v5 = vld [vmem:[%s2539_s5 + $0x3d8] sm:$0xff]  ;;  %v1356_v10 = vld [vmem:[%s2539_s5 + $0x3e0] sm:$0xff] }
  0xa6   : > { %v1357_v11 = vld [vmem:[%s2539_s5 + $0x3e8] sm:$0xff] }
  0xa7   : > { %v963_v32 = vsel %vm957_vm9, %v961_v19, %v962_v20  ;;  %v1621_v13 = vpack.c.bf16 %v1357_v11, %v1356_v10  ;;  %v1391_v20 = vld [vmem:[%s2539_s5 + $0x4f0] sm:$0xff]  ;;  %v1394_v27 = vld [vmem:[%s2539_s5 + $0x508] sm:$0xff]  ;;  %v1406_v11 = vld [vmem:[%s2539_s5 + $0x560] sm:$0xff] }
  0xa8   : > { %1574 = vmatpush1.bf16.msra.mxu1 %v1573_v16  ;;  %1529 = vmatpush1.bf16.msra.mxu0 %v1528_v17  ;;  %v1313_v16 = vld [vmem:[%s2539_s5 + $0x298] sm:$0xff]  ;;  %v722_v17 = vrot.slane %v684_v7, 3  ;;  %v1618_v7 = vpack.c.bf16 %v1355_v5, %v1354_v4 }
  0xa9   : > { %1575 = vmatprep.subr.bf16.mxu1 %v1747_v3  ;;  %1530 = vmatprep.subr.bf16.mxu0 %v1747_v3  ;;  %v1558_v25 = vpack.c.bf16 %v1313_v16, %v1312_v15  ;;  %v1390_v15 = vld [vmem:[%s2539_s5 + $0x4e8] sm:$0xff]  ;;  %v1358_v16 = vld [vmem:[%s2539_s5 + $0x3f0] sm:$0xff] }
  0xac   : > { %1577 = vmatpush1.bf16.msra.mxu1 %v1576_v22  ;;  %1532 = vmatpush1.bf16.msra.mxu0 %v1531_v23  ;;  %v566_v22 = vld [vmem:[#allocation2] sm:$0xfc]  ;;  %v568_v23 = vld [vmem:[#allocation2 + $0x10] sm:$0x3] }
  0xad   : > { %1578 = vmatprep.subr.bf16.mxu1 %v1747_v3  ;;  %1533 = vmatprep.subr.bf16.mxu0 %v1747_v3  ;;  %v604_v33 = vrot.slane %v566_v22, 2  ;;  %v1360_v22 = vld [vmem:[%s2539_s5 + $0x400] sm:$0xff] }
  0xb0   : > { %1580 = vmatpush1.bf16.msra.mxu1 %v1579_v28  ;;  %1535 = vmatpush1.bf16.msra.mxu0 %v1534_v29  ;;  %v1376_v28 = vld [vmem:[%s2539_s5 + $0x478] sm:$0xff]  ;;  %v724_v29 = vsel %vm721_vm7, %v722_v17, %v723_v18  ;;  %v1669_v18 = vpack.c.bf16 %v1390_v15, %v1389_v14  ;;  %v1408_v14 = vld [vmem:[%s2539_s5 + $0x570] sm:$0xff] }
  0xb1   : > { %1581 = vmatprep.subr.bf16.mxu1 %v1747_v3  ;;  %1536 = vmatprep.subr.bf16.mxu0 %v1747_v3  ;;  %v1648_v37 = vpack.c.bf16 %v1376_v28, %v1375_v24  ;;  %v1359_v17 = vld [vmem:[%s2539_s5 + $0x3f8] sm:$0xff]  ;;  %v1362_v28 = vld [vmem:[%s2539_s5 + $0x410] sm:$0xff] }
  0xb2   : > { %v1624_v19 = vpack.c.bf16 %v1359_v17, %v1358_v16  ;;  %v1409_v15 = vld [vmem:[%s2539_s5 + $0x578] sm:$0xff]  ;;  %v1410_v17 = vld [vmem:[%s2539_s5 + $0x580] sm:$0xff] }
  0xb3   : > { %v1696_v16 = vpack.c.bf16 %v1409_v15, %v1408_v14 }
  0xb4   : > { %1583 = vmatpush1.bf16.msra.mxu1 %v1582_v34  ;;  %1538 = vmatpush1.bf16.msra.mxu0 %v1537_v35  ;;  %v605_v34 = vrot.slane %v568_v23, 2  ;;  %v843_v35 = vrot.slane %v803_v26, 4  ;;  %v1361_v23 = vld [vmem:[%s2539_s5 + $0x408] sm:$0xff]  ;;  %v1393_v26 = vld [vmem:[%s2539_s5 + $0x500] sm:$0xff] }
  0xb5   : > { %1584 = vmatprep.subr.bf16.mxu1 %v1747_v3  ;;  %1539 = vmatprep.subr.bf16.mxu0 %v1747_v3  ;;  %v1675_v30 = vpack.c.bf16 %v1394_v27, %v1393_v26  ;;  %v1416_v26 = vld [vmem:[%s2539_s5 + $0x5b0] sm:$0xff]  ;;  %v1417_v27 = vld [vmem:[%s2539_s5 + $0x5b8] sm:$0xff] }
  0xb6   : > { %v606_v43 = vsel %vm603_vm8, %v604_v33, %v605_v34  ;;  %v845_v44 = vsel %vm839_vm10, %v843_v35, %v844_v36  ;;  %v1396_v33 = vld [vmem:[%s2539_s5 + $0x518] sm:$0xff]  ;;  %v1364_v34 = vld [vmem:[%s2539_s5 + $0x420] sm:$0xff]  ;;  %v1365_v35 = vld [vmem:[%s2539_s5 + $0x428] sm:$0xff] }
  0xb8   : > { %1586 = vmatpush1.bf16.msra.mxu1 %v1585_v40  ;;  %1541 = vmatpush1.bf16.msra.mxu0 %v1540_v41  ;;  %v1378_v40 = vld [vmem:[%s2539_s5 + $0x488] sm:$0xff]  ;;  %v1346_v41 = vld [vmem:[%s2539_s5 + $0x390] sm:$0xff] }
  0xb9   : > { %1587 = vmatprep.subr.bf16.mxu1 %v1747_v3  ;;  %1542 = vmatprep.subr.bf16.mxu0 %v1747_v3  ;;  %v1651_v45 = vpack.c.bf16 %v1378_v40, %v1377_v39  ;;  %v1398_v39 = vld [vmem:[%s2539_s5 + $0x528] sm:$0xff]  ;;  %v1366_v40 = vld [vmem:[%s2539_s5 + $0x430] sm:$0xff] }
  0xbc   : > { %1589 = vmatpush1.bf16.msra.mxu1 %v1588_v46  ;;  %1544 = vmatpush1.bf16.msra.mxu0 %v1543_v47  ;;  %v1606_v46 = vpack.c.bf16 %v1347_v42, %v1346_v41  ;;  %v1379_v47 = vld [vmem:[%s2539_s5 + $0x490] sm:$0xff]  ;;  %v1367_v41 = vld [vmem:[%s2539_s5 + $0x438] sm:$0xff] }
  0xbd   : > { %1590 = vmatprep.subr.bf16.mxu1 %v1747_v3  ;;  %1545 = vmatprep.subr.bf16.mxu0 %v1747_v3  ;;  %v1654_v51 = vpack.c.bf16 %v1380_v48, %v1379_v47  ;;  %v1369_v47 = vld [vmem:[%s2539_s5 + $0x448] sm:$0xff]  ;;  %v920_v48 = vld [vmem:[#allocation2] sm:$0xe0] }
  0xc0   : > { %1592 = vmatpush1.bf16.msra.mxu1 %v1591_v52  ;;  %1547 = vmatpush1.bf16.msra.mxu0 %v1546_v53  ;;  %v1609_v52 = vpack.c.bf16 %v1349_v50, %v1348_v49  ;;  %v1381_v53 = vld [vmem:[%s2539_s5 + $0x4a0] sm:$0xff]  ;;  %v922_v49 = vld [vmem:[#allocation2 + $0x10] sm:$0x1f] }
  0xc1   : > { %1593 = vmatprep.subr.bf16.mxu1 %v1747_v3  ;;  %1548 = vmatprep.subr.bf16.mxu0 %v1747_v3  ;;  %v1657_v57 = vpack.c.bf16 %v1382_v54, %v1381_v53  ;;  %v1371_v53 = vld [vmem:[%s2539_s5 + $0x458] sm:$0xff]  ;;  %v958_v54 = vrot.slane %v920_v48, 5 }
  0xc4   : > { %1595 = vmatpush1.bf16.msra.mxu1 %v1594_v58  ;;  %1550 = vmatpush1.bf16.msra.mxu0 %v1549_v59  ;;  %v1612_v58 = vpack.c.bf16 %v1351_v56, %v1350_v55  ;;  %v1383_v59 = vld [vmem:[%s2539_s5 + $0x4b0] sm:$0xff]  ;;  %v959_v55 = vrot.slane %v922_v49, 5  ;;  %v802_v56 = vld [vmem:[#allocation2] sm:$0xf0] }
  0xc5   : > { %1596 = vmatprep.subr.bf16.mxu1 %v1747_v3  ;;  %1551 = vmatprep.subr.bf16.mxu0 %v1747_v3  ;;  %v1660_v63 = vpack.c.bf16 %v1384_v60, %v1383_v59  ;;  %v1039_v59 = vld [vmem:[#allocation2 + $0x8] sm:$0xc0]  ;;  %v1041_v60 = vld [vmem:[#allocation2 + $0x18] sm:$0x3f] }
  0xc6   : > { %v1080_v4 = vrot.slane %v1041_v60, 6 }
  0xc8   : > { %1598 = vmatpush1.bf16.msra.mxu1 %v1597_v0  ;;  %1553 = vmatpush1.bf16.msra.mxu0 %v1552_v1  ;;  %v1615_v0 = vpack.c.bf16 %v1353_v62, %v1352_v61  ;;  %v1385_v1 = vld [vmem:[%s2539_s5 + $0x4c0] sm:$0xff]  ;;  %v960_v61 = vsel %vm957_vm9, %v958_v54, %v959_v55 }
  0xc9   : > { %1599 = vmatprep.subr.bf16.mxu1 %v1747_v3  ;;  %1554 = vmatprep.subr.bf16.mxu0 %v1747_v3  ;;  %v1663_v6 = vpack.c.bf16 %v1386_v2, %v1385_v1  ;;  %v1402_v62 = vld [vmem:[%s2539_s5 + $0x540] sm:$0xff]  ;;  %v1079_v2 = vrot.slane %v1039_v59, 6 }
  0xcc   : > { %1601 = vmatpush1.bf16.msra.mxu1 %v1600_v9  ;;  %1556 = vmatpush1.bf16.msra.mxu0 %v1555_v12  ;;  %v1388_v9 = vld [vmem:[%s2539_s5 + $0x4d8] sm:$0xff] }
  0xcd   : > { %1644 = vmatprep.subr.bf16.mxu1 %v1747_v3  ;;  %1557 = vmatprep.subr.bf16.mxu0 %v1747_v3  ;;  %v1666_v12 = vpack.c.bf16 %v1388_v9, %v1387_v8  ;;  %v1081_v9 = vsel %vm1075_vm11, %v1079_v2, %v1080_v4 }
  0xcf   : > { %796 = vmatmul.mubr.f32.vlgmr.msra.gmra.mrb[2].mxu1 %v724_v29  ;;  %v1363_v29 = vld [vmem:[%s2539_s5 + $0x418] sm:$0xff] }
  0xd0   : > { %1646 = vmatpush1.bf16.msra.mxu1 %v1645_v21  ;;  %1401 = vmatprep.mubr.msk.f32.mxu1 %vm328_vm0, %v963_v32  ;;  %v1392_v21 = vld [vmem:[%s2539_s5 + $0x4f8] sm:$0xff]  ;;  %v1630_v31 = vpack.c.bf16 %v1363_v29, %v1362_v28  ;;  %v1395_v32 = vld [vmem:[%s2539_s5 + $0x510] sm:$0xff]  ;;  %v1708_v28 = vpack.c.bf16 %v1417_v27, %v1416_v26  ;;  %v1418_v29 = vld [vmem:[%s2539_s5 + $0x5c0] sm:$0xff] }
  0xd1   : > { %1559 = vmatpush1.bf16.msra.mxu0 %v1558_v25  ;;  %1647 = vmatprep.subr.bf16.mxu1 %v1747_v3  ;;  %v1672_v24 = vpack.c.bf16 %v1392_v21, %v1391_v20  ;;  %v1627_v25 = vpack.c.bf16 %v1361_v23, %v1360_v22  ;;  %v1678_v36 = vpack.c.bf16 %v1396_v33, %v1395_v32  ;;  %v1412_v20 = vld [vmem:[%s2539_s5 + $0x590] sm:$0xff]  ;;  %v1413_v21 = vld [vmem:[%s2539_s5 + $0x598] sm:$0xff]  ;;  %v1414_v23 = vld [vmem:[%s2539_s5 + $0x5a0] sm:$0xff] }
  0xd2   : > { %1602 = vmatprep.subr.bf16.mxu0 %v1747_v3  ;;  %v1702_v22 = vpack.c.bf16 %v1413_v21, %v1412_v20  ;;  %v1420_v32 = vld [vmem:[%s2539_s5 + $0x5d0] sm:$0xff]  ;;  %v1421_v33 = vld [vmem:[%s2539_s5 + $0x5d8] sm:$0xff] }
  0xd4   : > { %678 = vmatmul.mubr.f32.vlgmr.msra.gmra.mrb[2].mxu0 %v606_v43  ;;  %1649 = vmatpush1.bf16.msra.mxu1 %v1648_v37  ;;  %v1633_v37 = vpack.c.bf16 %v1365_v35, %v1364_v34  ;;  %v1636_v43 = vpack.c.bf16 %v1367_v41, %v1366_v40  ;;  %v1714_v34 = vpack.c.bf16 %v1421_v33, %v1420_v32  ;;  %v1422_v35 = vld [vmem:[%s2539_s5 + $0x5e0] sm:$0xff] }
  0xd5   : > { %1604 = vmatpush1.bf16.msra.mxu0 %v1603_v38  ;;  %1372 = vmatprep.mubr.msk.f32.mxu0 %vm328_vm0, %v845_v44  ;;  %v1397_v38 = vld [vmem:[%s2539_s5 + $0x520] sm:$0xff]  ;;  %v1399_v44 = vld [vmem:[%s2539_s5 + $0x530] sm:$0xff] }
  0xd6   : > { %1605 = vmatprep.subr.bf16.mxu0 %v1747_v3  ;;  %1650 = vmatprep.subr.bf16.mxu1 %v1747_v3  ;;  %v1681_v42 = vpack.c.bf16 %v1398_v39, %v1397_v38  ;;  %v1424_v38 = vld [vmem:[%s2539_s5 + $0x5f0] sm:$0xff]  ;;  %v1425_v39 = vld [vmem:[%s2539_s5 + $0x5f8] sm:$0xff]  ;;  %v1426_v41 = vld [vmem:[%s2539_s5 + $0x600] sm:$0xff] }
  0xd7   : > { %v1720_v40 = vpack.c.bf16 %v1425_v39, %v1424_v38 }
  0xd8   : > { %1652 = vmatpush1.bf16.msra.mxu1 %v1651_v45  ;;  %v1400_v45 = vld [vmem:[%s2539_s5 + $0x538] sm:$0xff] }
  0xd9   : > { %1607 = vmatpush1.bf16.msra.mxu0 %v1606_v46  ;;  %1653 = vmatprep.subr.bf16.mxu1 %v1747_v3  ;;  %v1368_v46 = vld [vmem:[%s2539_s5 + $0x440] sm:$0xff]  ;;  %v1684_v50 = vpack.c.bf16 %v1400_v45, %v1399_v44  ;;  %v1428_v44 = vld [vmem:[%s2539_s5 + $0x610] sm:$0xff]  ;;  %v1429_v45 = vld [vmem:[%s2539_s5 + $0x618] sm:$0xff] }
  0xda   : > { %1608 = vmatprep.subr.bf16.mxu0 %v1747_v3  ;;  %v1726_v48 = vpack.c.bf16 %v1429_v45, %v1428_v44 }
  0xdc   : > { %1655 = vmatpush1.bf16.msra.mxu1 %v1654_v51  ;;  %v1639_v51 = vpack.c.bf16 %v1369_v47, %v1368_v46  ;;  %v1038_v46 = vld [vmem:[#allocation2] sm:$0xc0]  ;;  %v1040_v47 = vld [vmem:[#allocation2 + $0x10] sm:$0x3f] }
  0xdd   : > { %1610 = vmatpush1.bf16.msra.mxu0 %v1609_v52  ;;  %1656 = vmatprep.subr.bf16.mxu1 %v1747_v3  ;;  %v1370_v52 = vld [vmem:[%s2539_s5 + $0x450] sm:$0xff]  ;;  %v1076_v49 = vrot.slane %v1038_v46, 6 }
  0xde   : > { %1611 = vmatprep.subr.bf16.mxu0 %v1747_v3 }
  0xe0   : > { %1658 = vmatpush1.bf16.msra.mxu1 %v1657_v57  ;;  %v804_v57 = vld [vmem:[#allocation2 + $0x10] sm:$0xf] }
  0xe1   : > { %1613 = vmatpush1.bf16.msra.mxu0 %v1612_v58  ;;  %1659 = vmatprep.subr.bf16.mxu1 %v1747_v3  ;;  %v1642_v58 = vpack.c.bf16 %v1371_v53, %v1370_v52  ;;  %v841_v1 = vrot.slane %v804_v57, 4 }
  0xe2   : > { %1614 = vmatprep.subr.bf16.mxu0 %v1747_v3 }
  0xe4   : > { %1661 = vmatpush1.bf16.msra.mxu1 %v1660_v63  ;;  %v1403_v63 = vld [vmem:[%s2539_s5 + $0x548] sm:$0xff] }
  0xe5   : > { %1616 = vmatpush1.bf16.msra.mxu0 %v1615_v0  ;;  %1662 = vmatprep.subr.bf16.mxu1 %v1747_v3  ;;  %v840_v0 = vrot.slane %v802_v56, 4  ;;  %v1687_v5 = vpack.c.bf16 %v1403_v63, %v1402_v62 }
  0xe6   : > { %1617 = vmatprep.subr.bf16.mxu0 %v1747_v3 }
  0xe7   : > { %v842_v8 = vsel %vm839_vm10, %v840_v0, %v841_v1 }
  0xe8   : > { %1664 = vmatpush1.bf16.msra.mxu1 %v1663_v6  ;;  %v1404_v6 = vld [vmem:[%s2539_s5 + $0x550] sm:$0xff] }
  0xe9   : > { %1619 = vmatpush1.bf16.msra.mxu0 %v1618_v7  ;;  %1665 = vmatprep.subr.bf16.mxu1 %v1747_v3  ;;  %v1405_v7 = vld [vmem:[%s2539_s5 + $0x558] sm:$0xff] }
  0xea   : > { %1620 = vmatprep.subr.bf16.mxu0 %v1747_v3  ;;  %v1690_v10 = vpack.c.bf16 %v1405_v7, %v1404_v6  ;;  %v1431_v6 = vld [vmem:[%s2540_s6] ss:$0 sm:$0xff] }
  0xec   : > { %1667 = vmatpush1.bf16.msra.mxu1 %v1666_v12  ;;  %v1407_v12 = vld [vmem:[%s2539_s5 + $0x568] sm:$0xff] }
  0xed   : > { %1622 = vmatpush1.bf16.msra.mxu0 %v1621_v13  ;;  %1668 = vmatprep.subr.bf16.mxu1 %v1747_v3  ;;  %v1693_v13 = vpack.c.bf16 %v1407_v12, %v1406_v11 }
  0xee   : > { %1623 = vmatprep.subr.bf16.mxu0 %v1747_v3 }
  0xf0   : > { %1670 = vmatpush1.bf16.msra.mxu1 %v1669_v18  ;;  %v1411_v18 = vld [vmem:[%s2539_s5 + $0x588] sm:$0xff] }
  0xf1   : > { %1625 = vmatpush1.bf16.msra.mxu0 %v1624_v19  ;;  %1671 = vmatprep.subr.bf16.mxu1 %v1747_v3  ;;  %v1699_v19 = vpack.c.bf16 %v1411_v18, %v1410_v17 }
  0xf2   : > { %1626 = vmatprep.subr.bf16.mxu0 %v1747_v3 }
  0xf4   : > { %1673 = vmatpush1.bf16.msra.mxu1 %v1672_v24  ;;  %v1415_v24 = vld [vmem:[%s2539_s5 + $0x5a8] sm:$0xff] }
  0xf5   : > { %1628 = vmatpush1.bf16.msra.mxu0 %v1627_v25  ;;  %1674 = vmatprep.subr.bf16.mxu1 %v1747_v3  ;;  %v1705_v25 = vpack.c.bf16 %v1415_v24, %v1414_v23 }
  0xf6   : > { %1629 = vmatprep.subr.bf16.mxu0 %v1747_v3 }
  0xf8   : > { %1676 = vmatpush1.bf16.msra.mxu1 %v1675_v30  ;;  %v1419_v30 = vld [vmem:[%s2539_s5 + $0x5c8] sm:$0xff] }
  0xf9   : > { %1631 = vmatpush1.bf16.msra.mxu0 %v1630_v31  ;;  %1677 = vmatprep.subr.bf16.mxu1 %v1747_v3  ;;  %v1711_v31 = vpack.c.bf16 %v1419_v30, %v1418_v29 }
  0xfa   : > { %1632 = vmatprep.subr.bf16.mxu0 %v1747_v3 }
  0xfc   : > { %1679 = vmatpush1.bf16.msra.mxu1 %v1678_v36  ;;  %v1423_v36 = vld [vmem:[%s2539_s5 + $0x5e8] sm:$0xff] }
  0xfd   : > { %1634 = vmatpush1.bf16.msra.mxu0 %v1633_v37  ;;  %1680 = vmatprep.subr.bf16.mxu1 %v1747_v3  ;;  %v1717_v37 = vpack.c.bf16 %v1423_v36, %v1422_v35 }
  0xfe   : > { %1635 = vmatprep.subr.bf16.mxu0 %v1747_v3 }
 0x100   : > { %1682 = vmatpush1.bf16.msra.mxu1 %v1681_v42  ;;  %v1427_v42 = vld [vmem:[%s2539_s5 + $0x608] sm:$0xff] }
 0x101   : > { %1637 = vmatpush1.bf16.msra.mxu0 %v1636_v43  ;;  %1683 = vmatprep.subr.bf16.mxu1 %v1747_v3  ;;  %v1723_v43 = vpack.c.bf16 %v1427_v42, %v1426_v41 }
 0x102   : > { %1638 = vmatprep.subr.bf16.mxu0 %v1747_v3 }
 0x104   : > { %1685 = vmatpush1.bf16.msra.mxu1 %v1684_v50  ;;  %v1077_v50 = vrot.slane %v1040_v47, 6 }
 0x105   : > { %1640 = vmatpush1.bf16.msra.mxu0 %v1639_v51 }
 0x106   : > { %1641 = vmatprep.subr.bf16.mxu0 %v1747_v3  ;;  %v1078_v51 = vsel %vm1075_vm11, %v1076_v49, %v1077_v50 }
 0x107   : > { %1032 = vmatmul.mubr.f32.vlgmr.msra.gmra.mrb[4].mxu1 %v960_v61 }
 0x109   : > { %1643 = vmatpush1.bf16.msra.mxu0 %v1642_v58 }
 0x10a   : > { %1686 = vmatprep.subr.bf16.mxu0 %v1747_v3 }
 0x10c   : > { %914 = vmatmul.mubr.f32.vlgmr.msra.gmra.mrb[4].mxu0 %v842_v8 }
 0x10d   : > { %1688 = vmatpush1.bf16.msra.mxu0 %v1687_v5  ;;  %1430 = vmatprep.mubr.msk.f32.mxu0 %vm328_vm0, %v1081_v9  ;;  %v1164_v9 = vld [vmem:[%s303_s9] sm:$0xff] }
 0x10e   : > { %1689 = vmatprep.subr.bf16.mxu0 %v1747_v3 }
 0x111   : > { %1691 = vmatpush1.bf16.msra.mxu0 %v1690_v10 }
 0x112   : > { %1692 = vmatprep.subr.bf16.mxu0 %v1747_v3 }
 0x115   : > { %1694 = vmatpush1.bf16.msra.mxu0 %v1693_v13 }
 0x116   : > { %1695 = vmatprep.subr.bf16.mxu0 %v1747_v3 }
 0x119   : > { %1697 = vmatpush1.bf16.msra.mxu0 %v1696_v16 }
 0x11a   : > { %1698 = vmatprep.subr.bf16.mxu0 %v1747_v3 }
 0x11d   : > { %1700 = vmatpush1.bf16.msra.mxu0 %v1699_v19 }
 0x11e   : > { %1701 = vmatprep.subr.bf16.mxu0 %v1747_v3 }
 0x121   : > { %1703 = vmatpush1.bf16.msra.mxu0 %v1702_v22 }
 0x122   : > { %1704 = vmatprep.subr.bf16.mxu0 %v1747_v3 }
 0x125   : > { %1706 = vmatpush1.bf16.msra.mxu0 %v1705_v25 }
 0x126   : > { %1707 = vmatprep.subr.bf16.mxu0 %v1747_v3 }
 0x129   : > { %1709 = vmatpush1.bf16.msra.mxu0 %v1708_v28 }
 0x12a   : > { %1710 = vmatprep.subr.bf16.mxu0 %v1747_v3 }
 0x12d   : > { %1712 = vmatpush1.bf16.msra.mxu0 %v1711_v31 }
 0x12e   : > { %1713 = vmatprep.subr.bf16.mxu0 %v1747_v3 }
 0x131   : > { %1715 = vmatpush1.bf16.msra.mxu0 %v1714_v34 }
 0x132   : > { %1716 = vmatprep.subr.bf16.mxu0 %v1747_v3 }
 0x135   : > { %1718 = vmatpush1.bf16.msra.mxu0 %v1717_v37 }
 0x136   : > { %1719 = vmatprep.subr.bf16.mxu0 %v1747_v3 }
 0x139   : > { %1721 = vmatpush1.bf16.msra.mxu0 %v1720_v40 }
 0x13a   : > { %1722 = vmatprep.subr.bf16.mxu0 %v1747_v3 }
 0x13d   : > { %1724 = vmatpush1.bf16.msra.mxu0 %v1723_v43 }
 0x13e   : > { %1725 = vmatprep.subr.bf16.mxu0 %v1747_v3 }
 0x141   : > { %1727 = vmatpush1.bf16.msra.mxu0 %v1726_v48 }
 0x144   : > { %1150 = vmatmul.mubr.f32.vlgmr.msra.gmra.mrb[6].mxu0 %v1078_v51 }
 0x169   : > { %v562_v52 = vpop.f32.mrb[0].mxu1 }
 0x16a   : > { %v564_v53 = vpop.f32.mrb[1].mxu1 }
 0x16e   : > { %v489_v54 = vpop.f32.mrb[0].mxu0 }
 0x16f   : > { %v563_v55 = vadd.f32 %v562_v52, %v489_v54  ;;  %v491_v56 = vpop.f32.mrb[1].mxu0 }
 0x1a2   : > { %v797_v57 = vpop.f32.mrb[2].mxu1 }
 0x1a3   : > { %v799_v58 = vpop.f32.mrb[3].mxu1 }
 0x1a7   : > { %v679_v59 = vpop.f32.mrb[2].mxu0 }
 0x1a8   : > { %v683_v60 = vadd.f32 %v679_v59, %v563_v55  ;;  %v681_v61 = vpop.f32.mrb[3].mxu0 }
 0x1aa   : > { %v801_v62 = vadd.f32 %v797_v57, %v683_v60 }
 0x1da   : > { %v1033_v3 = vpop.f32.mrb[4].mxu1 }
 0x1db   : > { %v1035_v63 = vpop.f32.mrb[5].mxu1 }
 0x1df   : > { %v915_v0 = vpop.f32.mrb[4].mxu0 }
 0x1e0   : > { %v919_v1 = vadd.f32 %v915_v0, %v801_v62  ;;  %v917_v2 = vpop.f32.mrb[5].mxu0 }
 0x1e2   : > { %v1037_v4 = vadd.f32 %v1033_v3, %v919_v1 }
 0x217   : > { %v1151_v5 = vpop.f32.mrb[6].mxu0 }
 0x218   : > { %v1155_v7 = vadd.f32 %v1151_v5, %v1037_v4  ;;  %v1153_v8 = vpop.f32.mrb[7].mxu0 }
 0x21a   : > { %v1163_v10 = vadd.f32 %v1431_v6, %v1155_v7 }
 0x21c   : > { %v1165_v11 = vadd.f32 %v1164_v9, %v1163_v10 }
 0x21e   : > { %1167 = vst.msk [vmem:[%s307_s14] sm:$0xff] %vm1166_vm12, %v1165_v11 }
 0x21f PF: > { %s17_s24 = sadd.s32 1, %s1745_s24  }
 0x220   : > { %p14_p4 = scmp.ge.s32.totalorder %s17_s24, 4  }
 0x222   :  { %16 = sbr.rel (!%p14_p4) target bundleno = 1 (0x1), region = 90 }

</bundles_post_ra>
